<compile_context>
chip_gen: v6e
topology: v6e:2x2x1
jax: 0.10.0
libtpu: 0.0.40
codegen_flags: <defaults>
</compile_context>

<pallas_src>
import functools

import jax
import jax.numpy as jnp
from jax.experimental import pallas as pl
from jax.experimental.pallas import tpu as pltpu  # noqa: F401  (TPU backend)

# ----------------------------- tiny Llama config -----------------------------
VOCAB = 256
D = 64          # hidden size
H = 4           # attention heads
HD = D // H     # head dim
INTER = 128     # MLP intermediate
LAYERS = 2
EPS = 1e-5
ROPE_THETA = 10000.0


# --------------------------- fused forward kernel ----------------------------
def _fused_llama_kernel(ids_ref, bias_ref, cos_ref, sin_ref, embed_ref,
                        ln1_ref, wqkv_ref, wo_ref, ln2_ref, wgu_ref, wd_ref,
                        lnf_ref, lmhead_ref, logits_ref, *, B, T):
    BT = B * T

    def rms(x, w_row):
        # x: [BT, D], w_row: [1, D]
        var = jnp.mean(x * x, axis=-1, keepdims=True)
        return x * jax.lax.rsqrt(var + EPS) * w_row

    def rope(x, cos, sin):
        # x: [BT, D] (head-blocked columns); cos/sin: [BT, D]
        rot_parts = []
        for h in range(H):
            xh = x[:, h * HD:(h + 1) * HD]
            x1 = xh[:, :HD // 2]
            x2 = xh[:, HD // 2:]
            rot_parts.append(jnp.concatenate([-x2, x1], axis=-1))
        rot = jnp.concatenate(rot_parts, axis=-1)
        return x * cos + rot * sin

    # ---- embedding lookup as a one-hot matmul (gather-free, MXU-friendly) ----
    ids = ids_ref[...]                                              # [BT, 1] int32
    vocab_iota = jax.lax.broadcasted_iota(jnp.int32, (BT, VOCAB), 1)
    onehot = (vocab_iota == ids).astype(jnp.float32)                # [BT, VOCAB]
    x = jnp.dot(onehot, embed_ref[...],
                preferred_element_type=jnp.float32)                 # [BT, D]

    cos = cos_ref[...]                                              # [BT, D]
    sin = sin_ref[...]

    for l in range(LAYERS):
        # ---------------- self-attention block ----------------
        h = rms(x, ln1_ref[l])
        qkv = jnp.dot(h, wqkv_ref[l],
                      preferred_element_type=jnp.float32)           # [BT, 3D]
        q = rope(qkv[:, :D], cos, sin)          # 1/sqrt(HD) pre-folded in wqkv
        k = rope(qkv[:, D:2 * D], cos, sin)
        v = qkv[:, 2 * D:]

        attn_rows = []
        for b in range(B):
            rows = slice(b * T, (b + 1) * T)
            bias_b = bias_ref[b]                                    # [T, T]
            head_outs = []
            for hh in range(H):
                cols = slice(hh * HD, (hh + 1) * HD)
                qh = q[rows, cols]                                  # [T, HD]
                kh = k[rows, cols]
                vh = v[rows, cols]
                s = jnp.dot(qh, kh.T,
                            preferred_element_type=jnp.float32) + bias_b
                m = jnp.max(s, axis=-1, keepdims=True)
                p = jnp.exp(s - m)
                denom = jnp.sum(p, axis=-1, keepdims=True)
                p = p * pl.reciprocal(denom, approx=True)
                head_outs.append(
                    jnp.dot(p, vh, preferred_element_type=jnp.float32))
            attn_rows.append(jnp.concatenate(head_outs, axis=-1))   # [T, D]
        attn = jnp.concatenate(attn_rows, axis=0)                   # [BT, D]

        x = x + jnp.dot(attn, wo_ref[l], preferred_element_type=jnp.float32)

        # ---------------- SwiGLU MLP block ----------------
        h2 = rms(x, ln2_ref[l])
        gu = jnp.dot(h2, wgu_ref[l],
                     preferred_element_type=jnp.float32)            # [BT, 2*INTER]
        g = gu[:, :INTER]
        u = gu[:, INTER:]
        act = (g * jax.nn.sigmoid(g)) * u                           # SiLU(g) * u
        x = x + jnp.dot(act, wd_ref[l], preferred_element_type=jnp.float32)

    # ---------------- final norm + LM head ----------------
    hf = rms(x, lnf_ref[...])
    logits_ref[...] = jnp.dot(hf, lmhead_ref[...],
                              preferred_element_type=jnp.float32)   # [BT, VOCAB]


# ------------------------------- params / glue --------------------------------
def init_params(key):
    def dense(k, shape):
        return 0.02 * jax.random.normal(k, shape, dtype=jnp.float32)

    keys = jax.random.split(key, 2 + LAYERS * 7)
    scale = 1.0 / (HD ** 0.5)

    ln1s, ln2s, wqkvs, wos, wgus, wds = [], [], [], [], [], []
    for l in range(LAYERS):
        k = keys[2 + l * 7: 2 + (l + 1) * 7]
        wq = dense(k[0], (D, D)) * scale     # fold attention scale into Q proj
        wk = dense(k[1], (D, D))
        wv = dense(k[2], (D, D))
        wqkvs.append(jnp.concatenate([wq, wk, wv], axis=1))          # [D, 3D]
        wos.append(dense(k[3], (D, D)))
        wgus.append(jnp.concatenate([dense(k[4], (D, INTER)),
                                     dense(k[5], (D, INTER))], axis=1))  # [D, 2*INTER]
        wds.append(dense(k[6], (INTER, D)))
        ln1s.append(jnp.ones((1, D), jnp.float32))
        ln2s.append(jnp.ones((1, D), jnp.float32))

    return {
        "embed": dense(keys[0], (VOCAB, D)),
        "lm_head": dense(keys[1], (D, VOCAB)),
        "ln_f": jnp.ones((1, D), jnp.float32),
        "ln1": jnp.stack(ln1s),      # [L, 1, D]
        "ln2": jnp.stack(ln2s),      # [L, 1, D]
        "wqkv": jnp.stack(wqkvs),    # [L, D, 3D]
        "wo": jnp.stack(wos),        # [L, D, D]
        "wgu": jnp.stack(wgus),      # [L, D, 2*INTER]
        "wd": jnp.stack(wds),        # [L, INTER, D]
    }


def llama_forward(params, input_ids, attention_mask):
    """input_ids: [B, T] int32, attention_mask: [B, T] -> logits [B, T, VOCAB]."""
    B, T = input_ids.shape
    BT = B * T

    # RoPE cos/sin precomputed once (hoisted out of the layer loop) and tiled
    # to the in-kernel [B*T, D] head-blocked layout.
    half = HD // 2
    positions = jnp.arange(T, dtype=jnp.float32)
    inv_freq = 1.0 / (ROPE_THETA ** (jnp.arange(half, dtype=jnp.float32) / half))
    angles = positions[:, None] * inv_freq[None, :]                  # [T, half]
    cos = jnp.concatenate([jnp.cos(angles), jnp.cos(angles)], axis=-1)  # [T, HD]
    sin = jnp.concatenate([jnp.sin(angles), jnp.sin(angles)], axis=-1)
    cos_full = jnp.tile(cos, (B, H))                                 # [BT, D]
    sin_full = jnp.tile(sin, (B, H))

    # Combined causal + key-padding additive bias [B, T, T].
    causal = jnp.tril(jnp.ones((T, T), dtype=jnp.bool_))
    key_ok = attention_mask.astype(jnp.bool_)[:, None, :]            # (B, 1, T)
    allowed = jnp.logical_and(causal[None, :, :], key_ok)            # (B, T, T)
    bias = jnp.where(allowed, 0.0, -1e9).astype(jnp.float32)

    ids2 = input_ids.reshape(BT, 1).astype(jnp.int32)

    kernel = functools.partial(_fused_llama_kernel, B=B, T=T)
    logits = pl.pallas_call(
        kernel,
        out_shape=jax.ShapeDtypeStruct((BT, VOCAB), jnp.float32),
    )(ids2, bias, cos_full, sin_full, params["embed"],
      params["ln1"], params["wqkv"], params["wo"],
      params["ln2"], params["wgu"], params["wd"],
      params["ln_f"], params["lm_head"])
    return logits.reshape(B, T, VOCAB)


# TODO(synk): generate_text (autoregressive top-p/temperature sampling) is
# host-side control flow around repeated forward calls and is not reproduced.

if __name__ == "__main__":
    key = jax.random.PRNGKey(0)
    pkey, ikey = jax.random.split(key)
    params = init_params(pkey)

    B, T = 2, 8
    input_ids = jax.random.randint(ikey, (B, T), 0, VOCAB, dtype=jnp.int32)
    # batch 0 fully valid, batch 1 with last 2 positions padded
    attention_mask = jnp.array(
        [[1, 1, 1, 1, 1, 1, 1, 1],
         [1, 1, 1, 1, 1, 1, 0, 0]], dtype=jnp.int32)

    logits = jax.jit(llama_forward)(params, input_ids, attention_mask)
    jax.block_until_ready(logits)
    assert logits.shape == (B, T, VOCAB)
    assert bool(jnp.all(jnp.isfinite(logits)))
    print("KERNEL_OK")
</pallas_src>

<mosaic_0001>
module attributes {stable_mosaic.version = 11 : i64} {
  func.func @_fused_llama_kernel(%arg0: memref<16x1xi32, #tpu.memory_space<vmem>>, %arg1: memref<2x8x8xf32, #tpu.memory_space<vmem>>, %arg2: memref<16x64xf32, #tpu.memory_space<vmem>>, %arg3: memref<16x64xf32, #tpu.memory_space<vmem>>, %arg4: memref<256x64xf32, #tpu.memory_space<vmem>>, %arg5: memref<2x1x64xf32, #tpu.memory_space<vmem>>, %arg6: memref<2x64x192xf32, #tpu.memory_space<vmem>>, %arg7: memref<2x64x64xf32, #tpu.memory_space<vmem>>, %arg8: memref<2x1x64xf32, #tpu.memory_space<vmem>>, %arg9: memref<2x64x256xf32, #tpu.memory_space<vmem>>, %arg10: memref<2x128x64xf32, #tpu.memory_space<vmem>>, %arg11: memref<1x64xf32, #tpu.memory_space<vmem>>, %arg12: memref<64x256xf32, #tpu.memory_space<vmem>>, %arg13: memref<16x256xf32, #tpu.memory_space<vmem>>) attributes {dimension_semantics = [], scalar_prefetch = 0 : i64, scratch_operands = 0 : i64, tpu.core_type = #tpu.core_type<tc>} {
    %c0 = arith.constant 0 : index
    %c0_0 = arith.constant 0 : index
    %0 = vector.load %arg0[%c0, %c0_0] : memref<16x1xi32, #tpu.memory_space<vmem>>, vector<16x1xi32>
    %1 = tpu.iota {dimensions = array<i32: 1>} : vector<16x256xi32>
    %2 = vector.broadcast %0 : vector<16x1xi32> to vector<16x256xi32>
    %3 = arith.cmpi eq, %1, %2 : vector<16x256xi32>
    %4 = arith.extui %3 : vector<16x256xi1> to vector<16x256xi32>
    %5 = arith.sitofp %4 : vector<16x256xi32> to vector<16x256xf32>
    %c0_1 = arith.constant 0 : index
    %c0_2 = arith.constant 0 : index
    %6 = vector.load %arg4[%c0_1, %c0_2] : memref<256x64xf32, #tpu.memory_space<vmem>>, vector<256x64xf32>
    %cst = arith.constant dense<0.000000e+00> : vector<16x64xf32>
    %7 = tpu.matmul %5, %6, %cst {dimension_numbers = #tpu.dot_dimension_numbers<[1], [0], [0], [1], [0, 0, 1, 1], [], []>} : vector<16x256xf32>, vector<256x64xf32>, vector<16x64xf32> -> vector<16x64xf32>
    %c0_3 = arith.constant 0 : index
    %c0_4 = arith.constant 0 : index
    %8 = vector.load %arg2[%c0_3, %c0_4] : memref<16x64xf32, #tpu.memory_space<vmem>>, vector<16x64xf32>
    %c0_5 = arith.constant 0 : index
    %c0_6 = arith.constant 0 : index
    %9 = vector.load %arg3[%c0_5, %c0_6] : memref<16x64xf32, #tpu.memory_space<vmem>>, vector<16x64xf32>
    %c0_7 = arith.constant 0 : index
    %c0_8 = arith.constant 0 : index
    %c0_9 = arith.constant 0 : index
    %10 = vector.load %arg5[%c0_7, %c0_8, %c0_9] : memref<2x1x64xf32, #tpu.memory_space<vmem>>, vector<1x1x64xf32>
    %11 = vector.shape_cast %10 : vector<1x1x64xf32> to vector<1x64xf32>
    %12 = arith.mulf %7, %7 : vector<16x64xf32>
    %cst_10 = arith.constant dense<0.000000e+00> : vector<16xf32>
    %13 = vector.multi_reduction <add>, %12, %cst_10 [1] : vector<16x64xf32> to vector<16xf32>
    %14 = vector.shape_cast %13 : vector<16xf32> to vector<16x1xf32>
    %cst_11 = arith.constant 6.400000e+01 : f32
    %15 = vector.broadcast %cst_11 : f32 to vector<16x1xf32>
    %16 = arith.divf %14, %15 : vector<16x1xf32>
    %cst_12 = arith.constant 9.99999974E-6 : f32
    %17 = vector.broadcast %cst_12 : f32 to vector<16x1xf32>
    %18 = arith.addf %16, %17 : vector<16x1xf32>
    %19 = math.rsqrt %18 : vector<16x1xf32>
    %20 = vector.broadcast %19 : vector<16x1xf32> to vector<16x64xf32>
    %21 = arith.mulf %7, %20 : vector<16x64xf32>
    %22 = vector.broadcast %11 : vector<1x64xf32> to vector<16x64xf32>
    %23 = arith.mulf %21, %22 : vector<16x64xf32>
    %c0_13 = arith.constant 0 : index
    %c0_14 = arith.constant 0 : index
    %c0_15 = arith.constant 0 : index
    %24 = vector.load %arg6[%c0_13, %c0_14, %c0_15] : memref<2x64x192xf32, #tpu.memory_space<vmem>>, vector<1x64x192xf32>
    %25 = vector.shape_cast %24 : vector<1x64x192xf32> to vector<64x192xf32>
    %cst_16 = arith.constant dense<0.000000e+00> : vector<16x192xf32>
    %26 = tpu.matmul %23, %25, %cst_16 {dimension_numbers = #tpu.dot_dimension_numbers<[1], [0], [0], [1], [0, 0, 1, 1], [], []>} : vector<16x64xf32>, vector<64x192xf32>, vector<16x192xf32> -> vector<16x192xf32>
    %27 = vector.extract_strided_slice %26 {offsets = [0, 0], sizes = [16, 64], strides = [1, 1]} : vector<16x192xf32> to vector<16x64xf32>
    %28 = vector.extract_strided_slice %27 {offsets = [0, 0], sizes = [16, 16], strides = [1, 1]} : vector<16x64xf32> to vector<16x16xf32>
    %29 = vector.extract_strided_slice %28 {offsets = [0, 0], sizes = [16, 8], strides = [1, 1]} : vector<16x16xf32> to vector<16x8xf32>
    %30 = vector.extract_strided_slice %28 {offsets = [0, 8], sizes = [16, 8], strides = [1, 1]} : vector<16x16xf32> to vector<16x8xf32>
    %cst_17 = arith.constant 0.000000e+00 : f32
    %31 = vector.broadcast %cst_17 : f32 to vector<16x8xf32>
    %32 = arith.subf %31, %30 : vector<16x8xf32>
    %33 = tpu.concatenate %32, %29 in 1 : vector<16x8xf32>, vector<16x8xf32> -> vector<16x16xf32>
    %34 = vector.extract_strided_slice %27 {offsets = [0, 16], sizes = [16, 16], strides = [1, 1]} : vector<16x64xf32> to vector<16x16xf32>
    %35 = vector.extract_strided_slice %34 {offsets = [0, 0], sizes = [16, 8], strides = [1, 1]} : vector<16x16xf32> to vector<16x8xf32>
    %36 = vector.extract_strided_slice %34 {offsets = [0, 8], sizes = [16, 8], strides = [1, 1]} : vector<16x16xf32> to vector<16x8xf32>
    %cst_18 = arith.constant 0.000000e+00 : f32
    %37 = vector.broadcast %cst_18 : f32 to vector<16x8xf32>
    %38 = arith.subf %37, %36 : vector<16x8xf32>
    %39 = tpu.concatenate %38, %35 in 1 : vector<16x8xf32>, vector<16x8xf32> -> vector<16x16xf32>
    %40 = vector.extract_strided_slice %27 {offsets = [0, 32], sizes = [16, 16], strides = [1, 1]} : vector<16x64xf32> to vector<16x16xf32>
    %41 = vector.extract_strided_slice %40 {offsets = [0, 0], sizes = [16, 8], strides = [1, 1]} : vector<16x16xf32> to vector<16x8xf32>
    %42 = vector.extract_strided_slice %40 {offsets = [0, 8], sizes = [16, 8], strides = [1, 1]} : vector<16x16xf32> to vector<16x8xf32>
    %cst_19 = arith.constant 0.000000e+00 : f32
    %43 = vector.broadcast %cst_19 : f32 to vector<16x8xf32>
    %44 = arith.subf %43, %42 : vector<16x8xf32>
    %45 = tpu.concatenate %44, %41 in 1 : vector<16x8xf32>, vector<16x8xf32> -> vector<16x16xf32>
    %46 = vector.extract_strided_slice %27 {offsets = [0, 48], sizes = [16, 16], strides = [1, 1]} : vector<16x64xf32> to vector<16x16xf32>
    %47 = vector.extract_strided_slice %46 {offsets = [0, 0], sizes = [16, 8], strides = [1, 1]} : vector<16x16xf32> to vector<16x8xf32>
    %48 = vector.extract_strided_slice %46 {offsets = [0, 8], sizes = [16, 8], strides = [1, 1]} : vector<16x16xf32> to vector<16x8xf32>
    %cst_20 = arith.constant 0.000000e+00 : f32
    %49 = vector.broadcast %cst_20 : f32 to vector<16x8xf32>
    %50 = arith.subf %49, %48 : vector<16x8xf32>
    %51 = tpu.concatenate %50, %47 in 1 : vector<16x8xf32>, vector<16x8xf32> -> vector<16x16xf32>
    %52 = tpu.concatenate %33, %39, %45, %51 in 1 : vector<16x16xf32>, vector<16x16xf32>, vector<16x16xf32>, vector<16x16xf32> -> vector<16x64xf32>
    %53 = arith.mulf %27, %8 : vector<16x64xf32>
    %54 = arith.mulf %52, %9 : vector<16x64xf32>
    %55 = arith.addf %53, %54 : vector<16x64xf32>
    %56 = vector.extract_strided_slice %26 {offsets = [0, 64], sizes = [16, 64], strides = [1, 1]} : vector<16x192xf32> to vector<16x64xf32>
    %57 = vector.extract_strided_slice %56 {offsets = [0, 0], sizes = [16, 16], strides = [1, 1]} : vector<16x64xf32> to vector<16x16xf32>
    %58 = vector.extract_strided_slice %57 {offsets = [0, 0], sizes = [16, 8], strides = [1, 1]} : vector<16x16xf32> to vector<16x8xf32>
    %59 = vector.extract_strided_slice %57 {offsets = [0, 8], sizes = [16, 8], strides = [1, 1]} : vector<16x16xf32> to vector<16x8xf32>
    %cst_21 = arith.constant 0.000000e+00 : f32
    %60 = vector.broadcast %cst_21 : f32 to vector<16x8xf32>
    %61 = arith.subf %60, %59 : vector<16x8xf32>
    %62 = tpu.concatenate %61, %58 in 1 : vector<16x8xf32>, vector<16x8xf32> -> vector<16x16xf32>
    %63 = vector.extract_strided_slice %56 {offsets = [0, 16], sizes = [16, 16], strides = [1, 1]} : vector<16x64xf32> to vector<16x16xf32>
    %64 = vector.extract_strided_slice %63 {offsets = [0, 0], sizes = [16, 8], strides = [1, 1]} : vector<16x16xf32> to vector<16x8xf32>
    %65 = vector.extract_strided_slice %63 {offsets = [0, 8], sizes = [16, 8], strides = [1, 1]} : vector<16x16xf32> to vector<16x8xf32>
    %cst_22 = arith.constant 0.000000e+00 : f32
    %66 = vector.broadcast %cst_22 : f32 to vector<16x8xf32>
    %67 = arith.subf %66, %65 : vector<16x8xf32>
    %68 = tpu.concatenate %67, %64 in 1 : vector<16x8xf32>, vector<16x8xf32> -> vector<16x16xf32>
    %69 = vector.extract_strided_slice %56 {offsets = [0, 32], sizes = [16, 16], strides = [1, 1]} : vector<16x64xf32> to vector<16x16xf32>
    %70 = vector.extract_strided_slice %69 {offsets = [0, 0], sizes = [16, 8], strides = [1, 1]} : vector<16x16xf32> to vector<16x8xf32>
    %71 = vector.extract_strided_slice %69 {offsets = [0, 8], sizes = [16, 8], strides = [1, 1]} : vector<16x16xf32> to vector<16x8xf32>
    %cst_23 = arith.constant 0.000000e+00 : f32
    %72 = vector.broadcast %cst_23 : f32 to vector<16x8xf32>
    %73 = arith.subf %72, %71 : vector<16x8xf32>
    %74 = tpu.concatenate %73, %70 in 1 : vector<16x8xf32>, vector<16x8xf32> -> vector<16x16xf32>
    %75 = vector.extract_strided_slice %56 {offsets = [0, 48], sizes = [16, 16], strides = [1, 1]} : vector<16x64xf32> to vector<16x16xf32>
    %76 = vector.extract_strided_slice %75 {offsets = [0, 0], sizes = [16, 8], strides = [1, 1]} : vector<16x16xf32> to vector<16x8xf32>
    %77 = vector.extract_strided_slice %75 {offsets = [0, 8], sizes = [16, 8], strides = [1, 1]} : vector<16x16xf32> to vector<16x8xf32>
    %cst_24 = arith.constant 0.000000e+00 : f32
    %78 = vector.broadcast %cst_24 : f32 to vector<16x8xf32>
    %79 = arith.subf %78, %77 : vector<16x8xf32>
    %80 = tpu.concatenate %79, %76 in 1 : vector<16x8xf32>, vector<16x8xf32> -> vector<16x16xf32>
    %81 = tpu.concatenate %62, %68, %74, %80 in 1 : vector<16x16xf32>, vector<16x16xf32>, vector<16x16xf32>, vector<16x16xf32> -> vector<16x64xf32>
    %82 = arith.mulf %56, %8 : vector<16x64xf32>
    %83 = arith.mulf %81, %9 : vector<16x64xf32>
    %84 = arith.addf %82, %83 : vector<16x64xf32>
    %85 = vector.extract_strided_slice %26 {offsets = [0, 128], sizes = [16, 64], strides = [1, 1]} : vector<16x192xf32> to vector<16x64xf32>
    %c0_25 = arith.constant 0 : index
    %c0_26 = arith.constant 0 : index
    %c0_27 = arith.constant 0 : index
    %86 = vector.load %arg1[%c0_25, %c0_26, %c0_27] : memref<2x8x8xf32, #tpu.memory_space<vmem>>, vector<1x8x8xf32>
    %87 = vector.shape_cast %86 : vector<1x8x8xf32> to vector<8x8xf32>
    %88 = vector.extract_strided_slice %55 {offsets = [0, 0], sizes = [8, 16], strides = [1, 1]} : vector<16x64xf32> to vector<8x16xf32>
    %89 = vector.extract_strided_slice %84 {offsets = [0, 0], sizes = [8, 16], strides = [1, 1]} : vector<16x64xf32> to vector<8x16xf32>
    %90 = vector.extract_strided_slice %85 {offsets = [0, 0], sizes = [8, 16], strides = [1, 1]} : vector<16x64xf32> to vector<8x16xf32>
    %91 = tpu.transpose %89, [1, 0] : vector<8x16xf32> -> vector<16x8xf32>
    %cst_28 = arith.constant dense<0.000000e+00> : vector<8x8xf32>
    %92 = tpu.matmul %88, %91, %cst_28 {dimension_numbers = #tpu.dot_dimension_numbers<[1], [0], [0], [1], [0, 0, 1, 1], [], []>} : vector<8x16xf32>, vector<16x8xf32>, vector<8x8xf32> -> vector<8x8xf32>
    %93 = arith.addf %92, %87 : vector<8x8xf32>
    %cst_29 = arith.constant dense<0xFF800000> : vector<8xf32>
    %94 = vector.multi_reduction <maximumf>, %93, %cst_29 [1] : vector<8x8xf32> to vector<8xf32>
    %95 = vector.shape_cast %94 : vector<8xf32> to vector<8x1xf32>
    %96 = vector.broadcast %95 : vector<8x1xf32> to vector<8x8xf32>
    %97 = arith.subf %93, %96 : vector<8x8xf32>
    %98 = math.exp %97 : vector<8x8xf32>
    %cst_30 = arith.constant dense<0.000000e+00> : vector<8xf32>
    %99 = vector.multi_reduction <add>, %98, %cst_30 [1] : vector<8x8xf32> to vector<8xf32>
    %100 = vector.shape_cast %99 : vector<8xf32> to vector<8x1xf32>
    %101 = tpu.reciprocal %100 {approx = true} : vector<8x1xf32> -> vector<8x1xf32>
    %102 = vector.broadcast %101 : vector<8x1xf32> to vector<8x8xf32>
    %103 = arith.mulf %98, %102 : vector<8x8xf32>
    %cst_31 = arith.constant dense<0.000000e+00> : vector<8x16xf32>
    %104 = tpu.matmul %103, %90, %cst_31 {dimension_numbers = #tpu.dot_dimension_numbers<[1], [0], [0], [1], [0, 0, 1, 1], [], []>} : vector<8x8xf32>, vector<8x16xf32>, vector<8x16xf32> -> vector<8x16xf32>
    %105 = vector.extract_strided_slice %55 {offsets = [0, 16], sizes = [8, 16], strides = [1, 1]} : vector<16x64xf32> to vector<8x16xf32>
    %106 = vector.extract_strided_slice %84 {offsets = [0, 16], sizes = [8, 16], strides = [1, 1]} : vector<16x64xf32> to vector<8x16xf32>
    %107 = vector.extract_strided_slice %85 {offsets = [0, 16], sizes = [8, 16], strides = [1, 1]} : vector<16x64xf32> to vector<8x16xf32>
    %108 = tpu.transpose %106, [1, 0] : vector<8x16xf32> -> vector<16x8xf32>
    %cst_32 = arith.constant dense<0.000000e+00> : vector<8x8xf32>
    %109 = tpu.matmul %105, %108, %cst_32 {dimension_numbers = #tpu.dot_dimension_numbers<[1], [0], [0], [1], [0, 0, 1, 1], [], []>} : vector<8x16xf32>, vector<16x8xf32>, vector<8x8xf32> -> vector<8x8xf32>
    %110 = arith.addf %109, %87 : vector<8x8xf32>
    %cst_33 = arith.constant dense<0xFF800000> : vector<8xf32>
    %111 = vector.multi_reduction <maximumf>, %110, %cst_33 [1] : vector<8x8xf32> to vector<8xf32>
    %112 = vector.shape_cast %111 : vector<8xf32> to vector<8x1xf32>
    %113 = vector.broadcast %112 : vector<8x1xf32> to vector<8x8xf32>
    %114 = arith.subf %110, %113 : vector<8x8xf32>
    %115 = math.exp %114 : vector<8x8xf32>
    %cst_34 = arith.constant dense<0.000000e+00> : vector<8xf32>
    %116 = vector.multi_reduction <add>, %115, %cst_34 [1] : vector<8x8xf32> to vector<8xf32>
    %117 = vector.shape_cast %116 : vector<8xf32> to vector<8x1xf32>
    %118 = tpu.reciprocal %117 {approx = true} : vector<8x1xf32> -> vector<8x1xf32>
    %119 = vector.broadcast %118 : vector<8x1xf32> to vector<8x8xf32>
    %120 = arith.mulf %115, %119 : vector<8x8xf32>
    %cst_35 = arith.constant dense<0.000000e+00> : vector<8x16xf32>
    %121 = tpu.matmul %120, %107, %cst_35 {dimension_numbers = #tpu.dot_dimension_numbers<[1], [0], [0], [1], [0, 0, 1, 1], [], []>} : vector<8x8xf32>, vector<8x16xf32>, vector<8x16xf32> -> vector<8x16xf32>
    %122 = vector.extract_strided_slice %55 {offsets = [0, 32], sizes = [8, 16], strides = [1, 1]} : vector<16x64xf32> to vector<8x16xf32>
    %123 = vector.extract_strided_slice %84 {offsets = [0, 32], sizes = [8, 16], strides = [1, 1]} : vector<16x64xf32> to vector<8x16xf32>
    %124 = vector.extract_strided_slice %85 {offsets = [0, 32], sizes = [8, 16], strides = [1, 1]} : vector<16x64xf32> to vector<8x16xf32>
    %125 = tpu.transpose %123, [1, 0] : vector<8x16xf32> -> vector<16x8xf32>
    %cst_36 = arith.constant dense<0.000000e+00> : vector<8x8xf32>
    %126 = tpu.matmul %122, %125, %cst_36 {dimension_numbers = #tpu.dot_dimension_numbers<[1], [0], [0], [1], [0, 0, 1, 1], [], []>} : vector<8x16xf32>, vector<16x8xf32>, vector<8x8xf32> -> vector<8x8xf32>
    %127 = arith.addf %126, %87 : vector<8x8xf32>
    %cst_37 = arith.constant dense<0xFF800000> : vector<8xf32>
    %128 = vector.multi_reduction <maximumf>, %127, %cst_37 [1] : vector<8x8xf32> to vector<8xf32>
    %129 = vector.shape_cast %128 : vector<8xf32> to vector<8x1xf32>
    %130 = vector.broadcast %129 : vector<8x1xf32> to vector<8x8xf32>
    %131 = arith.subf %127, %130 : vector<8x8xf32>
    %132 = math.exp %131 : vector<8x8xf32>
    %cst_38 = arith.constant dense<0.000000e+00> : vector<8xf32>
    %133 = vector.multi_reduction <add>, %132, %cst_38 [1] : vector<8x8xf32> to vector<8xf32>
    %134 = vector.shape_cast %133 : vector<8xf32> to vector<8x1xf32>
    %135 = tpu.reciprocal %134 {approx = true} : vector<8x1xf32> -> vector<8x1xf32>
    %136 = vector.broadcast %135 : vector<8x1xf32> to vector<8x8xf32>
    %137 = arith.mulf %132, %136 : vector<8x8xf32>
    %cst_39 = arith.constant dense<0.000000e+00> : vector<8x16xf32>
    %138 = tpu.matmul %137, %124, %cst_39 {dimension_numbers = #tpu.dot_dimension_numbers<[1], [0], [0], [1], [0, 0, 1, 1], [], []>} : vector<8x8xf32>, vector<8x16xf32>, vector<8x16xf32> -> vector<8x16xf32>
    %139 = vector.extract_strided_slice %55 {offsets = [0, 48], sizes = [8, 16], strides = [1, 1]} : vector<16x64xf32> to vector<8x16xf32>
    %140 = vector.extract_strided_slice %84 {offsets = [0, 48], sizes = [8, 16], strides = [1, 1]} : vector<16x64xf32> to vector<8x16xf32>
    %141 = vector.extract_strided_slice %85 {offsets = [0, 48], sizes = [8, 16], strides = [1, 1]} : vector<16x64xf32> to vector<8x16xf32>
    %142 = tpu.transpose %140, [1, 0] : vector<8x16xf32> -> vector<16x8xf32>
    %cst_40 = arith.constant dense<0.000000e+00> : vector<8x8xf32>
    %143 = tpu.matmul %139, %142, %cst_40 {dimension_numbers = #tpu.dot_dimension_numbers<[1], [0], [0], [1], [0, 0, 1, 1], [], []>} : vector<8x16xf32>, vector<16x8xf32>, vector<8x8xf32> -> vector<8x8xf32>
    %144 = arith.addf %143, %87 : vector<8x8xf32>
    %cst_41 = arith.constant dense<0xFF800000> : vector<8xf32>
    %145 = vector.multi_reduction <maximumf>, %144, %cst_41 [1] : vector<8x8xf32> to vector<8xf32>
    %146 = vector.shape_cast %145 : vector<8xf32> to vector<8x1xf32>
    %147 = vector.broadcast %146 : vector<8x1xf32> to vector<8x8xf32>
    %148 = arith.subf %144, %147 : vector<8x8xf32>
    %149 = math.exp %148 : vector<8x8xf32>
    %cst_42 = arith.constant dense<0.000000e+00> : vector<8xf32>
    %150 = vector.multi_reduction <add>, %149, %cst_42 [1] : vector<8x8xf32> to vector<8xf32>
    %151 = vector.shape_cast %150 : vector<8xf32> to vector<8x1xf32>
    %152 = tpu.reciprocal %151 {approx = true} : vector<8x1xf32> -> vector<8x1xf32>
    %153 = vector.broadcast %152 : vector<8x1xf32> to vector<8x8xf32>
    %154 = arith.mulf %149, %153 : vector<8x8xf32>
    %cst_43 = arith.constant dense<0.000000e+00> : vector<8x16xf32>
    %155 = tpu.matmul %154, %141, %cst_43 {dimension_numbers = #tpu.dot_dimension_numbers<[1], [0], [0], [1], [0, 0, 1, 1], [], []>} : vector<8x8xf32>, vector<8x16xf32>, vector<8x16xf32> -> vector<8x16xf32>
    %156 = tpu.concatenate %104, %121, %138, %155 in 1 : vector<8x16xf32>, vector<8x16xf32>, vector<8x16xf32>, vector<8x16xf32> -> vector<8x64xf32>
    %c1 = arith.constant 1 : index
    %c0_44 = arith.constant 0 : index
    %c0_45 = arith.constant 0 : index
    %157 = vector.load %arg1[%c1, %c0_44, %c0_45] : memref<2x8x8xf32, #tpu.memory_space<vmem>>, vector<1x8x8xf32>
    %158 = vector.shape_cast %157 : vector<1x8x8xf32> to vector<8x8xf32>
    %159 = vector.extract_strided_slice %55 {offsets = [8, 0], sizes = [8, 16], strides = [1, 1]} : vector<16x64xf32> to vector<8x16xf32>
    %160 = vector.extract_strided_slice %84 {offsets = [8, 0], sizes = [8, 16], strides = [1, 1]} : vector<16x64xf32> to vector<8x16xf32>
    %161 = vector.extract_strided_slice %85 {offsets = [8, 0], sizes = [8, 16], strides = [1, 1]} : vector<16x64xf32> to vector<8x16xf32>
    %162 = tpu.transpose %160, [1, 0] : vector<8x16xf32> -> vector<16x8xf32>
    %cst_46 = arith.constant dense<0.000000e+00> : vector<8x8xf32>
    %163 = tpu.matmul %159, %162, %cst_46 {dimension_numbers = #tpu.dot_dimension_numbers<[1], [0], [0], [1], [0, 0, 1, 1], [], []>} : vector<8x16xf32>, vector<16x8xf32>, vector<8x8xf32> -> vector<8x8xf32>
    %164 = arith.addf %163, %158 : vector<8x8xf32>
    %cst_47 = arith.constant dense<0xFF800000> : vector<8xf32>
    %165 = vector.multi_reduction <maximumf>, %164, %cst_47 [1] : vector<8x8xf32> to vector<8xf32>
    %166 = vector.shape_cast %165 : vector<8xf32> to vector<8x1xf32>
    %167 = vector.broadcast %166 : vector<8x1xf32> to vector<8x8xf32>
    %168 = arith.subf %164, %167 : vector<8x8xf32>
    %169 = math.exp %168 : vector<8x8xf32>
    %cst_48 = arith.constant dense<0.000000e+00> : vector<8xf32>
    %170 = vector.multi_reduction <add>, %169, %cst_48 [1] : vector<8x8xf32> to vector<8xf32>
    %171 = vector.shape_cast %170 : vector<8xf32> to vector<8x1xf32>
    %172 = tpu.reciprocal %171 {approx = true} : vector<8x1xf32> -> vector<8x1xf32>
    %173 = vector.broadcast %172 : vector<8x1xf32> to vector<8x8xf32>
    %174 = arith.mulf %169, %173 : vector<8x8xf32>
    %cst_49 = arith.constant dense<0.000000e+00> : vector<8x16xf32>
    %175 = tpu.matmul %174, %161, %cst_49 {dimension_numbers = #tpu.dot_dimension_numbers<[1], [0], [0], [1], [0, 0, 1, 1], [], []>} : vector<8x8xf32>, vector<8x16xf32>, vector<8x16xf32> -> vector<8x16xf32>
    %176 = vector.extract_strided_slice %55 {offsets = [8, 16], sizes = [8, 16], strides = [1, 1]} : vector<16x64xf32> to vector<8x16xf32>
    %177 = vector.extract_strided_slice %84 {offsets = [8, 16], sizes = [8, 16], strides = [1, 1]} : vector<16x64xf32> to vector<8x16xf32>
    %178 = vector.extract_strided_slice %85 {offsets = [8, 16], sizes = [8, 16], strides = [1, 1]} : vector<16x64xf32> to vector<8x16xf32>
    %179 = tpu.transpose %177, [1, 0] : vector<8x16xf32> -> vector<16x8xf32>
    %cst_50 = arith.constant dense<0.000000e+00> : vector<8x8xf32>
    %180 = tpu.matmul %176, %179, %cst_50 {dimension_numbers = #tpu.dot_dimension_numbers<[1], [0], [0], [1], [0, 0, 1, 1], [], []>} : vector<8x16xf32>, vector<16x8xf32>, vector<8x8xf32> -> vector<8x8xf32>
    %181 = arith.addf %180, %158 : vector<8x8xf32>
    %cst_51 = arith.constant dense<0xFF800000> : vector<8xf32>
    %182 = vector.multi_reduction <maximumf>, %181, %cst_51 [1] : vector<8x8xf32> to vector<8xf32>
    %183 = vector.shape_cast %182 : vector<8xf32> to vector<8x1xf32>
    %184 = vector.broadcast %183 : vector<8x1xf32> to vector<8x8xf32>
    %185 = arith.subf %181, %184 : vector<8x8xf32>
    %186 = math.exp %185 : vector<8x8xf32>
    %cst_52 = arith.constant dense<0.000000e+00> : vector<8xf32>
    %187 = vector.multi_reduction <add>, %186, %cst_52 [1] : vector<8x8xf32> to vector<8xf32>
    %188 = vector.shape_cast %187 : vector<8xf32> to vector<8x1xf32>
    %189 = tpu.reciprocal %188 {approx = true} : vector<8x1xf32> -> vector<8x1xf32>
    %190 = vector.broadcast %189 : vector<8x1xf32> to vector<8x8xf32>
    %191 = arith.mulf %186, %190 : vector<8x8xf32>
    %cst_53 = arith.constant dense<0.000000e+00> : vector<8x16xf32>
    %192 = tpu.matmul %191, %178, %cst_53 {dimension_numbers = #tpu.dot_dimension_numbers<[1], [0], [0], [1], [0, 0, 1, 1], [], []>} : vector<8x8xf32>, vector<8x16xf32>, vector<8x16xf32> -> vector<8x16xf32>
    %193 = vector.extract_strided_slice %55 {offsets = [8, 32], sizes = [8, 16], strides = [1, 1]} : vector<16x64xf32> to vector<8x16xf32>
    %194 = vector.extract_strided_slice %84 {offsets = [8, 32], sizes = [8, 16], strides = [1, 1]} : vector<16x64xf32> to vector<8x16xf32>
    %195 = vector.extract_strided_slice %85 {offsets = [8, 32], sizes = [8, 16], strides = [1, 1]} : vector<16x64xf32> to vector<8x16xf32>
    %196 = tpu.transpose %194, [1, 0] : vector<8x16xf32> -> vector<16x8xf32>
    %cst_54 = arith.constant dense<0.000000e+00> : vector<8x8xf32>
    %197 = tpu.matmul %193, %196, %cst_54 {dimension_numbers = #tpu.dot_dimension_numbers<[1], [0], [0], [1], [0, 0, 1, 1], [], []>} : vector<8x16xf32>, vector<16x8xf32>, vector<8x8xf32> -> vector<8x8xf32>
    %198 = arith.addf %197, %158 : vector<8x8xf32>
    %cst_55 = arith.constant dense<0xFF800000> : vector<8xf32>
    %199 = vector.multi_reduction <maximumf>, %198, %cst_55 [1] : vector<8x8xf32> to vector<8xf32>
    %200 = vector.shape_cast %199 : vector<8xf32> to vector<8x1xf32>
    %201 = vector.broadcast %200 : vector<8x1xf32> to vector<8x8xf32>
    %202 = arith.subf %198, %201 : vector<8x8xf32>
    %203 = math.exp %202 : vector<8x8xf32>
    %cst_56 = arith.constant dense<0.000000e+00> : vector<8xf32>
    %204 = vector.multi_reduction <add>, %203, %cst_56 [1] : vector<8x8xf32> to vector<8xf32>
    %205 = vector.shape_cast %204 : vector<8xf32> to vector<8x1xf32>
    %206 = tpu.reciprocal %205 {approx = true} : vector<8x1xf32> -> vector<8x1xf32>
    %207 = vector.broadcast %206 : vector<8x1xf32> to vector<8x8xf32>
    %208 = arith.mulf %203, %207 : vector<8x8xf32>
    %cst_57 = arith.constant dense<0.000000e+00> : vector<8x16xf32>
    %209 = tpu.matmul %208, %195, %cst_57 {dimension_numbers = #tpu.dot_dimension_numbers<[1], [0], [0], [1], [0, 0, 1, 1], [], []>} : vector<8x8xf32>, vector<8x16xf32>, vector<8x16xf32> -> vector<8x16xf32>
    %210 = vector.extract_strided_slice %55 {offsets = [8, 48], sizes = [8, 16], strides = [1, 1]} : vector<16x64xf32> to vector<8x16xf32>
    %211 = vector.extract_strided_slice %84 {offsets = [8, 48], sizes = [8, 16], strides = [1, 1]} : vector<16x64xf32> to vector<8x16xf32>
    %212 = vector.extract_strided_slice %85 {offsets = [8, 48], sizes = [8, 16], strides = [1, 1]} : vector<16x64xf32> to vector<8x16xf32>
    %213 = tpu.transpose %211, [1, 0] : vector<8x16xf32> -> vector<16x8xf32>
    %cst_58 = arith.constant dense<0.000000e+00> : vector<8x8xf32>
    %214 = tpu.matmul %210, %213, %cst_58 {dimension_numbers = #tpu.dot_dimension_numbers<[1], [0], [0], [1], [0, 0, 1, 1], [], []>} : vector<8x16xf32>, vector<16x8xf32>, vector<8x8xf32> -> vector<8x8xf32>
    %215 = arith.addf %214, %158 : vector<8x8xf32>
    %cst_59 = arith.constant dense<0xFF800000> : vector<8xf32>
    %216 = vector.multi_reduction <maximumf>, %215, %cst_59 [1] : vector<8x8xf32> to vector<8xf32>
    %217 = vector.shape_cast %216 : vector<8xf32> to vector<8x1xf32>
    %218 = vector.broadcast %217 : vector<8x1xf32> to vector<8x8xf32>
    %219 = arith.subf %215, %218 : vector<8x8xf32>
    %220 = math.exp %219 : vector<8x8xf32>
    %cst_60 = arith.constant dense<0.000000e+00> : vector<8xf32>
    %221 = vector.multi_reduction <add>, %220, %cst_60 [1] : vector<8x8xf32> to vector<8xf32>
    %222 = vector.shape_cast %221 : vector<8xf32> to vector<8x1xf32>
    %223 = tpu.reciprocal %222 {approx = true} : vector<8x1xf32> -> vector<8x1xf32>
    %224 = vector.broadcast %223 : vector<8x1xf32> to vector<8x8xf32>
    %225 = arith.mulf %220, %224 : vector<8x8xf32>
    %cst_61 = arith.constant dense<0.000000e+00> : vector<8x16xf32>
    %226 = tpu.matmul %225, %212, %cst_61 {dimension_numbers = #tpu.dot_dimension_numbers<[1], [0], [0], [1], [0, 0, 1, 1], [], []>} : vector<8x8xf32>, vector<8x16xf32>, vector<8x16xf32> -> vector<8x16xf32>
    %227 = tpu.concatenate %175, %192, %209, %226 in 1 : vector<8x16xf32>, vector<8x16xf32>, vector<8x16xf32>, vector<8x16xf32> -> vector<8x64xf32>
    %228 = tpu.concatenate %156, %227 in 0 : vector<8x64xf32>, vector<8x64xf32> -> vector<16x64xf32>
    %c0_62 = arith.constant 0 : index
    %c0_63 = arith.constant 0 : index
    %c0_64 = arith.constant 0 : index
    %229 = vector.load %arg7[%c0_62, %c0_63, %c0_64] : memref<2x64x64xf32, #tpu.memory_space<vmem>>, vector<1x64x64xf32>
    %230 = vector.shape_cast %229 : vector<1x64x64xf32> to vector<64x64xf32>
    %cst_65 = arith.constant dense<0.000000e+00> : vector<16x64xf32>
    %231 = tpu.matmul %228, %230, %cst_65 {dimension_numbers = #tpu.dot_dimension_numbers<[1], [0], [0], [1], [0, 0, 1, 1], [], []>} : vector<16x64xf32>, vector<64x64xf32>, vector<16x64xf32> -> vector<16x64xf32>
    %232 = arith.addf %7, %231 : vector<16x64xf32>
    %c0_66 = arith.constant 0 : index
    %c0_67 = arith.constant 0 : index
    %c0_68 = arith.constant 0 : index
    %233 = vector.load %arg8[%c0_66, %c0_67, %c0_68] : memref<2x1x64xf32, #tpu.memory_space<vmem>>, vector<1x1x64xf32>
    %234 = vector.shape_cast %233 : vector<1x1x64xf32> to vector<1x64xf32>
    %235 = arith.mulf %232, %232 : vector<16x64xf32>
    %cst_69 = arith.constant dense<0.000000e+00> : vector<16xf32>
    %236 = vector.multi_reduction <add>, %235, %cst_69 [1] : vector<16x64xf32> to vector<16xf32>
    %237 = vector.shape_cast %236 : vector<16xf32> to vector<16x1xf32>
    %cst_70 = arith.constant 6.400000e+01 : f32
    %238 = vector.broadcast %cst_70 : f32 to vector<16x1xf32>
    %239 = arith.divf %237, %238 : vector<16x1xf32>
    %cst_71 = arith.constant 9.99999974E-6 : f32
    %240 = vector.broadcast %cst_71 : f32 to vector<16x1xf32>
    %241 = arith.addf %239, %240 : vector<16x1xf32>
    %242 = math.rsqrt %241 : vector<16x1xf32>
    %243 = vector.broadcast %242 : vector<16x1xf32> to vector<16x64xf32>
    %244 = arith.mulf %232, %243 : vector<16x64xf32>
    %245 = vector.broadcast %234 : vector<1x64xf32> to vector<16x64xf32>
    %246 = arith.mulf %244, %245 : vector<16x64xf32>
    %c0_72 = arith.constant 0 : index
    %c0_73 = arith.constant 0 : index
    %c0_74 = arith.constant 0 : index
    %247 = vector.load %arg9[%c0_72, %c0_73, %c0_74] : memref<2x64x256xf32, #tpu.memory_space<vmem>>, vector<1x64x256xf32>
    %248 = vector.shape_cast %247 : vector<1x64x256xf32> to vector<64x256xf32>
    %cst_75 = arith.constant dense<0.000000e+00> : vector<16x256xf32>
    %249 = tpu.matmul %246, %248, %cst_75 {dimension_numbers = #tpu.dot_dimension_numbers<[1], [0], [0], [1], [0, 0, 1, 1], [], []>} : vector<16x64xf32>, vector<64x256xf32>, vector<16x256xf32> -> vector<16x256xf32>
    %250 = vector.extract_strided_slice %249 {offsets = [0, 0], sizes = [16, 128], strides = [1, 1]} : vector<16x256xf32> to vector<16x128xf32>
    %251 = vector.extract_strided_slice %249 {offsets = [0, 128], sizes = [16, 128], strides = [1, 1]} : vector<16x256xf32> to vector<16x128xf32>
    %252 = arith.negf %250 : vector<16x128xf32>
    %253 = math.exp %252 : vector<16x128xf32>
    %cst_76 = arith.constant 1.000000e+00 : f32
    %254 = vector.broadcast %cst_76 : f32 to vector<16x128xf32>
    %255 = arith.addf %254, %253 : vector<16x128xf32>
    %256 = arith.divf %254, %255 : vector<16x128xf32>
    %257 = arith.mulf %250, %256 : vector<16x128xf32>
    %258 = arith.mulf %257, %251 : vector<16x128xf32>
    %c0_77 = arith.constant 0 : index
    %c0_78 = arith.constant 0 : index
    %c0_79 = arith.constant 0 : index
    %259 = vector.load %arg10[%c0_77, %c0_78, %c0_79] : memref<2x128x64xf32, #tpu.memory_space<vmem>>, vector<1x128x64xf32>
    %260 = vector.shape_cast %259 : vector<1x128x64xf32> to vector<128x64xf32>
    %cst_80 = arith.constant dense<0.000000e+00> : vector<16x64xf32>
    %261 = tpu.matmul %258, %260, %cst_80 {dimension_numbers = #tpu.dot_dimension_numbers<[1], [0], [0], [1], [0, 0, 1, 1], [], []>} : vector<16x128xf32>, vector<128x64xf32>, vector<16x64xf32> -> vector<16x64xf32>
    %262 = arith.addf %232, %261 : vector<16x64xf32>
    %c1_81 = arith.constant 1 : index
    %c0_82 = arith.constant 0 : index
    %c0_83 = arith.constant 0 : index
    %263 = vector.load %arg5[%c1_81, %c0_82, %c0_83] : memref<2x1x64xf32, #tpu.memory_space<vmem>>, vector<1x1x64xf32>
    %264 = vector.shape_cast %263 : vector<1x1x64xf32> to vector<1x64xf32>
    %265 = arith.mulf %262, %262 : vector<16x64xf32>
    %cst_84 = arith.constant dense<0.000000e+00> : vector<16xf32>
    %266 = vector.multi_reduction <add>, %265, %cst_84 [1] : vector<16x64xf32> to vector<16xf32>
    %267 = vector.shape_cast %266 : vector<16xf32> to vector<16x1xf32>
    %cst_85 = arith.constant 6.400000e+01 : f32
    %268 = vector.broadcast %cst_85 : f32 to vector<16x1xf32>
    %269 = arith.divf %267, %268 : vector<16x1xf32>
    %cst_86 = arith.constant 9.99999974E-6 : f32
    %270 = vector.broadcast %cst_86 : f32 to vector<16x1xf32>
    %271 = arith.addf %269, %270 : vector<16x1xf32>
    %272 = math.rsqrt %271 : vector<16x1xf32>
    %273 = vector.broadcast %272 : vector<16x1xf32> to vector<16x64xf32>
    %274 = arith.mulf %262, %273 : vector<16x64xf32>
    %275 = vector.broadcast %264 : vector<1x64xf32> to vector<16x64xf32>
    %276 = arith.mulf %274, %275 : vector<16x64xf32>
    %c1_87 = arith.constant 1 : index
    %c0_88 = arith.constant 0 : index
    %c0_89 = arith.constant 0 : index
    %277 = vector.load %arg6[%c1_87, %c0_88, %c0_89] : memref<2x64x192xf32, #tpu.memory_space<vmem>>, vector<1x64x192xf32>
    %278 = vector.shape_cast %277 : vector<1x64x192xf32> to vector<64x192xf32>
    %cst_90 = arith.constant dense<0.000000e+00> : vector<16x192xf32>
    %279 = tpu.matmul %276, %278, %cst_90 {dimension_numbers = #tpu.dot_dimension_numbers<[1], [0], [0], [1], [0, 0, 1, 1], [], []>} : vector<16x64xf32>, vector<64x192xf32>, vector<16x192xf32> -> vector<16x192xf32>
    %280 = vector.extract_strided_slice %279 {offsets = [0, 0], sizes = [16, 64], strides = [1, 1]} : vector<16x192xf32> to vector<16x64xf32>
    %281 = vector.extract_strided_slice %280 {offsets = [0, 0], sizes = [16, 16], strides = [1, 1]} : vector<16x64xf32> to vector<16x16xf32>
    %282 = vector.extract_strided_slice %281 {offsets = [0, 0], sizes = [16, 8], strides = [1, 1]} : vector<16x16xf32> to vector<16x8xf32>
    %283 = vector.extract_strided_slice %281 {offsets = [0, 8], sizes = [16, 8], strides = [1, 1]} : vector<16x16xf32> to vector<16x8xf32>
    %cst_91 = arith.constant 0.000000e+00 : f32
    %284 = vector.broadcast %cst_91 : f32 to vector<16x8xf32>
    %285 = arith.subf %284, %283 : vector<16x8xf32>
    %286 = tpu.concatenate %285, %282 in 1 : vector<16x8xf32>, vector<16x8xf32> -> vector<16x16xf32>
    %287 = vector.extract_strided_slice %280 {offsets = [0, 16], sizes = [16, 16], strides = [1, 1]} : vector<16x64xf32> to vector<16x16xf32>
    %288 = vector.extract_strided_slice %287 {offsets = [0, 0], sizes = [16, 8], strides = [1, 1]} : vector<16x16xf32> to vector<16x8xf32>
    %289 = vector.extract_strided_slice %287 {offsets = [0, 8], sizes = [16, 8], strides = [1, 1]} : vector<16x16xf32> to vector<16x8xf32>
    %cst_92 = arith.constant 0.000000e+00 : f32
    %290 = vector.broadcast %cst_92 : f32 to vector<16x8xf32>
    %291 = arith.subf %290, %289 : vector<16x8xf32>
    %292 = tpu.concatenate %291, %288 in 1 : vector<16x8xf32>, vector<16x8xf32> -> vector<16x16xf32>
    %293 = vector.extract_strided_slice %280 {offsets = [0, 32], sizes = [16, 16], strides = [1, 1]} : vector<16x64xf32> to vector<16x16xf32>
    %294 = vector.extract_strided_slice %293 {offsets = [0, 0], sizes = [16, 8], strides = [1, 1]} : vector<16x16xf32> to vector<16x8xf32>
    %295 = vector.extract_strided_slice %293 {offsets = [0, 8], sizes = [16, 8], strides = [1, 1]} : vector<16x16xf32> to vector<16x8xf32>
    %cst_93 = arith.constant 0.000000e+00 : f32
    %296 = vector.broadcast %cst_93 : f32 to vector<16x8xf32>
    %297 = arith.subf %296, %295 : vector<16x8xf32>
    %298 = tpu.concatenate %297, %294 in 1 : vector<16x8xf32>, vector<16x8xf32> -> vector<16x16xf32>
    %299 = vector.extract_strided_slice %280 {offsets = [0, 48], sizes = [16, 16], strides = [1, 1]} : vector<16x64xf32> to vector<16x16xf32>
    %300 = vector.extract_strided_slice %299 {offsets = [0, 0], sizes = [16, 8], strides = [1, 1]} : vector<16x16xf32> to vector<16x8xf32>
    %301 = vector.extract_strided_slice %299 {offsets = [0, 8], sizes = [16, 8], strides = [1, 1]} : vector<16x16xf32> to vector<16x8xf32>
    %cst_94 = arith.constant 0.000000e+00 : f32
    %302 = vector.broadcast %cst_94 : f32 to vector<16x8xf32>
    %303 = arith.subf %302, %301 : vector<16x8xf32>
    %304 = tpu.concatenate %303, %300 in 1 : vector<16x8xf32>, vector<16x8xf32> -> vector<16x16xf32>
    %305 = tpu.concatenate %286, %292, %298, %304 in 1 : vector<16x16xf32>, vector<16x16xf32>, vector<16x16xf32>, vector<16x16xf32> -> vector<16x64xf32>
    %306 = arith.mulf %280, %8 : vector<16x64xf32>
    %307 = arith.mulf %305, %9 : vector<16x64xf32>
    %308 = arith.addf %306, %307 : vector<16x64xf32>
    %309 = vector.extract_strided_slice %279 {offsets = [0, 64], sizes = [16, 64], strides = [1, 1]} : vector<16x192xf32> to vector<16x64xf32>
    %310 = vector.extract_strided_slice %309 {offsets = [0, 0], sizes = [16, 16], strides = [1, 1]} : vector<16x64xf32> to vector<16x16xf32>
    %311 = vector.extract_strided_slice %310 {offsets = [0, 0], sizes = [16, 8], strides = [1, 1]} : vector<16x16xf32> to vector<16x8xf32>
    %312 = vector.extract_strided_slice %310 {offsets = [0, 8], sizes = [16, 8], strides = [1, 1]} : vector<16x16xf32> to vector<16x8xf32>
    %cst_95 = arith.constant 0.000000e+00 : f32
    %313 = vector.broadcast %cst_95 : f32 to vector<16x8xf32>
    %314 = arith.subf %313, %312 : vector<16x8xf32>
    %315 = tpu.concatenate %314, %311 in 1 : vector<16x8xf32>, vector<16x8xf32> -> vector<16x16xf32>
    %316 = vector.extract_strided_slice %309 {offsets = [0, 16], sizes = [16, 16], strides = [1, 1]} : vector<16x64xf32> to vector<16x16xf32>
    %317 = vector.extract_strided_slice %316 {offsets = [0, 0], sizes = [16, 8], strides = [1, 1]} : vector<16x16xf32> to vector<16x8xf32>
    %318 = vector.extract_strided_slice %316 {offsets = [0, 8], sizes = [16, 8], strides = [1, 1]} : vector<16x16xf32> to vector<16x8xf32>
    %cst_96 = arith.constant 0.000000e+00 : f32
    %319 = vector.broadcast %cst_96 : f32 to vector<16x8xf32>
    %320 = arith.subf %319, %318 : vector<16x8xf32>
    %321 = tpu.concatenate %320, %317 in 1 : vector<16x8xf32>, vector<16x8xf32> -> vector<16x16xf32>
    %322 = vector.extract_strided_slice %309 {offsets = [0, 32], sizes = [16, 16], strides = [1, 1]} : vector<16x64xf32> to vector<16x16xf32>
    %323 = vector.extract_strided_slice %322 {offsets = [0, 0], sizes = [16, 8], strides = [1, 1]} : vector<16x16xf32> to vector<16x8xf32>
    %324 = vector.extract_strided_slice %322 {offsets = [0, 8], sizes = [16, 8], strides = [1, 1]} : vector<16x16xf32> to vector<16x8xf32>
    %cst_97 = arith.constant 0.000000e+00 : f32
    %325 = vector.broadcast %cst_97 : f32 to vector<16x8xf32>
    %326 = arith.subf %325, %324 : vector<16x8xf32>
    %327 = tpu.concatenate %326, %323 in 1 : vector<16x8xf32>, vector<16x8xf32> -> vector<16x16xf32>
    %328 = vector.extract_strided_slice %309 {offsets = [0, 48], sizes = [16, 16], strides = [1, 1]} : vector<16x64xf32> to vector<16x16xf32>
    %329 = vector.extract_strided_slice %328 {offsets = [0, 0], sizes = [16, 8], strides = [1, 1]} : vector<16x16xf32> to vector<16x8xf32>
    %330 = vector.extract_strided_slice %328 {offsets = [0, 8], sizes = [16, 8], strides = [1, 1]} : vector<16x16xf32> to vector<16x8xf32>
    %cst_98 = arith.constant 0.000000e+00 : f32
    %331 = vector.broadcast %cst_98 : f32 to vector<16x8xf32>
    %332 = arith.subf %331, %330 : vector<16x8xf32>
    %333 = tpu.concatenate %332, %329 in 1 : vector<16x8xf32>, vector<16x8xf32> -> vector<16x16xf32>
    %334 = tpu.concatenate %315, %321, %327, %333 in 1 : vector<16x16xf32>, vector<16x16xf32>, vector<16x16xf32>, vector<16x16xf32> -> vector<16x64xf32>
    %335 = arith.mulf %309, %8 : vector<16x64xf32>
    %336 = arith.mulf %334, %9 : vector<16x64xf32>
    %337 = arith.addf %335, %336 : vector<16x64xf32>
    %338 = vector.extract_strided_slice %279 {offsets = [0, 128], sizes = [16, 64], strides = [1, 1]} : vector<16x192xf32> to vector<16x64xf32>
    %c0_99 = arith.constant 0 : index
    %c0_100 = arith.constant 0 : index
    %c0_101 = arith.constant 0 : index
    %339 = vector.load %arg1[%c0_99, %c0_100, %c0_101] : memref<2x8x8xf32, #tpu.memory_space<vmem>>, vector<1x8x8xf32>
    %340 = vector.shape_cast %339 : vector<1x8x8xf32> to vector<8x8xf32>
    %341 = vector.extract_strided_slice %308 {offsets = [0, 0], sizes = [8, 16], strides = [1, 1]} : vector<16x64xf32> to vector<8x16xf32>
    %342 = vector.extract_strided_slice %337 {offsets = [0, 0], sizes = [8, 16], strides = [1, 1]} : vector<16x64xf32> to vector<8x16xf32>
    %343 = vector.extract_strided_slice %338 {offsets = [0, 0], sizes = [8, 16], strides = [1, 1]} : vector<16x64xf32> to vector<8x16xf32>
    %344 = tpu.transpose %342, [1, 0] : vector<8x16xf32> -> vector<16x8xf32>
    %cst_102 = arith.constant dense<0.000000e+00> : vector<8x8xf32>
    %345 = tpu.matmul %341, %344, %cst_102 {dimension_numbers = #tpu.dot_dimension_numbers<[1], [0], [0], [1], [0, 0, 1, 1], [], []>} : vector<8x16xf32>, vector<16x8xf32>, vector<8x8xf32> -> vector<8x8xf32>
    %346 = arith.addf %345, %340 : vector<8x8xf32>
    %cst_103 = arith.constant dense<0xFF800000> : vector<8xf32>
    %347 = vector.multi_reduction <maximumf>, %346, %cst_103 [1] : vector<8x8xf32> to vector<8xf32>
    %348 = vector.shape_cast %347 : vector<8xf32> to vector<8x1xf32>
    %349 = vector.broadcast %348 : vector<8x1xf32> to vector<8x8xf32>
    %350 = arith.subf %346, %349 : vector<8x8xf32>
    %351 = math.exp %350 : vector<8x8xf32>
    %cst_104 = arith.constant dense<0.000000e+00> : vector<8xf32>
    %352 = vector.multi_reduction <add>, %351, %cst_104 [1] : vector<8x8xf32> to vector<8xf32>
    %353 = vector.shape_cast %352 : vector<8xf32> to vector<8x1xf32>
    %354 = tpu.reciprocal %353 {approx = true} : vector<8x1xf32> -> vector<8x1xf32>
    %355 = vector.broadcast %354 : vector<8x1xf32> to vector<8x8xf32>
    %356 = arith.mulf %351, %355 : vector<8x8xf32>
    %cst_105 = arith.constant dense<0.000000e+00> : vector<8x16xf32>
    %357 = tpu.matmul %356, %343, %cst_105 {dimension_numbers = #tpu.dot_dimension_numbers<[1], [0], [0], [1], [0, 0, 1, 1], [], []>} : vector<8x8xf32>, vector<8x16xf32>, vector<8x16xf32> -> vector<8x16xf32>
    %358 = vector.extract_strided_slice %308 {offsets = [0, 16], sizes = [8, 16], strides = [1, 1]} : vector<16x64xf32> to vector<8x16xf32>
    %359 = vector.extract_strided_slice %337 {offsets = [0, 16], sizes = [8, 16], strides = [1, 1]} : vector<16x64xf32> to vector<8x16xf32>
    %360 = vector.extract_strided_slice %338 {offsets = [0, 16], sizes = [8, 16], strides = [1, 1]} : vector<16x64xf32> to vector<8x16xf32>
    %361 = tpu.transpose %359, [1, 0] : vector<8x16xf32> -> vector<16x8xf32>
    %cst_106 = arith.constant dense<0.000000e+00> : vector<8x8xf32>
    %362 = tpu.matmul %358, %361, %cst_106 {dimension_numbers = #tpu.dot_dimension_numbers<[1], [0], [0], [1], [0, 0, 1, 1], [], []>} : vector<8x16xf32>, vector<16x8xf32>, vector<8x8xf32> -> vector<8x8xf32>
    %363 = arith.addf %362, %340 : vector<8x8xf32>
    %cst_107 = arith.constant dense<0xFF800000> : vector<8xf32>
    %364 = vector.multi_reduction <maximumf>, %363, %cst_107 [1] : vector<8x8xf32> to vector<8xf32>
    %365 = vector.shape_cast %364 : vector<8xf32> to vector<8x1xf32>
    %366 = vector.broadcast %365 : vector<8x1xf32> to vector<8x8xf32>
    %367 = arith.subf %363, %366 : vector<8x8xf32>
    %368 = math.exp %367 : vector<8x8xf32>
    %cst_108 = arith.constant dense<0.000000e+00> : vector<8xf32>
    %369 = vector.multi_reduction <add>, %368, %cst_108 [1] : vector<8x8xf32> to vector<8xf32>
    %370 = vector.shape_cast %369 : vector<8xf32> to vector<8x1xf32>
    %371 = tpu.reciprocal %370 {approx = true} : vector<8x1xf32> -> vector<8x1xf32>
    %372 = vector.broadcast %371 : vector<8x1xf32> to vector<8x8xf32>
    %373 = arith.mulf %368, %372 : vector<8x8xf32>
    %cst_109 = arith.constant dense<0.000000e+00> : vector<8x16xf32>
    %374 = tpu.matmul %373, %360, %cst_109 {dimension_numbers = #tpu.dot_dimension_numbers<[1], [0], [0], [1], [0, 0, 1, 1], [], []>} : vector<8x8xf32>, vector<8x16xf32>, vector<8x16xf32> -> vector<8x16xf32>
    %375 = vector.extract_strided_slice %308 {offsets = [0, 32], sizes = [8, 16], strides = [1, 1]} : vector<16x64xf32> to vector<8x16xf32>
    %376 = vector.extract_strided_slice %337 {offsets = [0, 32], sizes = [8, 16], strides = [1, 1]} : vector<16x64xf32> to vector<8x16xf32>
    %377 = vector.extract_strided_slice %338 {offsets = [0, 32], sizes = [8, 16], strides = [1, 1]} : vector<16x64xf32> to vector<8x16xf32>
    %378 = tpu.transpose %376, [1, 0] : vector<8x16xf32> -> vector<16x8xf32>
    %cst_110 = arith.constant dense<0.000000e+00> : vector<8x8xf32>
    %379 = tpu.matmul %375, %378, %cst_110 {dimension_numbers = #tpu.dot_dimension_numbers<[1], [0], [0], [1], [0, 0, 1, 1], [], []>} : vector<8x16xf32>, vector<16x8xf32>, vector<8x8xf32> -> vector<8x8xf32>
    %380 = arith.addf %379, %340 : vector<8x8xf32>
    %cst_111 = arith.constant dense<0xFF800000> : vector<8xf32>
    %381 = vector.multi_reduction <maximumf>, %380, %cst_111 [1] : vector<8x8xf32> to vector<8xf32>
    %382 = vector.shape_cast %381 : vector<8xf32> to vector<8x1xf32>
    %383 = vector.broadcast %382 : vector<8x1xf32> to vector<8x8xf32>
    %384 = arith.subf %380, %383 : vector<8x8xf32>
    %385 = math.exp %384 : vector<8x8xf32>
    %cst_112 = arith.constant dense<0.000000e+00> : vector<8xf32>
    %386 = vector.multi_reduction <add>, %385, %cst_112 [1] : vector<8x8xf32> to vector<8xf32>
    %387 = vector.shape_cast %386 : vector<8xf32> to vector<8x1xf32>
    %388 = tpu.reciprocal %387 {approx = true} : vector<8x1xf32> -> vector<8x1xf32>
    %389 = vector.broadcast %388 : vector<8x1xf32> to vector<8x8xf32>
    %390 = arith.mulf %385, %389 : vector<8x8xf32>
    %cst_113 = arith.constant dense<0.000000e+00> : vector<8x16xf32>
    %391 = tpu.matmul %390, %377, %cst_113 {dimension_numbers = #tpu.dot_dimension_numbers<[1], [0], [0], [1], [0, 0, 1, 1], [], []>} : vector<8x8xf32>, vector<8x16xf32>, vector<8x16xf32> -> vector<8x16xf32>
    %392 = vector.extract_strided_slice %308 {offsets = [0, 48], sizes = [8, 16], strides = [1, 1]} : vector<16x64xf32> to vector<8x16xf32>
    %393 = vector.extract_strided_slice %337 {offsets = [0, 48], sizes = [8, 16], strides = [1, 1]} : vector<16x64xf32> to vector<8x16xf32>
    %394 = vector.extract_strided_slice %338 {offsets = [0, 48], sizes = [8, 16], strides = [1, 1]} : vector<16x64xf32> to vector<8x16xf32>
    %395 = tpu.transpose %393, [1, 0] : vector<8x16xf32> -> vector<16x8xf32>
    %cst_114 = arith.constant dense<0.000000e+00> : vector<8x8xf32>
    %396 = tpu.matmul %392, %395, %cst_114 {dimension_numbers = #tpu.dot_dimension_numbers<[1], [0], [0], [1], [0, 0, 1, 1], [], []>} : vector<8x16xf32>, vector<16x8xf32>, vector<8x8xf32> -> vector<8x8xf32>
    %397 = arith.addf %396, %340 : vector<8x8xf32>
    %cst_115 = arith.constant dense<0xFF800000> : vector<8xf32>
    %398 = vector.multi_reduction <maximumf>, %397, %cst_115 [1] : vector<8x8xf32> to vector<8xf32>
    %399 = vector.shape_cast %398 : vector<8xf32> to vector<8x1xf32>
    %400 = vector.broadcast %399 : vector<8x1xf32> to vector<8x8xf32>
    %401 = arith.subf %397, %400 : vector<8x8xf32>
    %402 = math.exp %401 : vector<8x8xf32>
    %cst_116 = arith.constant dense<0.000000e+00> : vector<8xf32>
    %403 = vector.multi_reduction <add>, %402, %cst_116 [1] : vector<8x8xf32> to vector<8xf32>
    %404 = vector.shape_cast %403 : vector<8xf32> to vector<8x1xf32>
    %405 = tpu.reciprocal %404 {approx = true} : vector<8x1xf32> -> vector<8x1xf32>
    %406 = vector.broadcast %405 : vector<8x1xf32> to vector<8x8xf32>
    %407 = arith.mulf %402, %406 : vector<8x8xf32>
    %cst_117 = arith.constant dense<0.000000e+00> : vector<8x16xf32>
    %408 = tpu.matmul %407, %394, %cst_117 {dimension_numbers = #tpu.dot_dimension_numbers<[1], [0], [0], [1], [0, 0, 1, 1], [], []>} : vector<8x8xf32>, vector<8x16xf32>, vector<8x16xf32> -> vector<8x16xf32>
    %409 = tpu.concatenate %357, %374, %391, %408 in 1 : vector<8x16xf32>, vector<8x16xf32>, vector<8x16xf32>, vector<8x16xf32> -> vector<8x64xf32>
    %c1_118 = arith.constant 1 : index
    %c0_119 = arith.constant 0 : index
    %c0_120 = arith.constant 0 : index
    %410 = vector.load %arg1[%c1_118, %c0_119, %c0_120] : memref<2x8x8xf32, #tpu.memory_space<vmem>>, vector<1x8x8xf32>
    %411 = vector.shape_cast %410 : vector<1x8x8xf32> to vector<8x8xf32>
    %412 = vector.extract_strided_slice %308 {offsets = [8, 0], sizes = [8, 16], strides = [1, 1]} : vector<16x64xf32> to vector<8x16xf32>
    %413 = vector.extract_strided_slice %337 {offsets = [8, 0], sizes = [8, 16], strides = [1, 1]} : vector<16x64xf32> to vector<8x16xf32>
    %414 = vector.extract_strided_slice %338 {offsets = [8, 0], sizes = [8, 16], strides = [1, 1]} : vector<16x64xf32> to vector<8x16xf32>
    %415 = tpu.transpose %413, [1, 0] : vector<8x16xf32> -> vector<16x8xf32>
    %cst_121 = arith.constant dense<0.000000e+00> : vector<8x8xf32>
    %416 = tpu.matmul %412, %415, %cst_121 {dimension_numbers = #tpu.dot_dimension_numbers<[1], [0], [0], [1], [0, 0, 1, 1], [], []>} : vector<8x16xf32>, vector<16x8xf32>, vector<8x8xf32> -> vector<8x8xf32>
    %417 = arith.addf %416, %411 : vector<8x8xf32>
    %cst_122 = arith.constant dense<0xFF800000> : vector<8xf32>
    %418 = vector.multi_reduction <maximumf>, %417, %cst_122 [1] : vector<8x8xf32> to vector<8xf32>
    %419 = vector.shape_cast %418 : vector<8xf32> to vector<8x1xf32>
    %420 = vector.broadcast %419 : vector<8x1xf32> to vector<8x8xf32>
    %421 = arith.subf %417, %420 : vector<8x8xf32>
    %422 = math.exp %421 : vector<8x8xf32>
    %cst_123 = arith.constant dense<0.000000e+00> : vector<8xf32>
    %423 = vector.multi_reduction <add>, %422, %cst_123 [1] : vector<8x8xf32> to vector<8xf32>
    %424 = vector.shape_cast %423 : vector<8xf32> to vector<8x1xf32>
    %425 = tpu.reciprocal %424 {approx = true} : vector<8x1xf32> -> vector<8x1xf32>
    %426 = vector.broadcast %425 : vector<8x1xf32> to vector<8x8xf32>
    %427 = arith.mulf %422, %426 : vector<8x8xf32>
    %cst_124 = arith.constant dense<0.000000e+00> : vector<8x16xf32>
    %428 = tpu.matmul %427, %414, %cst_124 {dimension_numbers = #tpu.dot_dimension_numbers<[1], [0], [0], [1], [0, 0, 1, 1], [], []>} : vector<8x8xf32>, vector<8x16xf32>, vector<8x16xf32> -> vector<8x16xf32>
    %429 = vector.extract_strided_slice %308 {offsets = [8, 16], sizes = [8, 16], strides = [1, 1]} : vector<16x64xf32> to vector<8x16xf32>
    %430 = vector.extract_strided_slice %337 {offsets = [8, 16], sizes = [8, 16], strides = [1, 1]} : vector<16x64xf32> to vector<8x16xf32>
    %431 = vector.extract_strided_slice %338 {offsets = [8, 16], sizes = [8, 16], strides = [1, 1]} : vector<16x64xf32> to vector<8x16xf32>
    %432 = tpu.transpose %430, [1, 0] : vector<8x16xf32> -> vector<16x8xf32>
    %cst_125 = arith.constant dense<0.000000e+00> : vector<8x8xf32>
    %433 = tpu.matmul %429, %432, %cst_125 {dimension_numbers = #tpu.dot_dimension_numbers<[1], [0], [0], [1], [0, 0, 1, 1], [], []>} : vector<8x16xf32>, vector<16x8xf32>, vector<8x8xf32> -> vector<8x8xf32>
    %434 = arith.addf %433, %411 : vector<8x8xf32>
    %cst_126 = arith.constant dense<0xFF800000> : vector<8xf32>
    %435 = vector.multi_reduction <maximumf>, %434, %cst_126 [1] : vector<8x8xf32> to vector<8xf32>
    %436 = vector.shape_cast %435 : vector<8xf32> to vector<8x1xf32>
    %437 = vector.broadcast %436 : vector<8x1xf32> to vector<8x8xf32>
    %438 = arith.subf %434, %437 : vector<8x8xf32>
    %439 = math.exp %438 : vector<8x8xf32>
    %cst_127 = arith.constant dense<0.000000e+00> : vector<8xf32>
    %440 = vector.multi_reduction <add>, %439, %cst_127 [1] : vector<8x8xf32> to vector<8xf32>
    %441 = vector.shape_cast %440 : vector<8xf32> to vector<8x1xf32>
    %442 = tpu.reciprocal %441 {approx = true} : vector<8x1xf32> -> vector<8x1xf32>
    %443 = vector.broadcast %442 : vector<8x1xf32> to vector<8x8xf32>
    %444 = arith.mulf %439, %443 : vector<8x8xf32>
    %cst_128 = arith.constant dense<0.000000e+00> : vector<8x16xf32>
    %445 = tpu.matmul %444, %431, %cst_128 {dimension_numbers = #tpu.dot_dimension_numbers<[1], [0], [0], [1], [0, 0, 1, 1], [], []>} : vector<8x8xf32>, vector<8x16xf32>, vector<8x16xf32> -> vector<8x16xf32>
    %446 = vector.extract_strided_slice %308 {offsets = [8, 32], sizes = [8, 16], strides = [1, 1]} : vector<16x64xf32> to vector<8x16xf32>
    %447 = vector.extract_strided_slice %337 {offsets = [8, 32], sizes = [8, 16], strides = [1, 1]} : vector<16x64xf32> to vector<8x16xf32>
    %448 = vector.extract_strided_slice %338 {offsets = [8, 32], sizes = [8, 16], strides = [1, 1]} : vector<16x64xf32> to vector<8x16xf32>
    %449 = tpu.transpose %447, [1, 0] : vector<8x16xf32> -> vector<16x8xf32>
    %cst_129 = arith.constant dense<0.000000e+00> : vector<8x8xf32>
    %450 = tpu.matmul %446, %449, %cst_129 {dimension_numbers = #tpu.dot_dimension_numbers<[1], [0], [0], [1], [0, 0, 1, 1], [], []>} : vector<8x16xf32>, vector<16x8xf32>, vector<8x8xf32> -> vector<8x8xf32>
    %451 = arith.addf %450, %411 : vector<8x8xf32>
    %cst_130 = arith.constant dense<0xFF800000> : vector<8xf32>
    %452 = vector.multi_reduction <maximumf>, %451, %cst_130 [1] : vector<8x8xf32> to vector<8xf32>
    %453 = vector.shape_cast %452 : vector<8xf32> to vector<8x1xf32>
    %454 = vector.broadcast %453 : vector<8x1xf32> to vector<8x8xf32>
    %455 = arith.subf %451, %454 : vector<8x8xf32>
    %456 = math.exp %455 : vector<8x8xf32>
    %cst_131 = arith.constant dense<0.000000e+00> : vector<8xf32>
    %457 = vector.multi_reduction <add>, %456, %cst_131 [1] : vector<8x8xf32> to vector<8xf32>
    %458 = vector.shape_cast %457 : vector<8xf32> to vector<8x1xf32>
    %459 = tpu.reciprocal %458 {approx = true} : vector<8x1xf32> -> vector<8x1xf32>
    %460 = vector.broadcast %459 : vector<8x1xf32> to vector<8x8xf32>
    %461 = arith.mulf %456, %460 : vector<8x8xf32>
    %cst_132 = arith.constant dense<0.000000e+00> : vector<8x16xf32>
    %462 = tpu.matmul %461, %448, %cst_132 {dimension_numbers = #tpu.dot_dimension_numbers<[1], [0], [0], [1], [0, 0, 1, 1], [], []>} : vector<8x8xf32>, vector<8x16xf32>, vector<8x16xf32> -> vector<8x16xf32>
    %463 = vector.extract_strided_slice %308 {offsets = [8, 48], sizes = [8, 16], strides = [1, 1]} : vector<16x64xf32> to vector<8x16xf32>
    %464 = vector.extract_strided_slice %337 {offsets = [8, 48], sizes = [8, 16], strides = [1, 1]} : vector<16x64xf32> to vector<8x16xf32>
    %465 = vector.extract_strided_slice %338 {offsets = [8, 48], sizes = [8, 16], strides = [1, 1]} : vector<16x64xf32> to vector<8x16xf32>
    %466 = tpu.transpose %464, [1, 0] : vector<8x16xf32> -> vector<16x8xf32>
    %cst_133 = arith.constant dense<0.000000e+00> : vector<8x8xf32>
    %467 = tpu.matmul %463, %466, %cst_133 {dimension_numbers = #tpu.dot_dimension_numbers<[1], [0], [0], [1], [0, 0, 1, 1], [], []>} : vector<8x16xf32>, vector<16x8xf32>, vector<8x8xf32> -> vector<8x8xf32>
    %468 = arith.addf %467, %411 : vector<8x8xf32>
    %cst_134 = arith.constant dense<0xFF800000> : vector<8xf32>
    %469 = vector.multi_reduction <maximumf>, %468, %cst_134 [1] : vector<8x8xf32> to vector<8xf32>
    %470 = vector.shape_cast %469 : vector<8xf32> to vector<8x1xf32>
    %471 = vector.broadcast %470 : vector<8x1xf32> to vector<8x8xf32>
    %472 = arith.subf %468, %471 : vector<8x8xf32>
    %473 = math.exp %472 : vector<8x8xf32>
    %cst_135 = arith.constant dense<0.000000e+00> : vector<8xf32>
    %474 = vector.multi_reduction <add>, %473, %cst_135 [1] : vector<8x8xf32> to vector<8xf32>
    %475 = vector.shape_cast %474 : vector<8xf32> to vector<8x1xf32>
    %476 = tpu.reciprocal %475 {approx = true} : vector<8x1xf32> -> vector<8x1xf32>
    %477 = vector.broadcast %476 : vector<8x1xf32> to vector<8x8xf32>
    %478 = arith.mulf %473, %477 : vector<8x8xf32>
    %cst_136 = arith.constant dense<0.000000e+00> : vector<8x16xf32>
    %479 = tpu.matmul %478, %465, %cst_136 {dimension_numbers = #tpu.dot_dimension_numbers<[1], [0], [0], [1], [0, 0, 1, 1], [], []>} : vector<8x8xf32>, vector<8x16xf32>, vector<8x16xf32> -> vector<8x16xf32>
    %480 = tpu.concatenate %428, %445, %462, %479 in 1 : vector<8x16xf32>, vector<8x16xf32>, vector<8x16xf32>, vector<8x16xf32> -> vector<8x64xf32>
    %481 = tpu.concatenate %409, %480 in 0 : vector<8x64xf32>, vector<8x64xf32> -> vector<16x64xf32>
    %c1_137 = arith.constant 1 : index
    %c0_138 = arith.constant 0 : index
    %c0_139 = arith.constant 0 : index
    %482 = vector.load %arg7[%c1_137, %c0_138, %c0_139] : memref<2x64x64xf32, #tpu.memory_space<vmem>>, vector<1x64x64xf32>
    %483 = vector.shape_cast %482 : vector<1x64x64xf32> to vector<64x64xf32>
    %cst_140 = arith.constant dense<0.000000e+00> : vector<16x64xf32>
    %484 = tpu.matmul %481, %483, %cst_140 {dimension_numbers = #tpu.dot_dimension_numbers<[1], [0], [0], [1], [0, 0, 1, 1], [], []>} : vector<16x64xf32>, vector<64x64xf32>, vector<16x64xf32> -> vector<16x64xf32>
    %485 = arith.addf %262, %484 : vector<16x64xf32>
    %c1_141 = arith.constant 1 : index
    %c0_142 = arith.constant 0 : index
    %c0_143 = arith.constant 0 : index
    %486 = vector.load %arg8[%c1_141, %c0_142, %c0_143] : memref<2x1x64xf32, #tpu.memory_space<vmem>>, vector<1x1x64xf32>
    %487 = vector.shape_cast %486 : vector<1x1x64xf32> to vector<1x64xf32>
    %488 = arith.mulf %485, %485 : vector<16x64xf32>
    %cst_144 = arith.constant dense<0.000000e+00> : vector<16xf32>
    %489 = vector.multi_reduction <add>, %488, %cst_144 [1] : vector<16x64xf32> to vector<16xf32>
    %490 = vector.shape_cast %489 : vector<16xf32> to vector<16x1xf32>
    %cst_145 = arith.constant 6.400000e+01 : f32
    %491 = vector.broadcast %cst_145 : f32 to vector<16x1xf32>
    %492 = arith.divf %490, %491 : vector<16x1xf32>
    %cst_146 = arith.constant 9.99999974E-6 : f32
    %493 = vector.broadcast %cst_146 : f32 to vector<16x1xf32>
    %494 = arith.addf %492, %493 : vector<16x1xf32>
    %495 = math.rsqrt %494 : vector<16x1xf32>
    %496 = vector.broadcast %495 : vector<16x1xf32> to vector<16x64xf32>
    %497 = arith.mulf %485, %496 : vector<16x64xf32>
    %498 = vector.broadcast %487 : vector<1x64xf32> to vector<16x64xf32>
    %499 = arith.mulf %497, %498 : vector<16x64xf32>
    %c1_147 = arith.constant 1 : index
    %c0_148 = arith.constant 0 : index
    %c0_149 = arith.constant 0 : index
    %500 = vector.load %arg9[%c1_147, %c0_148, %c0_149] : memref<2x64x256xf32, #tpu.memory_space<vmem>>, vector<1x64x256xf32>
    %501 = vector.shape_cast %500 : vector<1x64x256xf32> to vector<64x256xf32>
    %cst_150 = arith.constant dense<0.000000e+00> : vector<16x256xf32>
    %502 = tpu.matmul %499, %501, %cst_150 {dimension_numbers = #tpu.dot_dimension_numbers<[1], [0], [0], [1], [0, 0, 1, 1], [], []>} : vector<16x64xf32>, vector<64x256xf32>, vector<16x256xf32> -> vector<16x256xf32>
    %503 = vector.extract_strided_slice %502 {offsets = [0, 0], sizes = [16, 128], strides = [1, 1]} : vector<16x256xf32> to vector<16x128xf32>
    %504 = vector.extract_strided_slice %502 {offsets = [0, 128], sizes = [16, 128], strides = [1, 1]} : vector<16x256xf32> to vector<16x128xf32>
    %505 = arith.negf %503 : vector<16x128xf32>
    %506 = math.exp %505 : vector<16x128xf32>
    %cst_151 = arith.constant 1.000000e+00 : f32
    %507 = vector.broadcast %cst_151 : f32 to vector<16x128xf32>
    %508 = arith.addf %507, %506 : vector<16x128xf32>
    %509 = arith.divf %507, %508 : vector<16x128xf32>
    %510 = arith.mulf %503, %509 : vector<16x128xf32>
    %511 = arith.mulf %510, %504 : vector<16x128xf32>
    %c1_152 = arith.constant 1 : index
    %c0_153 = arith.constant 0 : index
    %c0_154 = arith.constant 0 : index
    %512 = vector.load %arg10[%c1_152, %c0_153, %c0_154] : memref<2x128x64xf32, #tpu.memory_space<vmem>>, vector<1x128x64xf32>
    %513 = vector.shape_cast %512 : vector<1x128x64xf32> to vector<128x64xf32>
    %cst_155 = arith.constant dense<0.000000e+00> : vector<16x64xf32>
    %514 = tpu.matmul %511, %513, %cst_155 {dimension_numbers = #tpu.dot_dimension_numbers<[1], [0], [0], [1], [0, 0, 1, 1], [], []>} : vector<16x128xf32>, vector<128x64xf32>, vector<16x64xf32> -> vector<16x64xf32>
    %515 = arith.addf %485, %514 : vector<16x64xf32>
    %c0_156 = arith.constant 0 : index
    %c0_157 = arith.constant 0 : index
    %516 = vector.load %arg11[%c0_156, %c0_157] : memref<1x64xf32, #tpu.memory_space<vmem>>, vector<1x64xf32>
    %517 = arith.mulf %515, %515 : vector<16x64xf32>
    %cst_158 = arith.constant dense<0.000000e+00> : vector<16xf32>
    %518 = vector.multi_reduction <add>, %517, %cst_158 [1] : vector<16x64xf32> to vector<16xf32>
    %519 = vector.shape_cast %518 : vector<16xf32> to vector<16x1xf32>
    %cst_159 = arith.constant 6.400000e+01 : f32
    %520 = vector.broadcast %cst_159 : f32 to vector<16x1xf32>
    %521 = arith.divf %519, %520 : vector<16x1xf32>
    %cst_160 = arith.constant 9.99999974E-6 : f32
    %522 = vector.broadcast %cst_160 : f32 to vector<16x1xf32>
    %523 = arith.addf %521, %522 : vector<16x1xf32>
    %524 = math.rsqrt %523 : vector<16x1xf32>
    %525 = vector.broadcast %524 : vector<16x1xf32> to vector<16x64xf32>
    %526 = arith.mulf %515, %525 : vector<16x64xf32>
    %527 = vector.broadcast %516 : vector<1x64xf32> to vector<16x64xf32>
    %528 = arith.mulf %526, %527 : vector<16x64xf32>
    %c0_161 = arith.constant 0 : index
    %c0_162 = arith.constant 0 : index
    %529 = vector.load %arg12[%c0_161, %c0_162] : memref<64x256xf32, #tpu.memory_space<vmem>>, vector<64x256xf32>
    %cst_163 = arith.constant dense<0.000000e+00> : vector<16x256xf32>
    %530 = tpu.matmul %528, %529, %cst_163 {dimension_numbers = #tpu.dot_dimension_numbers<[1], [0], [0], [1], [0, 0, 1, 1], [], []>} : vector<16x64xf32>, vector<64x256xf32>, vector<16x256xf32> -> vector<16x256xf32>
    %c0_164 = arith.constant 0 : index
    %c0_165 = arith.constant 0 : index
    %531 = vector.load %arg13[%c0_164, %c0_165] : memref<16x256xf32, #tpu.memory_space<vmem>>, vector<16x256xf32>
    tpu.vector_store %arg13[%c0_164, %c0_165], %530 {strides = array<i32>} : memref<16x256xf32, #tpu.memory_space<vmem>>, vector<16x256xf32>,
    return
  }
}

</mosaic_0001>

<bundles_post_ra>
// kernel: tile.13
= control target key start
LH: loop header
LB: loop body
LE: loop exit
PB: predicated region body
PF: predicated region fallthrough
CT: control target
= control target key end

     0   :  { %s154_s0 = inlined_call_operand.vmem [shape: f32[8,16], index: 0, kind: input, shape index: {}]   ;;  %s155_s1 = inlined_call_operand.vmem [shape: f32[2,8,4,16], index: 1, kind: output, shape index: {}]  }
   0x1   :  { %v4_v0 = vld [vmem:[%s154_s0] ss:$0 sm:$0xff]  ;;  %v51_v1 = vld [vmem:[%s154_s0 + $0x1] ss:$0 sm:$0xff]  ;;  %v54_v2 = vld [vmem:[%s154_s0 + $0x2] ss:$0 sm:$0xff] }
   0x2   :  { %5 = vst [vmem:[%s155_s1] sm:$0xf] %v4_v0  ;;  %50 = vst [vmem:[%s155_s1 + $0x20] sm:$0xf] %v4_v0  ;;  %v57_v3 = vld [vmem:[%s154_s0 + $0x3] ss:$0 sm:$0xff] }
   0x3   :  { %52 = vst [vmem:[%s155_s1 + $0x4] sm:$0xf] %v51_v1  ;;  %53 = vst [vmem:[%s155_s1 + $0x24] sm:$0xf] %v51_v1  ;;  %v60_v4 = vld [vmem:[%s154_s0 + $0x4] ss:$0 sm:$0xff] }
   0x4   :  { %55 = vst [vmem:[%s155_s1 + $0x8] sm:$0xf] %v54_v2  ;;  %56 = vst [vmem:[%s155_s1 + $0x28] sm:$0xf] %v54_v2  ;;  %v63_v5 = vld [vmem:[%s154_s0 + $0x5] ss:$0 sm:$0xff] }
   0x5   :  { %58 = vst [vmem:[%s155_s1 + $0xc] sm:$0xf] %v57_v3  ;;  %59 = vst [vmem:[%s155_s1 + $0x2c] sm:$0xf] %v57_v3  ;;  %v66_v6 = vld [vmem:[%s154_s0 + $0x6] ss:$0 sm:$0xff] }
   0x6   :  { %61 = vst [vmem:[%s155_s1 + $0x10] sm:$0xf] %v60_v4  ;;  %62 = vst [vmem:[%s155_s1 + $0x30] sm:$0xf] %v60_v4  ;;  %v69_v7 = vld [vmem:[%s154_s0 + $0x7] ss:$0 sm:$0xff] }
   0x7   :  { %64 = vst [vmem:[%s155_s1 + $0x14] sm:$0xf] %v63_v5  ;;  %65 = vst [vmem:[%s155_s1 + $0x34] sm:$0xf] %v63_v5 }
   0x8   :  { %67 = vst [vmem:[%s155_s1 + $0x18] sm:$0xf] %v66_v6  ;;  %68 = vst [vmem:[%s155_s1 + $0x38] sm:$0xf] %v66_v6 }
   0x9   :  { %70 = vst [vmem:[%s155_s1 + $0x1c] sm:$0xf] %v69_v7  ;;  %71 = vst [vmem:[%s155_s1 + $0x3c] sm:$0xf] %v69_v7 }

// kernel: tile.14
= control target key start
LH: loop header
LB: loop body
LE: loop exit
PB: predicated region body
PF: predicated region fallthrough
CT: control target
= control target key end

     0   :  { %vm83_vm0 = vcmask 1047556   ;;  %vm85_vm1 = vcmask 130048   ;;  %s196_s9 = smov 48   ;;  %s197_s14 = smov 16   ;;  %vm104_vm2 = vcmask 523648   ;;  %vm125_vm3 = vcmask 392448   ;;  %s290_s0 = inlined_call_operand.vmem [shape: f32[2,8,4,16], index: 0, kind: input, shape index: {}]   ;;  %s291_s1 = inlined_call_operand.vmem [shape: f32[16,64], index: 1, kind: output, shape index: {}]  }
   0x1   :  { %v181_v0 = vld [vmem:[%s290_s0 + $0x1c] sm:$0xf]  ;;  %v182_v1 = vld [vmem:[%s290_s0 + $0x18] sm:$0xf]  ;;  %v183_v2 = vld [vmem:[%s290_s0 + $0x14] sm:$0xf] }
   0x2   :  { %49 = vst [vmem:[#allocation0 + $0x38] sm:$0xf] %v181_v0  ;;  %54 = vst [vmem:[#allocation0 + $0x30] sm:$0xf] %v182_v1  ;;  %v184_v3 = vld [vmem:[%s290_s0 + $0x10] sm:$0xf] }
   0x3   :  { %59 = vst [vmem:[#allocation0 + $0x28] sm:$0xf] %v183_v2  ;;  %v185_v4 = vld [vmem:[%s290_s0 + $0xc] sm:$0xf]  ;;  %v186_v5 = vld [vmem:[%s290_s0 + $0x8] sm:$0xf] }
   0x4   :  { %64 = vst [vmem:[#allocation0 + $0x20] sm:$0xf] %v184_v3  ;;  %69 = vst [vmem:[#allocation0 + $0x18] sm:$0xf] %v185_v4  ;;  %v187_v6 = vld [vmem:[%s290_s0 + $0x4] sm:$0xf] }
   0x5   :  { %74 = vst [vmem:[#allocation0 + $0x10] sm:$0xf] %v186_v5  ;;  %v79_v7 = vld [vmem:[%s290_s0] sm:$0xf]  ;;  %78 = vst [vmem:[#allocation0 + $0x8] sm:$0xf] %v187_v6 }
   0x6   :  { %80 = vst [vmem:[#allocation0] sm:$0xf] %v79_v7  ;;  %v173_v8 = vld [vmem:[%s290_s0 + $0x3c] sm:$0xf]  ;;  %v174_v9 = vld [vmem:[%s290_s0 + $0x38] sm:$0xf] }
   0x7   :  { %9 = vst [vmem:[#allocation0 + $0x78] sm:$0xf] %v173_v8  ;;  %14 = vst [vmem:[#allocation0 + $0x70] sm:$0xf] %v174_v9  ;;  %v175_v10 = vld [vmem:[%s290_s0 + $0x34] sm:$0xf] }
   0x8   :  { %v176_v11 = vld [vmem:[%s290_s0 + $0x30] sm:$0xf]  ;;  %v177_v12 = vld [vmem:[%s290_s0 + $0x2c] sm:$0xf]  ;;  %19 = vst [vmem:[#allocation0 + $0x68] sm:$0xf] %v175_v10 }
   0x9   :  { %24 = vst [vmem:[#allocation0 + $0x60] sm:$0xf] %v176_v11  ;;  %29 = vst [vmem:[#allocation0 + $0x58] sm:$0xf] %v177_v12  ;;  %v178_v13 = vld [vmem:[%s290_s0 + $0x28] sm:$0xf] }
   0xa   :  { %v179_v14 = vld [vmem:[%s290_s0 + $0x24] sm:$0xf]  ;;  %v180_v15 = vld [vmem:[%s290_s0 + $0x20] sm:$0xf]  ;;  %34 = vst [vmem:[#allocation0 + $0x50] sm:$0xf] %v178_v13 }
   0xb   :  { %39 = vst [vmem:[#allocation0 + $0x48] sm:$0xf] %v179_v14  ;;  %44 = vst [vmem:[#allocation0 + $0x40] sm:$0xf] %v180_v15  ;;  %s195_s0 = smov 32   ;;  %vm146_vm4 = vcmask 261248  }
   0xc   :  { %v120_v16 = vld [vmem:[#allocation0 + $0x2] ss:$8 sm:$0xf0]   ;;  %v99_v17 = vld [vmem:[#allocation0 + $0x3] ss:$8 sm:$0xf0]  }
   0xd   :  { %v118_v18 = vld [vmem:[#allocation0 + $0x2] ss:$8 sm:$0xf]   ;;  %v97_v19 = vld [vmem:[#allocation0 + $0x3] ss:$8 sm:$0xf]  }
   0xe   :  { %v122_v20 = vsel %vm83_vm0, %v120_v16, %v118_v18  ;;  %v101_v21 = vsel %vm83_vm0, %v99_v17, %v97_v19  ;;  %v139_v24 = vld [vmem:[#allocation0 + $0x1] ss:$8 sm:$0xf]   ;;  %v81_v32 = vld [vmem:[#allocation0] ss:$8 sm:$0xf]  }
   0xf   :  { %123 = vrot.lane.b32.xlu1 %v122_v20, %s195_s0  ;;  %102 = vrot.lane.b32.xlu0 %v101_v21, %s196_s9  ;;  %v141_v25 = vld [vmem:[#allocation0 + $0x1] ss:$8 sm:$0xf0]   ;;  %v82_v33 = vld [vmem:[#allocation0] ss:$8 sm:$0xf0]  }
  0x10   :  { %v130_v22 = vld [vmem:[#allocation0 + $0x42] ss:$8 sm:$0xf0]   ;;  %v109_v23 = vld [vmem:[#allocation0 + $0x43] ss:$8 sm:$0xf0]   ;;  %v84_v34 = vsel %vm83_vm0, %v82_v33, %v81_v32  ;;  %v143_v38 = vsel %vm83_vm0, %v141_v25, %v139_v24 }
  0x11   :  { %v151_v31 = vld [vmem:[#allocation0 + $0x41] ss:$8 sm:$0xf0]   ;;  %v90_v36 = vld [vmem:[#allocation0 + $0x40] ss:$8 sm:$0xf0]  }
  0x12   :  { %v128_v26 = vld [vmem:[#allocation0 + $0x42] ss:$8 sm:$0xf]   ;;  %v107_v27 = vld [vmem:[#allocation0 + $0x43] ss:$8 sm:$0xf]  }
  0x13   :  { %v132_v28 = vsel %vm83_vm0, %v130_v22, %v128_v26  ;;  %v111_v29 = vsel %vm83_vm0, %v109_v23, %v107_v27  ;;  %v149_v30 = vld [vmem:[#allocation0 + $0x41] ss:$8 sm:$0xf]   ;;  %v88_v35 = vld [vmem:[#allocation0 + $0x40] ss:$8 sm:$0xf]  }
  0x14   :  { %133 = vrot.lane.b32.xlu1 %v132_v28, %s195_s0  ;;  %112 = vrot.lane.b32.xlu0 %v111_v29, %s196_s9  ;;  %v153_v37 = vsel %vm83_vm0, %v151_v31, %v149_v30  ;;  %86 = vst.msk [vmem:[%s291_s1] sm:$0xff] %vm85_vm1, %v84_v34   ;;  %v92_v39 = vsel %vm83_vm0, %v90_v36, %v88_v35 }
  0x15   :  { %188 = vst.msk [vmem:[%s291_s1 + $0x8] sm:$0xff] %vm85_vm1, %v92_v39  }
  0x18   :  { %154 = vrot.lane.b32.xlu1 %v153_v37, %s197_s14  ;;  %144 = vrot.lane.b32.xlu0 %v143_v38, %s197_s14 }
  0x81   :  { %v124_v40 = vpop.permute.xlu1 %123   ;;  %v103_v41 = vpop.permute.xlu0 %102  }
  0x82   :  { %105 = vst.msk [vmem:[%s291_s1] sm:$0xff] %vm104_vm2, %v103_v41  }
  0x83   :  { %126 = vst.msk [vmem:[%s291_s1] sm:$0xff] %vm125_vm3, %v124_v40  }
  0x86   :  { %v134_v42 = vpop.permute.xlu1 %133   ;;  %v113_v43 = vpop.permute.xlu0 %112  }
  0x87   :  { %189 = vst.msk [vmem:[%s291_s1 + $0x8] sm:$0xff] %vm104_vm2, %v113_v43  }
  0x88   :  { %190 = vst.msk [vmem:[%s291_s1 + $0x8] sm:$0xff] %vm125_vm3, %v134_v42  }
  0x8a   :  { %v155_v44 = vpop.permute.xlu1 %154   ;;  %v145_v45 = vpop.permute.xlu0 %144  }
  0x8b   :  { %191 = vst.msk [vmem:[%s291_s1 + $0x8] sm:$0xff] %vm146_vm4, %v155_v44   ;;  %147 = vst.msk [vmem:[%s291_s1] sm:$0xff] %vm146_vm4, %v145_v45  }

// kernel: llama_forward.1
= control target key start
LH: loop header
LB: loop body
LE: loop exit
PB: predicated region body
PF: predicated region fallthrough
CT: control target
= control target key end

     0   :  { %v5045_v3 = vmov 0   ;;  %s6327_s0 = inlined_call_operand.vmem [shape: s32[16,1], index: 0, kind: input, shape index: {}]   ;;  %s6328_s1 = inlined_call_operand.vmem [shape: f32[2,8,8], index: 1, kind: input, shape index: {}]   ;;  %s6329_s2 = inlined_call_operand.vmem [shape: f32[16,64], index: 2, kind: input, shape index: {}]   ;;  %s6330_s3 = inlined_call_operand.vmem [shape: f32[16,64], index: 3, kind: input, shape index: {}]   ;;  %s6331_s4 = inlined_call_operand.vmem [shape: f32[256,64], index: 4, kind: input, shape index: {}]   ;;  %s6332_s5 = inlined_call_operand.vmem [shape: f32[2,1,64], index: 5, kind: input, shape index: {}]   ;;  %s6333_s6 = inlined_call_operand.vmem [shape: f32[2,64,192], index: 6, kind: input, shape index: {}]   ;;  %s6334_s7 = inlined_call_operand.vmem [shape: f32[2,64,64], index: 7, kind: input, shape index: {}]   ;;  %s6335_s8 = inlined_call_operand.vmem [shape: f32[2,1,64], index: 8, kind: input, shape index: {}]   ;;  %s6336_s9 = inlined_call_operand.vmem [shape: f32[2,64,256], index: 9, kind: input, shape index: {}]   ;;  %s6337_s10 = inlined_call_operand.vmem [shape: f32[2,128,64], index: 10, kind: input, shape index: {}]   ;;  %s6338_s11 = inlined_call_operand.vmem [shape: f32[1,64], index: 11, kind: input, shape index: {}]   ;;  %s6339_s12 = inlined_call_operand.vmem [shape: f32[64,256], index: 12, kind: input, shape index: {}]   ;;  %s6340_s13 = inlined_call_operand.hbm [shape: f32[16,256], index: 13, kind: output, shape index: {}]  }
   0x1   :  { %v45_v0 = vld [vmem:[%s6327_s0] sm:$0xff]  ;;  %v99_v1 = vld [vmem:[%s6331_s4 + $0xf8] sm:$0xff]  ;;  %4915 = vset.pattern.permute.xlu0 %v5045_v3  ;;  %v98_v4 = vld [vmem:[%s6331_s4 + $0xf0] sm:$0xff]  ;;  %4916 = vset.pattern.permute.xlu1 %v5045_v3 }
   0x2   :  { %v83_v2 = vld [vmem:[%s6331_s4 + $0x78] sm:$0xff]  ;;  %4468 = vmatprep.subr.mxu0 %v99_v1  ;;  %v82_v5 = vld [vmem:[%s6331_s4 + $0x70] sm:$0xff]  ;;  %51 = vperm.xlu0 %4915, %v45_v0   ;;  %v97_v6 = vld [vmem:[%s6331_s4 + $0xe8] sm:$0xff] }
   0x3   :  { %4469 = vmatpush3.msra.mxu0 %v83_v2  ;;  %v81_v7 = vld [vmem:[%s6331_s4 + $0x68] sm:$0xff]  ;;  %v96_v8 = vld [vmem:[%s6331_s4 + $0xe0] sm:$0xff]  ;;  %v95_v10 = vld [vmem:[%s6331_s4 + $0xd8] sm:$0xff] }
   0x4   :  { %4470 = vmatprep.subr.mxu0 %v98_v4  ;;  %v80_v9 = vld [vmem:[%s6331_s4 + $0x60] sm:$0xff]  ;;  %v79_v11 = vld [vmem:[%s6331_s4 + $0x58] sm:$0xff]  ;;  %v94_v12 = vld [vmem:[%s6331_s4 + $0xd0] sm:$0xff] }
   0x5   :  { %4471 = vmatpush3.msra.mxu0 %v82_v5  ;;  %v78_v13 = vld [vmem:[%s6331_s4 + $0x50] sm:$0xff]  ;;  %v93_v14 = vld [vmem:[%s6331_s4 + $0xc8] sm:$0xff] }
   0x6   :  { %4472 = vmatprep.subr.mxu0 %v97_v6  ;;  %v77_v15 = vld [vmem:[%s6331_s4 + $0x48] sm:$0xff] }
   0x7   :  { %4473 = vmatpush3.msra.mxu0 %v81_v7 }
   0x8   :  { %4474 = vmatprep.subr.mxu0 %v96_v8 }
   0x9   :  { %4475 = vmatpush3.msra.mxu0 %v80_v9 }
   0xa   :  { %4476 = vmatprep.subr.mxu0 %v95_v10 }
   0xb   :  { %4477 = vmatpush3.msra.mxu0 %v79_v11 }
   0xc   :  { %4478 = vmatprep.subr.mxu0 %v94_v12 }
   0xd   :  { %18 = vsyncpa [#allocation3], 0  ;;  %4479 = vmatpush3.msra.mxu0 %v78_v13  ;;  %v92_v16 = vld [vmem:[%s6331_s4 + $0xc0] sm:$0xff]  ;;  %v91_v18 = vld [vmem:[%s6331_s4 + $0xb8] sm:$0xff]  ;;  %v47_v34 = vlaneseq  ;;  %v5046_v38 = vmov 1.0   ;;  %vm182_vm2 = vcmask 523264  }
   0xe   :  { %4480 = vmatprep.subr.mxu0 %v93_v14  ;;  %v76_v17 = vld [vmem:[%s6331_s4 + $0x40] sm:$0xff]  ;;  %v75_v19 = vld [vmem:[%s6331_s4 + $0x38] sm:$0xff]  ;;  %v90_v20 = vld [vmem:[%s6331_s4 + $0xb0] sm:$0xff]  ;;  %v5047_v48 = vmov 0.0   ;;  %s5050_s23 = smov 24   ;;  %s5051_s24 = smov 8  }
   0xf   :  { %4481 = vmatpush3.msra.mxu0 %v77_v15  ;;  %v74_v21 = vld [vmem:[%s6331_s4 + $0x30] sm:$0xff]  ;;  %v89_v22 = vld [vmem:[%s6331_s4 + $0xa8] sm:$0xff]  ;;  %v88_v24 = vld [vmem:[%s6331_s4 + $0xa0] sm:$0xff]  ;;  %v5235_v35 = vand.u32 127, %v47_v34  ;;  %292 = vmatprep.mubr.f32.mxu1 %v5047_v48  ;;  %s5052_s25 = smov 72   ;;  %vm323_vm5 = vcmask 64512  }
  0x10   :  { %4482 = vmatprep.subr.mxu0 %v92_v16  ;;  %v73_v23 = vld [vmem:[%s6331_s4 + $0x28] sm:$0xff]  ;;  %v72_v25 = vld [vmem:[%s6331_s4 + $0x20] sm:$0xff]  ;;  %v87_v26 = vld [vmem:[%s6331_s4 + $0x98] sm:$0xff]  ;;  %s5053_s26 = smov 16   ;;  %s5054_s27 = smov 104   ;;  %vm392_vm6 = vcmask 130048  }
  0x11   :  { %4483 = vmatpush3.msra.mxu0 %v76_v17  ;;  %v71_v27 = vld [vmem:[%s6331_s4 + $0x18] sm:$0xff]  ;;  %v86_v28 = vld [vmem:[%s6331_s4 + $0x90] sm:$0xff]  ;;  %v85_v30 = vld [vmem:[%s6331_s4 + $0x88] sm:$0xff]  ;;  %v5238_v36 = vadd.s32 128, %v5235_v35  ;;  %s5055_s28 = smov 32   ;;  %s6351_s29 = smov 120  }
  0x12   :  { %4484 = vmatprep.subr.mxu0 %v91_v18  ;;  %v70_v29 = vld [vmem:[%s6331_s4 + $0x10] sm:$0xff]  ;;  %v69_v31 = vld [vmem:[%s6331_s4 + $0x8] sm:$0xff]  ;;  %v84_v32 = vld [vmem:[%s6331_s4 + $0x80] sm:$0xff]  ;;  %s6349_s30 = smov 88   ;;  %s5058_s14 = smov 48   ;;  %vm395_vm7 = vcmask 261120  }
  0x13   :  { %4485 = vmatpush3.msra.mxu0 %v75_v19  ;;  %v68_v33 = vld [vmem:[%s6331_s4] sm:$0xff]  ;;  %v221_v44 = vld [vmem:[%s6333_s6 + $0x78] sm:$0xff]  ;;  %v220_v45 = vld [vmem:[%s6333_s6 + $0x70] sm:$0xff]  ;;  %s5049_s4 = smov 40   ;;  %s6347_s17 = smov 64   ;;  %vm398_vm8 = vcmask 392192  }
  0x14   :  { %4486 = vmatprep.subr.mxu0 %v90_v20  ;;  %v219_v46 = vld [vmem:[%s6333_s6 + $0x68] sm:$0xff]  ;;  %244 = vmatprep.subr.mxu1 %v221_v44  ;;  %v218_v47 = vld [vmem:[%s6333_s6 + $0x60] sm:$0xff]  ;;  %v217_v49 = vld [vmem:[%s6333_s6 + $0x58] sm:$0xff]  ;;  %vm5060_vm9 = vmmov 0   ;;  %s6345_s19 = smov 112   ;;  %s6343_s20 = smov 96  }
  0x15   :  { %4487 = vmatpush3.msra.mxu0 %v74_v21  ;;  %245 = vmatpush1.msra.mxu1 %v220_v45  ;;  %v216_v50 = vld [vmem:[%s6333_s6 + $0x50] sm:$0xff]  ;;  %v215_v51 = vld [vmem:[%s6333_s6 + $0x48] sm:$0xff]  ;;  %v214_v52 = vld [vmem:[%s6333_s6 + $0x40] sm:$0xff]  ;;  %s6341_s21 = smov 80  }
  0x16   :  { %4488 = vmatprep.subr.mxu0 %v89_v22  ;;  %246 = vmatprep.subr.mxu1 %v219_v46  ;;  %v213_v53 = vld [vmem:[%s6333_s6 + $0x38] sm:$0xff]  ;;  %v212_v54 = vld [vmem:[%s6333_s6 + $0x30] sm:$0xff]  ;;  %v211_v55 = vld [vmem:[%s6333_s6 + $0x28] sm:$0xff] }
  0x17   :  { %4489 = vmatpush3.msra.mxu0 %v73_v23  ;;  %247 = vmatpush1.msra.mxu1 %v218_v47  ;;  %v210_v56 = vld [vmem:[%s6333_s6 + $0x20] sm:$0xff]  ;;  %v209_v57 = vld [vmem:[%s6333_s6 + $0x18] sm:$0xff]  ;;  %v208_v58 = vld [vmem:[%s6333_s6 + $0x10] sm:$0xff] }
  0x18   :  { %4490 = vmatprep.subr.mxu0 %v88_v24  ;;  %248 = vmatprep.subr.mxu1 %v217_v49  ;;  %v207_v59 = vld [vmem:[%s6333_s6 + $0x8] sm:$0xff]  ;;  %v206_v60 = vld [vmem:[%s6333_s6] sm:$0xff] }
  0x19   :  { %4491 = vmatpush3.msra.mxu0 %v72_v25  ;;  %249 = vmatpush1.msra.mxu1 %v216_v50  ;;  %v46_v61 = vld [vmem:[%s6327_s0 + $0x8] sm:$0xff]  ;;  %v5304_v2 = vld [vmem:[%s6332_s5] ss:$0 sm:$0xff]  ;;  %s5048_s0 = smov 56  }
  0x1a   :  { %4492 = vmatprep.subr.mxu0 %v87_v26  ;;  %250 = vmatprep.subr.mxu1 %v215_v51  ;;  %v5346_v18 = vld [vmem:[%s6329_s2] sm:$0xff] }
  0x1b   :  { %4493 = vmatpush3.msra.mxu0 %v71_v27  ;;  %251 = vmatpush1.msra.mxu1 %v214_v52 }
  0x1c   :  { %4494 = vmatprep.subr.mxu0 %v86_v28  ;;  %252 = vmatprep.subr.mxu1 %v213_v53 }
  0x1d   :  { %4495 = vmatpush3.msra.mxu0 %v70_v29  ;;  %253 = vmatpush1.msra.mxu1 %v212_v54 }
  0x1e   :  { %4496 = vmatprep.subr.mxu0 %v85_v30  ;;  %254 = vmatprep.subr.mxu1 %v211_v55 }
  0x1f   :  { %4497 = vmatpush3.msra.mxu0 %v69_v31  ;;  %255 = vmatpush1.msra.mxu1 %v210_v56  ;;  %v177_v31 = vld [vmem:[%s6330_s3] sm:$0xff] }
  0x20   :  { %4498 = vmatprep.subr.mxu0 %v84_v32  ;;  %256 = vmatprep.subr.mxu1 %v209_v57 }
  0x21   :  { %4499 = vmatpush3.msra.mxu0 %v68_v33  ;;  %257 = vmatpush1.msra.mxu1 %v208_v58 }
  0x22   :  { %4626 = vmatprep.subr.mxu0 %v5047_v48  ;;  %258 = vmatprep.subr.mxu1 %v207_v59 }
  0x23   :  { %259 = vmatpush1.msra.mxu1 %v206_v60  ;;  %54 = vperm.xlu1 %4916, %v46_v61  }
  0x24   :  { %4631 = vmatprep.subr.mxu1 %v5047_v48 }
  0x7d   :  { %v52_v37 = vpop.permute.xlu0 %51 }
  0x7e   :  { %vm57_vm0 = vcmp.eq.s32.totalorder %v5238_v36, %v52_v37  ;;  %vm56_vm1 = vcmp.eq.s32.totalorder %v5235_v35, %v52_v37 }
  0x7f   :  { %4334 = vmatprep.mubr.msk.f32.mxu0 %vm57_vm0, %v5046_v38 }
  0x80   :  { %4335 = vmatmul.mubr.msk.f32.vlgmr.msra.gmra.mxu0 %vm56_vm1, %v5046_v38 }
  0x9e   :  { %v55_v4 = vpop.permute.xlu1 %54 }
  0x9f   :  { %vm59_vm3 = vcmp.eq.s32.totalorder %v5238_v36, %v55_v4  ;;  %vm58_vm4 = vcmp.eq.s32.totalorder %v5235_v35, %v55_v4 }
  0xa0   :  { %4336 = vmatprep.mubr.msk.f32.mxu0 %vm59_vm3, %v5046_v38 }
  0xa1   :  { %4337 = vmatmul.mubr.msk.f32.gmra.mxu0 %vm58_vm4, %v5046_v38 }
  0xa2   :  { %4628 = vmatprep.mubr.msk.f32.mxu0 %vm5060_vm9, %v5047_v48 }
 0x140   :  { %v4500_v39 = vpop.f32.mrf.mxu0 }
 0x142   :  { %v4501_v40 = vpop.f32.mrf.mxu0 }
 0x143   :  { %v5242_v41 = vadd.f32 %v4501_v40, %v4500_v39 }
 0x145   :  { %v180_v42 = vmul.f32 %v5242_v41, %v5242_v41 }
 0x147   :  { %v183_v43 = vsel %vm182_vm2, %v180_v42, 0.0 }
 0x148   :  { %184 = vadd.xlane.f32.xlu0 %v183_v43 }
 0x161   :  { %v4503_v19 = vpop.f32.mrf.mxu0 }
 0x163   :  { %v4504_v20 = vpop.f32.mrf.mxu0 }
 0x164   :  { %v5351_v21 = vadd.f32 %v4504_v20, %v4503_v19 }
 0x166   :  { %v181_v22 = vmul.f32 %v5351_v21, %v5351_v21 }
 0x168   :  { %v186_v23 = vsel %vm182_vm2, %v181_v22, 0.0 }
 0x1d1   :  { %v185_v62 = vpop.xlane.xlu0 %184 }
 0x1d2   :  { %v190_v63 = vmul.f32 0.015625, %v185_v62 }
 0x1d4   :  { %v192_v0 = vadd.f32 1e-05, %v190_v63 }
 0x1d6   :  { %4917 = vrsqrt.f32 %v192_v0 }
 0x1e3   :  { %v4918_v1 = vpop.eup %4917 }
 0x1e4   :  { %v196_v3 = vmul.f32 %v4918_v1, %v5242_v41 }
 0x1e6   :  { %v204_v5 = vmul.f32 %v5304_v2, %v196_v3 }
 0x1e8   :  { %4339 = vmatmul.mubr.msk.f32.vlgmr.msra.gmra.mxu1 %vm182_vm2, %v204_v5 }
 0x1e9   :  { %298 = vmatprep.mubr.f32.mxu1 %v5047_v48 }
 0x2a8   :  { %v5312_v6 = vpop.f32.mrf.mxu1 }
 0x2a9   :  { %427 = vrot.lane.b32.xlu1 %v5312_v6, %s5048_s0  ;;  %v305_v8 = vsub.f32 0.0, %v5312_v6 }
 0x2aa   :  { %v5316_v7 = vpop.f32.mrf.mxu1 }
 0x2ab   :  { %4632 = vmatpush3.msra.mxu1 %v5316_v7 }
 0x2ac   :  { %4636 = vmatprep.subr.mxu1 %v5047_v48 }
 0x2ad   :  { %441 = vrot.lane.b32.xlu1 %v5312_v6, %s5049_s4 }
 0x2b1   :  { %421 = vrot.lane.b32.xlu1 %v305_v8, %s5049_s4 }
 0x2b5   :  { %435 = vrot.lane.b32.xlu1 %v305_v8, %s5050_s23 }
 0x2b9   :  { %449 = vrot.lane.b32.xlu1 %v305_v8, %s5051_s24 }
 0x2bd   :  { %455 = vrot.lane.b32.xlu1 %v5312_v6, %s5050_s23 }
 0x2c1   :  { %413 = vrot.lane.b32.xlu1 %v5312_v6, %s5052_s25 }
 0x2c5   :  { %407 = vrot.lane.b32.xlu1 %v305_v8, %s5048_s0 }
 0x31b   :  { %v428_v9 = vpop.permute.xlu1 %427 }
 0x31f   :  { %v442_v10 = vpop.permute.xlu1 %441 }
 0x323   :  { %v422_v11 = vpop.permute.xlu1 %421 }
 0x324   :  { %v433_v12 = vsel %vm323_vm5, %v422_v11, %v428_v9 }
 0x325   :  { %465 = vrot.lane.b32.xlu0 %v433_v12, %s5053_s26 }
 0x327   :  { %v436_v13 = vpop.permute.xlu1 %435 }
 0x328   :  { %v447_v14 = vsel %vm323_vm5, %v436_v13, %v442_v10 }
 0x329   :  { %326 = vrot.lane.b32.xlu0 %v305_v8, %s5054_s27  ;;  %473 = vrot.lane.b32.xlu1 %v447_v14, %s5055_s28 }
 0x32b   :  { %v450_v15 = vpop.permute.xlu1 %449 }
 0x32d   :  { %332 = vrot.lane.b32.xlu0 %v5312_v6, %s6351_s29 }
 0x32f   :  { %v456_v16 = vpop.permute.xlu1 %455 }
 0x330   :  { %v461_v17 = vsel %vm323_vm5, %v450_v15, %v456_v16 }
 0x331   :  { %340 = vrot.lane.b32.xlu0 %v305_v8, %s6349_s30  ;;  %481 = vrot.lane.b32.xlu1 %v461_v17, %s5058_s14  ;;  %v5436_v17 = vld [vmem:[%s6329_s2 + $0x8] sm:$0xff] }
 0x333   :  { %v414_v24 = vpop.permute.xlu1 %413 }
 0x335   :  { %346 = vrot.lane.b32.xlu0 %v5312_v6, %s5054_s27 }
 0x337   :  { %v408_v25 = vpop.permute.xlu1 %407 }
 0x338   :  { %v419_v28 = vsel %vm323_vm5, %v408_v25, %v414_v24 }
 0x339   :  { %495 = vrot.lane.b32.xlu0 %v5346_v18, %s6347_s17 }
 0x33d   :  { %354 = vrot.lane.b32.xlu0 %v305_v8, %s5052_s25 }
 0x355   :  { %187 = vadd.xlane.f32.xlu1 %v186_v23 }
 0x366   :  { %360 = vrot.lane.b32.xlu1 %v5312_v6, %s6349_s30 }
 0x397   :  { %v466_v26 = vpop.permute.xlu0 %465 }
 0x398   :  { %v487_v30 = vsel %vm392_vm6, %v419_v28, %v466_v26 }
 0x39b   :  { %v474_v27 = vpop.permute.xlu1 %473  ;;  %v327_v29 = vpop.permute.xlu0 %326 }
 0x39c   :  { %v489_v32 = vsel %vm395_vm7, %v487_v30, %v474_v27  ;;  %v178_v30 = vld [vmem:[%s6330_s3 + $0x8] sm:$0xff] }
 0x39f   :  { %v333_v36 = vpop.permute.xlu0 %332 }
 0x3a0   :  { %v338_v38 = vsel %vm323_vm5, %v327_v29, %v333_v36 }
 0x3a3   :  { %v482_v33 = vpop.permute.xlu1 %481  ;;  %v341_v37 = vpop.permute.xlu0 %340 }
 0x3a4   :  { %v491_v34 = vsel %vm398_vm8, %v489_v32, %v482_v33 }
 0x3a5   :  { %v503_v35 = vmul.f32 %v491_v34, %v177_v31 }
 0x3a7   :  { %507 = vrot.lane.b32.xlu0 %v503_v35, %s6347_s17  ;;  %v347_v39 = vpop.permute.xlu0 %346 }
 0x3a8   :  { %v352_v40 = vsel %vm323_vm5, %v341_v37, %v347_v39 }
 0x3ab   :  { %309 = vrot.lane.b32.xlu0 %v305_v8, %s6351_s29  ;;  %v5373_v42 = vpop.permute.xlu0 %495 }
 0x3ac   :  { %v501_v53 = vmul.f32 %v5373_v42, %v5312_v6 }
 0x3af   :  { %317 = vrot.lane.b32.xlu0 %v5312_v6, %s5051_s24  ;;  %v355_v46 = vpop.permute.xlu0 %354 }
 0x3b3   :  { %370 = vrot.lane.b32.xlu0 %v338_v38, %s5053_s26 }
 0x3b7   :  { %378 = vrot.lane.b32.xlu0 %v352_v40, %s5055_s28 }
 0x3de   :  { %v188_v43 = vpop.xlane.xlu1 %187 }
 0x3df   :  { %v191_v44 = vmul.f32 0.015625, %v188_v43 }
 0x3e1   :  { %v193_v45 = vadd.f32 1e-05, %v191_v44 }
 0x3e2   :  { %v361_v47 = vpop.permute.xlu1 %360 }
 0x3e3   :  { %4919 = vrsqrt.f32 %v193_v45  ;;  %v366_v49 = vsel %vm323_vm5, %v355_v46, %v361_v47 }
 0x3e4   :  { %386 = vrot.lane.b32.xlu1 %v366_v49, %s5058_s14 }
 0x3f0   :  { %v4920_v50 = vpop.eup %4919 }
 0x3f1   :  { %v197_v51 = vmul.f32 %v4920_v50, %v5351_v21 }
 0x3f3   :  { %v205_v52 = vmul.f32 %v5304_v2, %v197_v51  ;;  %v401_v2 = vmul.f32 %v5312_v6, %v5346_v18  ;;  %v5443_v18 = vld [vmem:[%s6328_s1] sm:$0xff] }
 0x3f5   :  { %4340 = vmatmul.mubr.msk.f32.gmra.mxu1 %vm182_vm2, %v205_v52 }
 0x3f6   :  { %4633 = vmatprep.mubr.msk.f32.mxu1 %vm5060_vm9, %v5047_v48 }
 0x419   :  { %v508_v54 = vpop.permute.xlu0 %507 }
 0x41a   :  { %v5386_v55 = vadd.f32 %v508_v54, %v501_v53 }
 0x41c   :  { %517 = vrot.lane.b32.xlu0 %v5386_v55, %s6347_s17 }
 0x41d   :  { %v310_v56 = vpop.permute.xlu0 %309 }
 0x421   :  { %v318_v57 = vpop.permute.xlu0 %317 }
 0x422   :  { %v324_v60 = vsel %vm323_vm5, %v310_v56, %v318_v57 }
 0x425   :  { %v371_v58 = vpop.permute.xlu0 %370 }
 0x426   :  { %v393_v62 = vsel %vm392_vm6, %v324_v60, %v371_v58 }
 0x429   :  { %v379_v59 = vpop.permute.xlu0 %378 }
 0x42a   :  { %v396_v63 = vsel %vm395_vm7, %v393_v62, %v379_v59 }
 0x456   :  { %v387_v61 = vpop.permute.xlu1 %386 }
 0x457   :  { %v399_v0 = vsel %vm398_vm8, %v396_v63, %v387_v61 }
 0x458   :  { %v403_v1 = vmul.f32 %v399_v0, %v177_v31 }
 0x45a   :  { %v5397_v4 = vadd.f32 %v403_v1, %v401_v2 }
 0x48e   :  { %v518_v3 = vpop.permute.xlu0 %517 }
 0x48f   :  { %4627 = vmatpush3.xpose.msk.msra.mxu0 %vm392_vm6, %v518_v3 }
 0x490   :  { %4646 = vmatprep.subr.mxu0 %v5047_v48 }
 0x492   :  { %4629 = vmatmul.mubr.msk.f32.vlgmr.msra.gmra.mxu0 %vm392_vm6, %v5397_v4 }
 0x493   :  { %4648 = vmatprep.mubr.msk.f32.mxu0 %vm5060_vm9, %v5047_v48 }
 0x4b5   :  { %v5404_v5 = vpop.f32.mrf.mxu1 }
 0x4b6   :  { %429 = vrot.lane.b32.xlu0 %v5404_v5, %s5048_s0  ;;  %v306_v6 = vsub.f32 0.0, %v5404_v5  ;;  %v402_v1 = vmul.f32 %v5404_v5, %v5436_v17 }
 0x4b8   :  { %423 = vrot.lane.b32.xlu1 %v306_v6, %s5049_s4 }
 0x4ba   :  { %443 = vrot.lane.b32.xlu0 %v5404_v5, %s5049_s4 }
 0x4bc   :  { %437 = vrot.lane.b32.xlu1 %v306_v6, %s5050_s23 }
 0x4be   :  { %457 = vrot.lane.b32.xlu0 %v5404_v5, %s5050_s23 }
 0x4c0   :  { %451 = vrot.lane.b32.xlu1 %v306_v6, %s5051_s24 }
 0x4c2   :  { %409 = vrot.lane.b32.xlu0 %v306_v6, %s5048_s0 }
 0x4c6   :  { %415 = vrot.lane.b32.xlu0 %v5404_v5, %s5052_s25 }
 0x528   :  { %v430_v8 = vpop.permute.xlu0 %429 }
 0x52a   :  { %v424_v9 = vpop.permute.xlu1 %423 }
 0x52b   :  { %v434_v10 = vsel %vm323_vm5, %v424_v9, %v430_v8 }
 0x52c   :  { %v444_v11 = vpop.permute.xlu0 %443  ;;  %467 = vrot.lane.b32.xlu0 %v434_v10, %s5053_s26 }
 0x52e   :  { %v438_v12 = vpop.permute.xlu1 %437 }
 0x52f   :  { %v448_v13 = vsel %vm323_vm5, %v438_v12, %v444_v11 }
 0x530   :  { %475 = vrot.lane.b32.xlu0 %v448_v13, %s5055_s28  ;;  %v458_v14 = vpop.permute.xlu0 %457 }
 0x532   :  { %v452_v15 = vpop.permute.xlu1 %451 }
 0x533   :  { %v462_v16 = vsel %vm323_vm5, %v452_v15, %v458_v14 }
 0x534   :  { %483 = vrot.lane.b32.xlu0 %v462_v16, %s5058_s14  ;;  %v410_v24 = vpop.permute.xlu0 %409 }
 0x538   :  { %328 = vrot.lane.b32.xlu0 %v306_v6, %s5054_s27  ;;  %v416_v25 = vpop.permute.xlu0 %415 }
 0x539   :  { %v420_v28 = vsel %vm323_vm5, %v410_v24, %v416_v25 }
 0x53c   :  { %334 = vrot.lane.b32.xlu0 %v5404_v5, %s6351_s29 }
 0x540   :  { %342 = vrot.lane.b32.xlu0 %v306_v6, %s6349_s30 }
 0x544   :  { %348 = vrot.lane.b32.xlu0 %v5404_v5, %s5054_s27 }
 0x548   :  { %362 = vrot.lane.b32.xlu0 %v5404_v5, %s6349_s30 }
 0x54c   :  { %497 = vrot.lane.b32.xlu0 %v5436_v17, %s6347_s17 }
 0x552   :  { %v590_v19 = vpop.f32.mrf.mxu0 }
 0x553   :  { %v591_v20 = vadd.f32 %v590_v19, %v5443_v18 }
 0x554   :  { %v4630_v22 = vpop.f32.mrf.mxu0 }
 0x555   :  { %v594_v23 = vsel %vm323_vm5, %v591_v20, -inf }
 0x556   :  { %595 = vmax.xlane.f32.xlu1 %v594_v23 }
 0x567   :  { %356 = vrot.lane.b32.xlu1 %v306_v6, %s5052_s25 }
 0x56b   :  { %319 = vrot.lane.b32.xlu1 %v5404_v5, %s5051_s24 }
 0x59e   :  { %v468_v26 = vpop.permute.xlu0 %467 }
 0x59f   :  { %v488_v29 = vsel %vm392_vm6, %v420_v28, %v468_v26 }
 0x5a2   :  { %v476_v27 = vpop.permute.xlu0 %475 }
 0x5a3   :  { %v490_v31 = vsel %vm395_vm7, %v488_v29, %v476_v27  ;;  %v5532_v29 = vpop.f32.mrf.mxu1 }
 0x5a6   :  { %v484_v32 = vpop.permute.xlu0 %483 }
 0x5a7   :  { %v492_v33 = vsel %vm398_vm8, %v490_v31, %v484_v32 }
 0x5a8   :  { %v504_v34 = vmul.f32 %v492_v33, %v178_v30 }
 0x5aa   :  { %509 = vrot.lane.b32.xlu0 %v504_v34, %s6347_s17  ;;  %v329_v35 = vpop.permute.xlu0 %328 }
 0x5ae   :  { %311 = vrot.lane.b32.xlu0 %v306_v6, %s6351_s29  ;;  %v335_v36 = vpop.permute.xlu0 %334 }
 0x5af   :  { %v339_v37 = vsel %vm323_vm5, %v329_v35, %v335_v36 }
 0x5b2   :  { %372 = vrot.lane.b32.xlu0 %v339_v37, %s5053_s26  ;;  %v343_v38 = vpop.permute.xlu0 %342  ;;  %v4353_v37 = vld [vmem:[%s6328_s1 + $0x8] sm:$0xff] }
 0x5b6   :  { %v349_v39 = vpop.permute.xlu0 %348 }
 0x5b7   :  { %v353_v40 = vsel %vm323_vm5, %v343_v38, %v349_v39 }
 0x5b8   :  { %380 = vrot.lane.b32.xlu1 %v353_v40, %s5055_s28 }
 0x5ba   :  { %v363_v46 = vpop.permute.xlu0 %362 }
 0x5be   :  { %v5478_v52 = vpop.permute.xlu0 %497 }
 0x5bf   :  { %v502_v53 = vmul.f32 %v5478_v52, %v5404_v5 }
 0x5df   :  { %v596_v43 = vpop.xlane.xlu1 %595 }
 0x5e0   :  { %v597_v44 = vsub.f32 %v591_v20, %v596_v43 }
 0x5e2   :  { %v598_v45 = vmul.f32 1.442695, %v597_v44 }
 0x5e3   :  { %v357_v47 = vpop.permute.xlu1 %356 }
 0x5e4   :  { %4921 = vpow2.f32 %v598_v45  ;;  %v367_v49 = vsel %vm323_vm5, %v357_v47, %v363_v46 }
 0x5e5   :  { %388 = vrot.lane.b32.xlu0 %v367_v49, %s5058_s14 }
 0x5e7   :  { %v320_v58 = vpop.permute.xlu1 %319 }
 0x5e9   :  { %680 = vrot.lane.b32.xlu0 %v5386_v55, %s5058_s14 }
 0x5ed   :  { %678 = vrot.lane.b32.xlu0 %v5397_v4, %s6345_s19 }
 0x5f1   :  { %v4922_v50 = vpop.eup %4921  ;;  %846 = vrot.lane.b32.xlu0 %v5386_v55, %s5055_s28 }
 0x5f2   :  { %v600_v51 = vsel %vm323_vm5, %v4922_v50, 0.0 }
 0x5f3   :  { %601 = vadd.xlane.f32.xlu1 %v600_v51 }
 0x5f5   :  { %844 = vrot.lane.b32.xlu0 %v5397_v4, %s6343_s20 }
 0x5f9   :  { %1011 = vrot.lane.b32.xlu0 %v5386_v55, %s5053_s26 }
 0x5fd   :  { %1009 = vrot.lane.b32.xlu0 %v5397_v4, %s6341_s21 }
 0x61c   :  { %v510_v54 = vpop.permute.xlu0 %509 }
 0x61d   :  { %v514_v56 = vadd.f32 %v510_v54, %v502_v53 }
 0x61f   :  { %1521 = vrot.lane.b32.xlu1 %v514_v56, %s5055_s28  ;;  %1192 = vrot.lane.b32.xlu0 %v514_v56, %s6347_s17 }
 0x620   :  { %v312_v57 = vpop.permute.xlu0 %311 }
 0x621   :  { %v325_v60 = vsel %vm323_vm5, %v312_v57, %v320_v58 }
 0x623   :  { %1355 = vrot.lane.b32.xlu0 %v514_v56, %s5058_s14 }
 0x624   :  { %v373_v55 = vpop.permute.xlu0 %372 }
 0x625   :  { %v394_v61 = vsel %vm392_vm6, %v325_v60, %v373_v55 }
 0x62a   :  { %v381_v59 = vpop.permute.xlu1 %380 }
 0x62b   :  { %v397_v62 = vsel %vm395_vm7, %v394_v61, %v381_v59 }
 0x657   :  { %v389_v63 = vpop.permute.xlu0 %388 }
 0x658   :  { %v400_v0 = vsel %vm398_vm8, %v397_v62, %v389_v63 }
 0x659   :  { %v404_v2 = vmul.f32 %v400_v0, %v178_v30 }
 0x65b   :  { %v406_v3 = vadd.f32 %v404_v2, %v402_v1  ;;  %v681_v4 = vpop.permute.xlu0 %680 }
 0x65d   :  { %1353 = vrot.lane.b32.xlu0 %v406_v3, %s6345_s19 }
 0x65f   :  { %v679_v6 = vpop.permute.xlu0 %678 }
 0x661   :  { %1519 = vrot.lane.b32.xlu0 %v406_v3, %s6343_s20 }
 0x663   :  { %v847_v8 = vpop.permute.xlu0 %846 }
 0x664   :  { %4647 = vmatpush3.xpose.msk.msra.mxu0 %vm392_vm6, %v847_v8 }
 0x665   :  { %1686 = vrot.lane.b32.xlu0 %v514_v56, %s5053_s26  ;;  %4656 = vmatprep.subr.mxu0 %v5047_v48 }
 0x667   :  { %v845_v9 = vpop.permute.xlu0 %844 }
 0x668   :  { %4649 = vmatmul.mubr.msk.f32.vlgmr.msra.gmra.mxu0 %vm392_vm6, %v845_v9 }
 0x669   :  { %1684 = vrot.lane.b32.xlu0 %v406_v3, %s6341_s21  ;;  %4658 = vmatprep.mubr.msk.f32.mxu0 %vm5060_vm9, %v5047_v48 }
 0x66b   :  { %v1012_v5 = vpop.permute.xlu0 %1011 }
 0x66c   :  { %4657 = vmatpush3.xpose.msk.msra.mxu0 %vm392_vm6, %v1012_v5 }
 0x66d   :  { %4666 = vmatprep.subr.mxu0 %v5047_v48 }
 0x66f   :  { %v1010_v10 = vpop.permute.xlu0 %1009 }
 0x670   :  { %4659 = vmatmul.mubr.msk.f32.vlgmr.msra.gmra.mxu0 %vm392_vm6, %v1010_v10 }
 0x671   :  { %4668 = vmatprep.mubr.msk.f32.mxu0 %vm5060_vm9, %v5047_v48 }
 0x67c   :  { %v602_v11 = vpop.xlane.xlu1 %601 }
 0x67d   :  { %4923 = vrcp.f32 %v602_v11 }
 0x68a   :  { %v4924_v12 = vpop.eup %4923 }
 0x68b   :  { %v604_v13 = vmul.f32 %v4924_v12, %v4922_v50 }
 0x68d   :  { %4634 = vmatmul.mubr.msk.f32.vlgmr.msra.gmra.mxu1 %vm323_vm5, %v604_v13 }
 0x68e   :  { %4637 = vmatpush3.xpose.msk.msra.mxu1 %vm392_vm6, %v681_v4  ;;  %4638 = vmatprep.mubr.msk.f32.mxu1 %vm5060_vm9, %v5047_v48 }
 0x68f   :  { %4641 = vmatprep.subr.mxu1 %v5047_v48 }
 0x691   :  { %v1193_v14 = vpop.permute.xlu0 %1192  ;;  %4639 = vmatmul.mubr.msk.f32.vlgmr.msra.gmra.mxu1 %vm392_vm6, %v679_v6  ;;  %v1522_v17 = vpop.permute.xlu1 %1521 }
 0x692   :  { %4667 = vmatpush3.xpose.msk.msra.mxu0 %vm392_vm6, %v1193_v14  ;;  %4643 = vmatprep.mubr.msk.f32.mxu1 %vm5060_vm9, %v5047_v48 }
 0x693   :  { %4676 = vmatprep.subr.mxu0 %v5047_v48 }
 0x695   :  { %v1356_v15 = vpop.permute.xlu0 %1355  ;;  %4669 = vmatmul.mubr.msk.f32.vlgmr.msra.gmra.mxu0 %vm392_vm6, %v406_v3 }
 0x696   :  { %4677 = vmatpush3.xpose.msk.msra.mxu0 %vm392_vm6, %v1356_v15  ;;  %4678 = vmatprep.mubr.msk.f32.mxu0 %vm5060_vm9, %v5047_v48 }
 0x697   :  { %4686 = vmatprep.subr.mxu0 %v5047_v48 }
 0x6cf   :  { %v1354_v16 = vpop.permute.xlu0 %1353 }
 0x6d0   :  { %4679 = vmatmul.mubr.msk.f32.vlgmr.msra.gmra.mxu0 %vm392_vm6, %v1354_v16 }
 0x6d1   :  { %4687 = vmatpush3.xpose.msk.msra.mxu0 %vm392_vm6, %v1522_v17  ;;  %4688 = vmatprep.mubr.msk.f32.mxu0 %vm5060_vm9, %v5047_v48 }
 0x6d2   :  { %4696 = vmatprep.subr.mxu0 %v5047_v48 }
 0x6d3   :  { %v1520_v19 = vpop.permute.xlu0 %1519 }
 0x6d4   :  { %4689 = vmatmul.mubr.msk.f32.vlgmr.msra.gmra.mxu0 %vm392_vm6, %v1520_v19 }
 0x6d5   :  { %4698 = vmatprep.mubr.msk.f32.mxu0 %vm5060_vm9, %v5047_v48 }
 0x6d7   :  { %v1687_v20 = vpop.permute.xlu0 %1686 }
 0x6d8   :  { %4697 = vmatpush3.xpose.msk.msra.mxu0 %vm392_vm6, %v1687_v20 }
 0x6db   :  { %v1685_v22 = vpop.permute.xlu0 %1684 }
 0x6dc   :  { %4699 = vmatmul.mubr.msk.f32.vlgmr.msra.gmra.mxu0 %vm392_vm6, %v1685_v22 }
 0x728   :  { %v918_v23 = vpop.f32.mrf.mxu0 }
 0x729   :  { %v919_v24 = vadd.f32 %v918_v23, %v5443_v18 }
 0x72a   :  { %v4650_v25 = vpop.f32.mrf.mxu0 }
 0x72b   :  { %v922_v26 = vsel %vm323_vm5, %v919_v24, -inf }
 0x72c   :  { %923 = vmax.xlane.f32.xlu1 %v922_v26 }
 0x730   :  { %v1083_v27 = vpop.f32.mrf.mxu0 }
 0x731   :  { %v1084_v35 = vadd.f32 %v1083_v27, %v5443_v18 }
 0x732   :  { %v4660_v28 = vpop.f32.mrf.mxu0 }
 0x733   :  { %v1087_v43 = vsel %vm323_vm5, %v1084_v35, -inf }
 0x74d   :  { %v5534_v30 = vpop.f32.mrf.mxu1 }
 0x74f   :  { %v4635_v31 = vpop.f32.mrf.mxu1 }
 0x751   :  { %v752_v32 = vpop.f32.mrf.mxu1 }
 0x752   :  { %v753_v33 = vadd.f32 %v752_v32, %v5443_v18 }
 0x753   :  { %v4640_v34 = vpop.f32.mrf.mxu1 }
 0x754   :  { %v756_v36 = vsel %vm323_vm5, %v753_v33, -inf }
 0x755   :  { %v1265_v38 = vpop.f32.mrf.mxu0  ;;  %757 = vmax.xlane.f32.xlu0 %v756_v36 }
 0x756   :  { %v1266_v40 = vadd.f32 %v4353_v37, %v1265_v38 }
 0x757   :  { %v4670_v39 = vpop.f32.mrf.mxu0 }
 0x758   :  { %v1269_v44 = vsel %vm323_vm5, %v1266_v40, -inf }
 0x759   :  { %1088 = vmax.xlane.f32.xlu0 %v1087_v43 }
 0x75d   :  { %1270 = vmax.xlane.f32.xlu0 %v1269_v44 }
 0x790   :  { %v1427_v45 = vpop.f32.mrf.mxu0 }
 0x791   :  { %v1428_v46 = vadd.f32 %v4353_v37, %v1427_v45 }
 0x792   :  { %v4680_v47 = vpop.f32.mrf.mxu0 }
 0x793   :  { %v1431_v18 = vsel %vm323_vm5, %v1428_v46, -inf }
 0x794   :  { %1432 = vmax.xlane.f32.xlu1 %v1431_v18  ;;  %v1593_v49 = vpop.f32.mrf.mxu0 }
 0x795   :  { %v1594_v50 = vadd.f32 %v4353_v37, %v1593_v49 }
 0x796   :  { %v4690_v51 = vpop.f32.mrf.mxu0 }
 0x797   :  { %v1597_v53 = vsel %vm323_vm5, %v1594_v50, -inf }
 0x798   :  { %1598 = vmax.xlane.f32.xlu0 %v1597_v53 }
 0x79c   :  { %v1758_v54 = vpop.f32.mrf.mxu0 }
 0x79d   :  { %v1759_v56 = vadd.f32 %v4353_v37, %v1758_v54 }
 0x79e   :  { %v4700_v57 = vpop.f32.mrf.mxu0 }
 0x79f   :  { %v1762_v58 = vsel %vm323_vm5, %v1759_v56, -inf }
 0x7a0   :  { %1763 = vmax.xlane.f32.xlu1 %v1762_v58 }
 0x7b5   :  { %v924_v55 = vpop.xlane.xlu1 %923 }
 0x7b6   :  { %v925_v59 = vsub.f32 %v919_v24, %v924_v55 }
 0x7b8   :  { %v926_v60 = vmul.f32 1.442695, %v925_v59 }
 0x7ba   :  { %4925 = vpow2.f32 %v926_v60 }
 0x7c7   :  { %v5547_v61 = vpop.eup %4925 }
 0x7c8   :  { %v928_v62 = vsel %vm323_vm5, %v5547_v61, 0.0 }
 0x7c9   :  { %929 = vadd.xlane.f32.xlu1 %v928_v62  ;;  %v1871_v62 = vld [vmem:[%s6334_s7 + $0x38] sm:$0xff] }
 0x7ca   :  { %4706 = vmatprep.subr.mxu0 %v1871_v62 }
 0x7cb   :  { %4707 = vmatpush3.msra.mxu0 %v1871_v62 }
 0x7de   :  { %v758_v63 = vpop.xlane.xlu0 %757 }
 0x7df   :  { %v759_v17 = vsub.f32 %v753_v33, %v758_v63  ;;  %v1870_v63 = vld [vmem:[%s6334_s7 + $0x30] sm:$0xff] }
 0x7e0   :  { %4708 = vmatprep.subr.mxu0 %v1870_v63 }
 0x7e1   :  { %v760_v22 = vmul.f32 1.442695, %v759_v17  ;;  %4709 = vmatpush3.msra.mxu0 %v1870_v63 }
 0x7e2   :  { %v1089_v0 = vpop.xlane.xlu0 %1088 }
 0x7e3   :  { %v1090_v1 = vsub.f32 %v1084_v35, %v1089_v0  ;;  %v1869_v0 = vld [vmem:[%s6334_s7 + $0x28] sm:$0xff] }
 0x7e4   :  { %4710 = vmatprep.subr.mxu0 %v1869_v0 }
 0x7e5   :  { %v1091_v2 = vmul.f32 1.442695, %v1090_v1  ;;  %4711 = vmatpush3.msra.mxu0 %v1869_v0 }
 0x7e6   :  { %v1271_v3 = vpop.xlane.xlu0 %1270 }
 0x7e7   :  { %4927 = vpow2.f32 %v1091_v2  ;;  %v1272_v4 = vsub.f32 %v1266_v40, %v1271_v3  ;;  %v1868_v2 = vld [vmem:[%s6334_s7 + $0x20] sm:$0xff] }
 0x7e8   :  { %4712 = vmatprep.subr.mxu0 %v1868_v2 }
 0x7e9   :  { %v1273_v6 = vmul.f32 1.442695, %v1272_v4  ;;  %4713 = vmatpush3.msra.mxu0 %v1868_v2 }
 0x7eb   :  { %4929 = vpow2.f32 %v1273_v6  ;;  %v1867_v6 = vld [vmem:[%s6334_s7 + $0x18] sm:$0xff] }
 0x7ec   :  { %4714 = vmatprep.subr.mxu0 %v1867_v6 }
 0x7ed   :  { %4715 = vmatpush3.msra.mxu0 %v1867_v6 }
 0x7f4   :  { %v5551_v8 = vpop.eup %4927 }
 0x7f5   :  { %v1093_v9 = vsel %vm323_vm5, %v5551_v8, 0.0 }
 0x7f6   :  { %1094 = vadd.xlane.f32.xlu0 %v1093_v9 }
 0x7f8   :  { %v5555_v5 = vpop.eup %4929 }
 0x7f9   :  { %v1275_v10 = vsel %vm323_vm5, %v5555_v5, 0.0 }
 0x7fa   :  { %1276 = vadd.xlane.f32.xlu1 %v1275_v10  ;;  %v1865_v10 = vld [vmem:[%s6334_s7 + $0x8] sm:$0xff] }
 0x81d   :  { %v1433_v11 = vpop.xlane.xlu1 %1432 }
 0x81e   :  { %v1434_v12 = vsub.f32 %v1428_v46, %v1433_v11  ;;  %v1864_v11 = vld [vmem:[%s6334_s7] sm:$0xff] }
 0x820   :  { %v1435_v13 = vmul.f32 1.442695, %v1434_v12 }
 0x821   :  { %v1599_v14 = vpop.xlane.xlu0 %1598 }
 0x822   :  { %4931 = vpow2.f32 %v1435_v13  ;;  %v1600_v15 = vsub.f32 %v1594_v50, %v1599_v14 }
 0x824   :  { %v1601_v16 = vmul.f32 1.442695, %v1600_v15 }
 0x826   :  { %4933 = vpow2.f32 %v1601_v16 }
 0x829   :  { %v1764_v19 = vpop.xlane.xlu1 %1763 }
 0x82a   :  { %v1765_v20 = vsub.f32 %v1759_v56, %v1764_v19 }
 0x82c   :  { %v1766_v23 = vmul.f32 1.442695, %v1765_v20 }
 0x82e   :  { %4935 = vpow2.f32 %v1766_v23 }
 0x82f   :  { %v5559_v24 = vpop.eup %4931  ;;  %4937 = vpow2.f32 %v760_v22 }
 0x830   :  { %v1437_v25 = vsel %vm323_vm5, %v5559_v24, 0.0 }
 0x831   :  { %1438 = vadd.xlane.f32.xlu0 %v1437_v25 }
 0x833   :  { %v5563_v26 = vpop.eup %4933 }
 0x834   :  { %v1603_v27 = vsel %vm323_vm5, %v5563_v26, 0.0 }
 0x835   :  { %1604 = vadd.xlane.f32.xlu1 %v1603_v27 }
 0x83b   :  { %v5567_v28 = vpop.eup %4935 }
 0x83c   :  { %v1768_v31 = vsel %vm323_vm5, %v5567_v28, 0.0  ;;  %v4938_v32 = vpop.eup %4937 }
 0x83d   :  { %1769 = vadd.xlane.f32.xlu0 %v1768_v31  ;;  %v762_v33 = vsel %vm323_vm5, %v4938_v32, 0.0 }
 0x841   :  { %763 = vadd.xlane.f32.xlu0 %v762_v33 }
 0x846   :  { %768 = vrot.lane.b32.xlu1 %v5316_v7, %s6345_s19 }
 0x84a   :  { %1098 = vrot.lane.b32.xlu1 %v5316_v7, %s6341_s21 }
 0x84e   :  { %1443 = vrot.lane.b32.xlu1 %v5532_v29, %s6345_s19 }
 0x852   :  { %1773 = vrot.lane.b32.xlu1 %v5532_v29, %s6341_s21  ;;  %v930_v34 = vpop.xlane.xlu1 %929 }
 0x857   :  { %933 = vrot.lane.b32.xlu0 %v5316_v7, %s6343_s20 }
 0x85b   :  { %1608 = vrot.lane.b32.xlu0 %v5532_v29, %s6343_s20  ;;  %s6355_s20 = smov 64  }
 0x87f   :  { %v1095_v36 = vpop.xlane.xlu0 %1094 }
 0x883   :  { %v1277_v35 = vpop.xlane.xlu1 %1276 }
 0x8ba   :  { %v1439_v38 = vpop.xlane.xlu0 %1438 }
 0x8be   :  { %v1605_v37 = vpop.xlane.xlu1 %1604 }
 0x8c2   :  { %v769_v39 = vpop.permute.xlu1 %768 }
 0x8c3   :  { %4642 = vmatpush3.msra.mxu1 %v769_v39 }
 0x8c4   :  { %4651 = vmatprep.subr.mxu1 %v5047_v48 }
 0x8c6   :  { %v1770_v40 = vpop.xlane.xlu0 %1769  ;;  %v1099_v49 = vpop.permute.xlu1 %1098 }
 0x8ca   :  { %v764_v43 = vpop.xlane.xlu0 %763  ;;  %v1444_v56 = vpop.permute.xlu1 %1443 }
 0x8cb   :  { %4939 = vrcp.f32 %v764_v43 }
 0x8cc   :  { %4941 = vrcp.f32 %v930_v34 }
 0x8cd   :  { %4943 = vrcp.f32 %v1095_v36 }
 0x8ce   :  { %4945 = vrcp.f32 %v1277_v35  ;;  %v934_v46 = vpop.permute.xlu0 %933  ;;  %v1774_v60 = vpop.permute.xlu1 %1773 }
 0x8cf   :  { %4947 = vrcp.f32 %v1439_v38 }
 0x8d0   :  { %4949 = vrcp.f32 %v1605_v37 }
 0x8d1   :  { %4951 = vrcp.f32 %v1770_v40 }
 0x8d2   :  { %v1609_v58 = vpop.permute.xlu0 %1608 }
 0x8d8   :  { %v4940_v44 = vpop.eup %4939 }
 0x8d9   :  { %v766_v7 = vmul.f32 %v4940_v44, %v4938_v32  ;;  %v4942_v45 = vpop.eup %4941 }
 0x8da   :  { %v932_v47 = vmul.f32 %v4942_v45, %v5547_v61  ;;  %v4944_v18 = vpop.eup %4943  ;;  %v1993_v45 = vld [vmem:[%s6336_s9 + $0x68] sm:$0xff] }
 0x8db   :  { %4644 = vmatmul.mubr.msk.f32.vlgmr.msra.gmra.mxu1 %vm323_vm5, %v766_v7  ;;  %v1097_v50 = vmul.f32 %v4944_v18, %v5551_v8  ;;  %v4946_v51 = vpop.eup %4945  ;;  %v1866_v8 = vld [vmem:[%s6334_s7 + $0x10] sm:$0xff] }
 0x8dc   :  { %4652 = vmatpush3.msra.mxu1 %v934_v46  ;;  %4653 = vmatprep.mubr.msk.f32.mxu1 %vm5060_vm9, %v5047_v48  ;;  %v1279_v53 = vmul.f32 %v4946_v51, %v5555_v5  ;;  %v4948_v54 = vpop.eup %4947  ;;  %v1992_v46 = vld [vmem:[%s6336_s9 + $0x60] sm:$0xff]  ;;  %v1990_v18 = vld [vmem:[%s6336_s9 + $0x50] sm:$0xff]  ;;  %v1987_v51 = vld [vmem:[%s6336_s9 + $0x38] sm:$0xff] }
 0x8dd   :  { %4661 = vmatprep.subr.mxu1 %v5047_v48  ;;  %v1441_v57 = vmul.f32 %v4948_v54, %v5559_v24  ;;  %4716 = vmatprep.subr.mxu0 %v1866_v8  ;;  %v1985_v54 = vld [vmem:[%s6336_s9 + $0x28] sm:$0xff] }
 0x8de   :  { %4717 = vmatpush3.msra.mxu0 %v1866_v8 }
 0x8df   :  { %4654 = vmatmul.mubr.msk.f32.vlgmr.msra.gmra.mxu1 %vm323_vm5, %v932_v47  ;;  %4718 = vmatprep.subr.mxu0 %v1865_v10  ;;  %v1991_v47 = vld [vmem:[%s6336_s9 + $0x58] sm:$0xff] }
 0x8e0   :  { %4662 = vmatpush3.msra.mxu1 %v1099_v49  ;;  %4663 = vmatprep.mubr.msk.f32.mxu1 %vm5060_vm9, %v5047_v48  ;;  %v1989_v49 = vld [vmem:[%s6336_s9 + $0x48] sm:$0xff] }
 0x8e1   :  { %4671 = vmatprep.subr.mxu1 %v5047_v48  ;;  %4719 = vmatpush3.msra.mxu0 %v1865_v10  ;;  %v2109_v10 = vld [vmem:[%s6337_s10 + $0x70] sm:$0xff] }
 0x8e2   :  { %4720 = vmatprep.subr.mxu0 %v1864_v11 }
 0x8e3   :  { %4664 = vmatmul.mubr.msk.f32.vlgmr.msra.gmra.mxu1 %vm323_vm5, %v1097_v50  ;;  %4721 = vmatpush3.msra.mxu0 %v1864_v11  ;;  %v1988_v50 = vld [vmem:[%s6336_s9 + $0x40] sm:$0xff]  ;;  %v2108_v11 = vld [vmem:[%s6337_s10 + $0x68] sm:$0xff] }
 0x8e4   :  { %4672 = vmatpush3.msra.mxu1 %v5532_v29  ;;  %4673 = vmatprep.mubr.msk.f32.mxu1 %vm5060_vm9, %v5047_v48  ;;  %v4950_v29 = vpop.eup %4949 }
 0x8e5   :  { %4681 = vmatprep.subr.mxu1 %v5047_v48  ;;  %v1607_v55 = vmul.f32 %v4950_v29, %v5563_v26  ;;  %v4952_v59 = vpop.eup %4951  ;;  %v1982_v29 = vld [vmem:[%s6336_s9 + $0x10] sm:$0xff] }
 0x8e6   :  { %v1772_v61 = vmul.f32 %v4952_v59, %v5567_v28 }
 0x8e7   :  { %4674 = vmatmul.mubr.msk.f32.vlgmr.msra.gmra.mxu1 %vm323_vm5, %v1279_v53  ;;  %v1986_v53 = vld [vmem:[%s6336_s9 + $0x30] sm:$0xff] }
 0x8e8   :  { %4682 = vmatpush3.msra.mxu1 %v1444_v56  ;;  %4683 = vmatprep.mubr.msk.f32.mxu1 %vm5060_vm9, %v5047_v48  ;;  %v1984_v56 = vld [vmem:[%s6336_s9 + $0x20] sm:$0xff] }
 0x8e9   :  { %4691 = vmatprep.subr.mxu1 %v5047_v48 }
 0x8eb   :  { %4684 = vmatmul.mubr.msk.f32.vlgmr.msra.gmra.mxu1 %vm323_vm5, %v1441_v57  ;;  %v1983_v57 = vld [vmem:[%s6336_s9 + $0x18] sm:$0xff] }
 0x8ec   :  { %4692 = vmatpush3.msra.mxu1 %v1609_v58  ;;  %4693 = vmatprep.mubr.msk.f32.mxu1 %vm5060_vm9, %v5047_v48  ;;  %v1981_v58 = vld [vmem:[%s6336_s9 + $0x8] sm:$0xff] }
 0x8ed   :  { %4701 = vmatprep.subr.mxu1 %v5047_v48 }
 0x8ef   :  { %4694 = vmatmul.mubr.msk.f32.vlgmr.msra.gmra.mxu1 %vm323_vm5, %v1607_v55  ;;  %v1980_v55 = vld [vmem:[%s6336_s9] sm:$0xff] }
 0x8f0   :  { %4702 = vmatpush3.msra.mxu1 %v1774_v60  ;;  %4703 = vmatprep.mubr.msk.f32.mxu1 %vm5060_vm9, %v5047_v48 }
 0x8f3   :  { %4704 = vmatmul.mubr.msk.f32.vlgmr.msra.gmra.mxu1 %vm323_vm5, %v1772_v61 }
 0x8f4   :  { %2066 = vmatprep.mubr.f32.mxu1 %v5047_v48 }
 0x99b   :  { %v840_v1 = vpop.f32.mrf.mxu1 }
 0x99c   :  { %1175 = vrot.lane.b32.xlu0 %v840_v1, %s5053_s26 }
 0x99d   :  { %v4645_v3 = vpop.f32.mrf.mxu1 }
 0x99f   :  { %v1005_v4 = vpop.f32.mrf.mxu1 }
 0x9a0   :  { %1179 = vrot.lane.b32.xlu1 %v1005_v4, %s5055_s28  ;;  %v4368_v4 = vld [vmem:[%s6335_s8] ss:$0 sm:$0xff] }
 0x9a1   :  { %v4655_v9 = vpop.f32.mrf.mxu1 }
 0x9a3   :  { %v1170_v5 = vpop.f32.mrf.mxu1 }
 0x9a4   :  { %1183 = vrot.lane.b32.xlu1 %v1170_v5, %s5058_s14  ;;  %v2110_v5 = vld [vmem:[%s6337_s10 + $0x78] sm:$0xff] }
 0x9a5   :  { %v4665_v12 = vpop.f32.mrf.mxu1  ;;  %4725 = vmatprep.subr.mxu0 %v2110_v5 }
 0x9a6   :  { %v2107_v12 = vld [vmem:[%s6337_s10 + $0x60] sm:$0xff] }
 0x9a7   :  { %v1349_v13 = vpop.f32.mrf.mxu1 }
 0x9a9   :  { %v4675_v14 = vpop.f32.mrf.mxu1 }
 0x9aa   :  { %v2105_v14 = vld [vmem:[%s6337_s10 + $0x50] sm:$0xff] }
 0x9ab   :  { %v1515_v15 = vpop.f32.mrf.mxu1 }
 0x9ac   :  { %1850 = vrot.lane.b32.xlu0 %v1515_v15, %s5053_s26  ;;  %v2104_v15 = vld [vmem:[%s6337_s10 + $0x48] sm:$0xff] }
 0x9ad   :  { %v4685_v16 = vpop.f32.mrf.mxu1 }
 0x9ae   :  { %v2103_v16 = vld [vmem:[%s6337_s10 + $0x40] sm:$0xff] }
 0x9af   :  { %v1680_v17 = vpop.f32.mrf.mxu1 }
 0x9b0   :  { %1854 = vrot.lane.b32.xlu0 %v1680_v17, %s5055_s28  ;;  %v2102_v17 = vld [vmem:[%s6337_s10 + $0x38] sm:$0xff] }
 0x9b1   :  { %v4695_v19 = vpop.f32.mrf.mxu1 }
 0x9b2   :  { %v2101_v19 = vld [vmem:[%s6337_s10 + $0x30] sm:$0xff] }
 0x9b3   :  { %v1845_v20 = vpop.f32.mrf.mxu1 }
 0x9b4   :  { %1858 = vrot.lane.b32.xlu1 %v1845_v20, %s5058_s14  ;;  %v2100_v20 = vld [vmem:[%s6337_s10 + $0x28] sm:$0xff] }
 0x9b5   :  { %v4705_v22 = vpop.f32.mrf.mxu1 }
 0x9b6   :  { %v2099_v22 = vld [vmem:[%s6337_s10 + $0x20] sm:$0xff] }
 0xa0e   :  { %v1176_v23 = vpop.permute.xlu0 %1175 }
 0xa0f   :  { %v1186_v25 = vsel %vm392_vm6, %v5534_v30, %v1176_v23  ;;  %v2098_v23 = vld [vmem:[%s6337_s10 + $0x18] sm:$0xff] }
 0xa12   :  { %v1180_v24 = vpop.permute.xlu1 %1179 }
 0xa13   :  { %v1187_v26 = vsel %vm395_vm7, %v1186_v25, %v1180_v24  ;;  %v2097_v24 = vld [vmem:[%s6337_s10 + $0x10] sm:$0xff]  ;;  %v2096_v25 = vld [vmem:[%s6337_s10 + $0x8] sm:$0xff] }
 0xa16   :  { %v1184_v27 = vpop.permute.xlu1 %1183 }
 0xa17   :  { %v1188_v28 = vsel %vm398_vm8, %v1187_v26, %v1184_v27  ;;  %v2095_v26 = vld [vmem:[%s6337_s10] sm:$0xff] }
 0xa18   :  { %4722 = vmatprep.mubr.msk.f32.mxu0 %vm182_vm2, %v1188_v28 }
 0xa1e   :  { %v1851_v31 = vpop.permute.xlu0 %1850 }
 0xa1f   :  { %v1861_v33 = vsel %vm392_vm6, %v1349_v13, %v1851_v31  ;;  %v2106_v13 = vld [vmem:[%s6337_s10 + $0x58] sm:$0xff] }
 0xa22   :  { %v1855_v32 = vpop.permute.xlu0 %1854 }
 0xa23   :  { %v1862_v34 = vsel %vm395_vm7, %v1861_v33, %v1855_v32 }
 0xa26   :  { %v1859_v35 = vpop.permute.xlu1 %1858 }
 0xa27   :  { %v1863_v36 = vsel %vm398_vm8, %v1862_v34, %v1859_v35 }
 0xa28   :  { %4723 = vmatmul.mubr.msk.f32.vlgmr.msra.gmra.mxu0 %vm182_vm2, %v1863_v36 }
 0xa29   :  { %4726 = vmatpush3.msra.mxu0 %v2110_v5 }
 0xa2a   :  { %4727 = vmatprep.subr.mxu0 %v2109_v10 }
 0xa2b   :  { %4728 = vmatpush3.msra.mxu0 %v2109_v10 }
 0xa2c   :  { %4729 = vmatprep.subr.mxu0 %v2108_v11 }
 0xa2d   :  { %4730 = vmatpush3.msra.mxu0 %v2108_v11 }
 0xa2e   :  { %4731 = vmatprep.subr.mxu0 %v2107_v12 }
 0xa2f   :  { %4732 = vmatpush3.msra.mxu0 %v2107_v12 }
 0xa30   :  { %4733 = vmatprep.subr.mxu0 %v2106_v13 }
 0xa31   :  { %4734 = vmatpush3.msra.mxu0 %v2106_v13 }
 0xa32   :  { %4735 = vmatprep.subr.mxu0 %v2105_v14 }
 0xa33   :  { %4736 = vmatpush3.msra.mxu0 %v2105_v14 }
 0xa34   :  { %4737 = vmatprep.subr.mxu0 %v2104_v15 }
 0xa35   :  { %4738 = vmatpush3.msra.mxu0 %v2104_v15 }
 0xa36   :  { %4739 = vmatprep.subr.mxu0 %v2103_v16 }
 0xa37   :  { %4740 = vmatpush3.msra.mxu0 %v2103_v16 }
 0xa38   :  { %4741 = vmatprep.subr.mxu0 %v2102_v17 }
 0xa39   :  { %4742 = vmatpush3.msra.mxu0 %v2102_v17 }
 0xa3a   :  { %4743 = vmatprep.subr.mxu0 %v2101_v19 }
 0xa3b   :  { %4744 = vmatpush3.msra.mxu0 %v2101_v19 }
 0xa3c   :  { %4745 = vmatprep.subr.mxu0 %v2100_v20 }
 0xa3d   :  { %4746 = vmatpush3.msra.mxu0 %v2100_v20 }
 0xa3e   :  { %4747 = vmatprep.subr.mxu0 %v2099_v22 }
 0xa3f   :  { %4748 = vmatpush3.msra.mxu0 %v2099_v22 }
 0xa40   :  { %4749 = vmatprep.subr.mxu0 %v2098_v23 }
 0xa41   :  { %4750 = vmatpush3.msra.mxu0 %v2098_v23 }
 0xa42   :  { %4751 = vmatprep.subr.mxu0 %v2097_v24 }
 0xa43   :  { %4752 = vmatpush3.msra.mxu0 %v2097_v24 }
 0xa44   :  { %4753 = vmatprep.subr.mxu0 %v2096_v25 }
 0xa45   :  { %4754 = vmatpush3.msra.mxu0 %v2096_v25 }
 0xa46   :  { %4755 = vmatprep.subr.mxu0 %v2095_v26 }
 0xa47   :  { %4756 = vmatpush3.msra.mxu0 %v2095_v26 }
 0xa48   :  { %4775 = vmatprep.subr.mxu0 %v5047_v48 }
 0xae8   :  { %v4724_v37 = vpop.f32.mrf.mxu0 }
 0xae9   :  { %v5657_v30 = vadd.f32 %v4724_v37, %v5351_v21  ;;  %v1995_v21 = vld [vmem:[%s6336_s9 + $0x78] sm:$0xff] }
 0xaea   :  { %v1944_v38 = vpop.f32.mrf.mxu0  ;;  %2018 = vmatprep.subr.mxu1 %v1995_v21 }
 0xaeb   :  { %v5660_v39 = vadd.f32 %v5242_v41, %v1944_v38  ;;  %v1957_v40 = vmul.f32 %v5657_v30, %v5657_v30  ;;  %v1994_v41 = vld [vmem:[%s6336_s9 + $0x70] sm:$0xff] }
 0xaec   :  { %2019 = vmatpush1.msra.mxu1 %v1994_v41 }
 0xaed   :  { %v1961_v43 = vsel %vm182_vm2, %v1957_v40, 0.0  ;;  %v1956_v44 = vmul.f32 %v5660_v39, %v5660_v39  ;;  %2020 = vmatprep.subr.mxu1 %v1993_v45 }
 0xaee   :  { %1962 = vadd.xlane.f32.xlu1 %v1961_v43  ;;  %2021 = vmatpush1.msra.mxu1 %v1992_v46 }
 0xaef   :  { %v1958_v7 = vsel %vm182_vm2, %v1956_v44, 0.0  ;;  %2022 = vmatprep.subr.mxu1 %v1991_v47 }
 0xaf0   :  { %1959 = vadd.xlane.f32.xlu0 %v1958_v7  ;;  %2023 = vmatpush1.msra.mxu1 %v1990_v18 }
 0xaf1   :  { %2024 = vmatprep.subr.mxu1 %v1989_v49 }
 0xaf2   :  { %2025 = vmatpush1.msra.mxu1 %v1988_v50  ;;  %v4390_v50 = vld [vmem:[%s6333_s6 + $0xf8] sm:$0xff] }
 0xaf3   :  { %2026 = vmatprep.subr.mxu1 %v1987_v51  ;;  %v4389_v51 = vld [vmem:[%s6333_s6 + $0xf0] sm:$0xff] }
 0xaf4   :  { %2027 = vmatpush1.msra.mxu1 %v1986_v53  ;;  %v4387_v53 = vld [vmem:[%s6333_s6 + $0xe0] sm:$0xff] }
 0xaf5   :  { %2028 = vmatprep.subr.mxu1 %v1985_v54  ;;  %v4386_v54 = vld [vmem:[%s6333_s6 + $0xd8] sm:$0xff] }
 0xaf6   :  { %2029 = vmatpush1.msra.mxu1 %v1984_v56  ;;  %v4385_v56 = vld [vmem:[%s6333_s6 + $0xd0] sm:$0xff] }
 0xaf7   :  { %2030 = vmatprep.subr.mxu1 %v1983_v57  ;;  %v4384_v57 = vld [vmem:[%s6333_s6 + $0xc8] sm:$0xff] }
 0xaf8   :  { %2031 = vmatpush1.msra.mxu1 %v1982_v29  ;;  %v4383_v29 = vld [vmem:[%s6333_s6 + $0xc0] sm:$0xff] }
 0xaf9   :  { %2032 = vmatprep.subr.mxu1 %v1981_v58  ;;  %v4382_v58 = vld [vmem:[%s6333_s6 + $0xb8] sm:$0xff] }
 0xafa   :  { %2033 = vmatpush1.msra.mxu1 %v1980_v55  ;;  %v4381_v55 = vld [vmem:[%s6333_s6 + $0xb0] sm:$0xff] }
 0xafb   :  { %2253 = vmatprep.subr.mxu1 %v4390_v50 }
 0xb77   :  { %v1963_v59 = vpop.xlane.xlu1 %1962 }
 0xb78   :  { %v1965_v60 = vmul.f32 0.015625, %v1963_v59  ;;  %v4380_v59 = vld [vmem:[%s6333_s6 + $0xa8] sm:$0xff] }
 0xb79   :  { %v1960_v61 = vpop.xlane.xlu0 %1959 }
 0xb7a   :  { %v1967_v62 = vadd.f32 1e-05, %v1965_v60  ;;  %v1964_v63 = vmul.f32 0.015625, %v1960_v61  ;;  %v4379_v60 = vld [vmem:[%s6333_s6 + $0xa0] sm:$0xff]  ;;  %v4378_v61 = vld [vmem:[%s6333_s6 + $0x98] sm:$0xff] }
 0xb7c   :  { %v1966_v0 = vadd.f32 1e-05, %v1964_v63  ;;  %4953 = vrsqrt.f32 %v1967_v62  ;;  %v4377_v62 = vld [vmem:[%s6333_s6 + $0x90] sm:$0xff]  ;;  %v4376_v63 = vld [vmem:[%s6333_s6 + $0x88] sm:$0xff] }
 0xb7e   :  { %4955 = vrsqrt.f32 %v1966_v0  ;;  %v4375_v0 = vld [vmem:[%s6333_s6 + $0x80] sm:$0xff] }
 0xb89   :  { %v4954_v1 = vpop.eup %4953 }
 0xb8a   :  { %v1971_v8 = vmul.f32 %v4954_v1, %v5657_v30 }
 0xb8b   :  { %v4956_v2 = vpop.eup %4955 }
 0xb8c   :  { %v1970_v3 = vmul.f32 %v4956_v2, %v5660_v39  ;;  %v1979_v9 = vmul.f32 %v4368_v4, %v1971_v8 }
 0xb8e   :  { %v1978_v6 = vmul.f32 %v4368_v4, %v1970_v3 }
 0xb90   :  { %4369 = vmatmul.mubr.msk.f32.vlgmr.msra.gmra.mxu1 %vm182_vm2, %v1978_v6  ;;  %v5836_v6 = vld [vmem:[%s6332_s5 + $0x1] ss:$0 sm:$0xff]  ;;  %s6353_s5 = smov 120  }
 0xb91   :  { %2072 = vmatprep.mubr.f32.mxu1 %v5047_v48  ;;  %2254 = vmatpush1.msra.mxu1 %v4389_v51 }
 0xb94   :  { %4370 = vmatmul.mubr.msk.f32.gmra.mxu1 %vm182_vm2, %v1979_v9 }
 0xb95   :  { %2301 = vmatprep.mubr.f32.mxu1 %v5047_v48 }
 0xc50   :  { %v2068_v27 = vpop.f32.mrf.mxu1 }
 0xc51   :  { %v4371_v28 = vmul.f32 -1.442695, %v2068_v27 }
 0xc52   :  { %v2070_v31 = vpop.f32.mrf.mxu1 }
 0xc53   :  { %4957 = vpow2.f32 %v4371_v28 }
 0xc54   :  { %v2074_v32 = vpop.f32.mrf.mxu1 }
 0xc55   :  { %v4372_v33 = vmul.f32 -1.442695, %v2074_v32 }
 0xc56   :  { %v2076_v21 = vpop.f32.mrf.mxu1 }
 0xc57   :  { %4959 = vpow2.f32 %v4372_v33 }
 0xc60   :  { %v4958_v34 = vpop.eup %4957 }
 0xc61   :  { %v2085_v35 = vadd.f32 1.0, %v4958_v34 }
 0xc63   :  { %4961 = vrcp.f32 %v2085_v35  ;;  %v5017_v35 = vld [vmem:[%s6330_s3] sm:$0xff] }
 0xc64   :  { %v4960_v36 = vpop.eup %4959 }
 0xc65   :  { %v2086_v37 = vadd.f32 1.0, %v4960_v36 }
 0xc67   :  { %4963 = vrcp.f32 %v2086_v37 }
 0xc70   :  { %v4962_v38 = vpop.eup %4961 }
 0xc71   :  { %v2091_v40 = vmul.f32 %v4962_v38, %v2068_v27 }
 0xc73   :  { %v2093_v43 = vmul.f32 %v2091_v40, %v2070_v31 }
 0xc74   :  { %v4964_v44 = vpop.eup %4963 }
 0xc75   :  { %v2092_v7 = vmul.f32 %v4964_v44, %v2074_v32  ;;  %4757 = vmatprep.mubr.f32.mxu0 %v2093_v43 }
 0xc77   :  { %v2094_v41 = vmul.f32 %v2092_v7, %v2076_v21 }
 0xc79   :  { %4758 = vmatmul.mubr.f32.vlgmr.msra.gmra.mxu0 %v2094_v41 }
 0xc7a   :  { %4777 = vmatprep.mubr.msk.f32.mxu0 %vm5060_vm9, %v5047_v48 }
 0xd39   :  { %v5776_v45 = vpop.f32.mrf.mxu0 }
 0xd3a   :  { %v5871_v22 = vadd.f32 %v5776_v45, %v5657_v30 }
 0xd3b   :  { %v2177_v46 = vpop.f32.mrf.mxu0 }
 0xd3c   :  { %v5779_v47 = vadd.f32 %v2177_v46, %v5660_v39  ;;  %v4388_v39 = vld [vmem:[%s6333_s6 + $0xe8] sm:$0xff]  ;;  %s6354_s6 = smov 88   ;;  %v2191_v23 = vmul.f32 %v5871_v22, %v5871_v22 }
 0xd3d   :  { %2255 = vmatprep.subr.mxu1 %v4388_v39 }
 0xd3e   :  { %v2190_v18 = vmul.f32 %v5779_v47, %v5779_v47  ;;  %2256 = vmatpush1.msra.mxu1 %v4387_v53  ;;  %v2195_v24 = vsel %vm182_vm2, %v2191_v23, 0.0 }
 0xd3f   :  { %2257 = vmatprep.subr.mxu1 %v4386_v54 }
 0xd40   :  { %v2192_v49 = vsel %vm182_vm2, %v2190_v18, 0.0  ;;  %2258 = vmatpush1.msra.mxu1 %v4385_v56 }
 0xd41   :  { %2193 = vadd.xlane.f32.xlu0 %v2192_v49  ;;  %2259 = vmatprep.subr.mxu1 %v4384_v57 }
 0xd42   :  { %2260 = vmatpush1.msra.mxu1 %v4383_v29 }
 0xd43   :  { %2261 = vmatprep.subr.mxu1 %v4382_v58 }
 0xd44   :  { %2262 = vmatpush1.msra.mxu1 %v4381_v55 }
 0xd45   :  { %2263 = vmatprep.subr.mxu1 %v4380_v59 }
 0xd46   :  { %2264 = vmatpush1.msra.mxu1 %v4379_v60 }
 0xd47   :  { %2265 = vmatprep.subr.mxu1 %v4378_v61 }
 0xd48   :  { %2266 = vmatpush1.msra.mxu1 %v4377_v62 }
 0xd49   :  { %2267 = vmatprep.subr.mxu1 %v4376_v63 }
 0xd4a   :  { %2268 = vmatpush1.msra.mxu1 %v4375_v0  ;;  %v5018_v0 = vld [vmem:[%s6329_s2] sm:$0xff] }
 0xd4b   :  { %4760 = vmatprep.subr.mxu1 %v5047_v48 }
 0xdca   :  { %v2194_v1 = vpop.xlane.xlu0 %2193 }
 0xdcb   :  { %v2198_v2 = vmul.f32 0.015625, %v2194_v1 }
 0xdcd   :  { %v2200_v3 = vadd.f32 1e-05, %v2198_v2 }
 0xdcf   :  { %4965 = vrsqrt.f32 %v2200_v3 }
 0xddc   :  { %v4966_v4 = vpop.eup %4965 }
 0xddd   :  { %v2204_v8 = vmul.f32 %v4966_v4, %v5779_v47 }
 0xddf   :  { %v2212_v9 = vmul.f32 %v5836_v6, %v2204_v8 }
 0xde1   :  { %4391 = vmatmul.mubr.msk.f32.vlgmr.msra.gmra.mxu1 %vm182_vm2, %v2212_v9 }
 0xde2   :  { %2307 = vmatprep.mubr.f32.mxu1 %v5047_v48 }
 0xea1   :  { %v5842_v5 = vpop.f32.mrf.mxu1 }
 0xea2   :  { %2446 = vrot.lane.b32.xlu0 %v5842_v5, %s5049_s4  ;;  %2432 = vrot.lane.b32.xlu1 %v5842_v5, %s5048_s0  ;;  %v2314_v10 = vsub.f32 0.0, %v5842_v5  ;;  %v2498_v53 = vmul.f32 %v5842_v5, %v5373_v42  ;;  %v2406_v1 = vmul.f32 %v5018_v0, %v5842_v5 }
 0xea3   :  { %v5919_v4 = vpop.f32.mrf.mxu1 }
 0xea6   :  { %2440 = vrot.lane.b32.xlu1 %v2314_v10, %s5050_s23  ;;  %2426 = vrot.lane.b32.xlu0 %v2314_v10, %s5049_s4 }
 0xeaa   :  { %2454 = vrot.lane.b32.xlu1 %v2314_v10, %s5051_s24  ;;  %2460 = vrot.lane.b32.xlu0 %v5842_v5, %s5050_s23 }
 0xeae   :  { %2412 = vrot.lane.b32.xlu1 %v2314_v10, %s5048_s0  ;;  %2418 = vrot.lane.b32.xlu0 %v5842_v5, %s5052_s25 }
 0xf14   :  { %v2447_v11 = vpop.permute.xlu0 %2446  ;;  %v2433_v12 = vpop.permute.xlu1 %2432 }
 0xf18   :  { %v2441_v13 = vpop.permute.xlu1 %2440  ;;  %v2427_v14 = vpop.permute.xlu0 %2426 }
 0xf19   :  { %v2452_v15 = vsel %vm323_vm5, %v2441_v13, %v2447_v11  ;;  %v2438_v16 = vsel %vm323_vm5, %v2427_v14, %v2433_v12 }
 0xf1a   :  { %2478 = vrot.lane.b32.xlu0 %v2452_v15, %s5055_s28  ;;  %2470 = vrot.lane.b32.xlu1 %v2438_v16, %s5053_s26 }
 0xf1c   :  { %v2455_v17 = vpop.permute.xlu1 %2454  ;;  %v2461_v19 = vpop.permute.xlu0 %2460 }
 0xf1d   :  { %v2466_v20 = vsel %vm323_vm5, %v2455_v17, %v2461_v19 }
 0xf1e   :  { %2486 = vrot.lane.b32.xlu1 %v2466_v20, %s5058_s14  ;;  %v5961_v20 = vld [vmem:[%s6328_s1] sm:$0xff] }
 0xf20   :  { %v2413_v25 = vpop.permute.xlu1 %2412  ;;  %v2419_v26 = vpop.permute.xlu0 %2418 }
 0xf21   :  { %v2424_v27 = vsel %vm323_vm5, %v2413_v25, %v2419_v26 }
 0xf22   :  { %2334 = vrot.lane.b32.xlu1 %v2314_v10, %s5054_s27 }
 0xf26   :  { %2340 = vrot.lane.b32.xlu1 %v5842_v5, %s6353_s5 }
 0xf2a   :  { %2348 = vrot.lane.b32.xlu1 %v2314_v10, %s6354_s6 }
 0xf2e   :  { %2354 = vrot.lane.b32.xlu1 %v5842_v5, %s5054_s27 }
 0xf32   :  { %2362 = vrot.lane.b32.xlu1 %v2314_v10, %s5052_s25 }
 0xf36   :  { %2368 = vrot.lane.b32.xlu1 %v5842_v5, %s6354_s6 }
 0xf39   :  { %2196 = vadd.xlane.f32.xlu0 %v2195_v24 }
 0xf4f   :  { %2326 = vrot.lane.b32.xlu0 %v5842_v5, %s5051_s24 }
 0xf8c   :  { %v2471_v30 = vpop.permute.xlu1 %2470  ;;  %v2479_v31 = vpop.permute.xlu0 %2478 }
 0xf8d   :  { %v2492_v28 = vsel %vm392_vm6, %v2424_v27, %v2471_v30 }
 0xf8e   :  { %v2494_v32 = vsel %vm395_vm7, %v2492_v28, %v2479_v31 }
 0xf90   :  { %v2487_v33 = vpop.permute.xlu1 %2486 }
 0xf91   :  { %v2496_v34 = vsel %vm398_vm8, %v2494_v32, %v2487_v33 }
 0xf92   :  { %v2500_v36 = vmul.f32 %v5017_v35, %v2496_v34 }
 0xf94   :  { %v2335_v37 = vpop.permute.xlu1 %2334  ;;  %2504 = vrot.lane.b32.xlu1 %v2500_v36, %s6355_s20  ;;  %v5020_v36 = vld [vmem:[%s6330_s3 + $0x8] sm:$0xff]  ;;  %s6356_s3 = smov 112  }
 0xf98   :  { %v2341_v38 = vpop.permute.xlu1 %2340  ;;  %2318 = vrot.lane.b32.xlu1 %v2314_v10, %s6353_s5 }
 0xf99   :  { %v2346_v40 = vsel %vm323_vm5, %v2335_v37, %v2341_v38 }
 0xf9c   :  { %v2349_v43 = vpop.permute.xlu1 %2348  ;;  %2378 = vrot.lane.b32.xlu1 %v2346_v40, %s5053_s26 }
 0xfa0   :  { %v2355_v44 = vpop.permute.xlu1 %2354 }
 0xfa1   :  { %v2360_v7 = vsel %vm323_vm5, %v2349_v43, %v2355_v44 }
 0xfa2   :  { %2386 = vrot.lane.b32.xlu1 %v2360_v7, %s5055_s28 }
 0xfa4   :  { %v2363_v21 = vpop.permute.xlu1 %2362 }
 0xfa8   :  { %v2369_v41 = vpop.permute.xlu1 %2368 }
 0xfa9   :  { %v2374_v45 = vsel %vm323_vm5, %v2363_v21, %v2369_v41 }
 0xfaa   :  { %2394 = vrot.lane.b32.xlu1 %v2374_v45, %s5058_s14 }
 0xfc2   :  { %v2197_v46 = vpop.xlane.xlu0 %2196 }
 0xfc3   :  { %v2199_v18 = vmul.f32 0.015625, %v2197_v46 }
 0xfc5   :  { %v2201_v49 = vadd.f32 1e-05, %v2199_v18 }
 0xfc6   :  { %v2327_v55 = vpop.permute.xlu0 %2326 }
 0xfc7   :  { %4967 = vrsqrt.f32 %v2201_v49 }
 0xfd4   :  { %v4968_v50 = vpop.eup %4967 }
 0xfd5   :  { %v2205_v51 = vmul.f32 %v4968_v50, %v5871_v22 }
 0xfd7   :  { %v2213_v39 = vmul.f32 %v5836_v6, %v2205_v51 }
 0xfd9   :  { %4392 = vmatmul.mubr.msk.f32.gmra.mxu1 %vm182_vm2, %v2213_v39 }
 0xfda   :  { %4762 = vmatprep.mubr.msk.f32.mxu1 %vm5060_vm9, %v5047_v48 }
0x1006   :  { %v2505_v54 = vpop.permute.xlu1 %2504 }
0x1007   :  { %v5903_v56 = vadd.f32 %v2505_v54, %v2498_v53 }
0x1009   :  { %2513 = vrot.lane.b32.xlu1 %v5903_v56, %s6355_s20 }
0x100a   :  { %v2319_v57 = vpop.permute.xlu1 %2318 }
0x100b   :  { %v2332_v59 = vsel %vm323_vm5, %v2319_v57, %v2327_v55 }
0x100e   :  { %v2379_v29 = vpop.permute.xlu1 %2378 }
0x100f   :  { %v2400_v61 = vsel %vm392_vm6, %v2332_v59, %v2379_v29 }
0x1014   :  { %v2387_v58 = vpop.permute.xlu1 %2386 }
0x1015   :  { %v2402_v62 = vsel %vm395_vm7, %v2400_v61, %v2387_v58 }
0x101c   :  { %v2395_v60 = vpop.permute.xlu1 %2394 }
0x101d   :  { %v2404_v63 = vsel %vm398_vm8, %v2402_v62, %v2395_v60 }
0x101e   :  { %v2408_v42 = vmul.f32 %v5017_v35, %v2404_v63  ;;  %v5021_v63 = vld [vmem:[%s6329_s2 + $0x8] sm:$0xff] }
0x1020   :  { %v5916_v3 = vadd.f32 %v2408_v42, %v2406_v1 }
0x107b   :  { %v2514_v2 = vpop.permute.xlu1 %2513 }
0x107c   :  { %4761 = vmatpush3.xpose.msk.msra.mxu1 %vm392_vm6, %v2514_v2 }
0x107d   :  { %4765 = vmatprep.subr.mxu1 %v5047_v48 }
0x107f   :  { %4763 = vmatmul.mubr.msk.f32.vlgmr.msra.gmra.mxu1 %vm392_vm6, %v5916_v3 }
0x1080   :  { %4766 = vmatpush3.msra.mxu1 %v5919_v4  ;;  %4767 = vmatprep.mubr.msk.f32.mxu1 %vm5060_vm9, %v5047_v48 }
0x1081   :  { %4770 = vmatprep.subr.mxu1 %v5047_v48 }
0x1099   :  { %v5927_v6 = vpop.f32.mrf.mxu1 }
0x109a   :  { %2434 = vrot.lane.b32.xlu0 %v5927_v6, %s5048_s0  ;;  %v2315_v8 = vsub.f32 0.0, %v5927_v6  ;;  %v2499_v53 = vmul.f32 %v5927_v6, %v5478_v52  ;;  %v2407_v42 = vmul.f32 %v5021_v63, %v5927_v6 }
0x109b   :  { %v5956_v17 = vpop.f32.mrf.mxu1 }
0x109c   :  { %2428 = vrot.lane.b32.xlu1 %v2315_v8, %s5049_s4 }
0x109e   :  { %2448 = vrot.lane.b32.xlu0 %v5927_v6, %s5049_s4 }
0x10a0   :  { %2442 = vrot.lane.b32.xlu1 %v2315_v8, %s5050_s23 }
0x10a2   :  { %2462 = vrot.lane.b32.xlu0 %v5927_v6, %s5050_s23 }
0x10a4   :  { %2456 = vrot.lane.b32.xlu1 %v2315_v8, %s5051_s24 }
0x10a6   :  { %2414 = vrot.lane.b32.xlu0 %v2315_v8, %s5048_s0 }
0x10aa   :  { %2420 = vrot.lane.b32.xlu0 %v5927_v6, %s5052_s25 }
0x110c   :  { %v2435_v9 = vpop.permute.xlu0 %2434 }
0x110e   :  { %v2429_v5 = vpop.permute.xlu1 %2428 }
0x110f   :  { %v2439_v10 = vsel %vm323_vm5, %v2429_v5, %v2435_v9 }
0x1110   :  { %v2449_v11 = vpop.permute.xlu0 %2448  ;;  %2472 = vrot.lane.b32.xlu0 %v2439_v10, %s5053_s26 }
0x1112   :  { %v2443_v12 = vpop.permute.xlu1 %2442 }
0x1113   :  { %v2453_v13 = vsel %vm323_vm5, %v2443_v12, %v2449_v11 }
0x1114   :  { %2480 = vrot.lane.b32.xlu0 %v2453_v13, %s5055_s28  ;;  %v2463_v14 = vpop.permute.xlu0 %2462 }
0x1116   :  { %v2457_v15 = vpop.permute.xlu1 %2456 }
0x1117   :  { %v2467_v16 = vsel %vm323_vm5, %v2457_v15, %v2463_v14 }
0x1118   :  { %2488 = vrot.lane.b32.xlu0 %v2467_v16, %s5058_s14  ;;  %v2415_v26 = vpop.permute.xlu0 %2414 }
0x111c   :  { %2336 = vrot.lane.b32.xlu0 %v2315_v8, %s5054_s27  ;;  %v2421_v27 = vpop.permute.xlu0 %2420 }
0x111d   :  { %v2425_v31 = vsel %vm323_vm5, %v2415_v26, %v2421_v27 }
0x1120   :  { %2342 = vrot.lane.b32.xlu0 %v5927_v6, %s6353_s5 }
0x1124   :  { %2350 = vrot.lane.b32.xlu0 %v2315_v8, %s6354_s6 }
0x1128   :  { %2356 = vrot.lane.b32.xlu0 %v5927_v6, %s5054_s27 }
0x112c   :  { %2370 = vrot.lane.b32.xlu0 %v5927_v6, %s6354_s6 }
0x113f   :  { %v2586_v19 = vpop.f32.mrf.mxu1 }
0x1140   :  { %v2587_v23 = vadd.f32 %v5961_v20, %v2586_v19 }
0x1141   :  { %v4764_v24 = vpop.f32.mrf.mxu1 }
0x1142   :  { %v2590_v25 = vsel %vm323_vm5, %v2587_v23, -inf }
0x1143   :  { %2591 = vmax.xlane.f32.xlu1 %v2590_v25 }
0x1154   :  { %2364 = vrot.lane.b32.xlu1 %v2315_v8, %s5052_s25  ;;  %s6358_s25 = smov 80  }
0x1182   :  { %v2473_v30 = vpop.permute.xlu0 %2472 }
0x1183   :  { %v2493_v32 = vsel %vm392_vm6, %v2425_v31, %v2473_v30 }
0x1186   :  { %v2481_v28 = vpop.permute.xlu0 %2480 }
0x1187   :  { %v2495_v33 = vsel %vm395_vm7, %v2493_v32, %v2481_v28 }
0x118a   :  { %v2489_v34 = vpop.permute.xlu0 %2488 }
0x118b   :  { %v2497_v35 = vsel %vm398_vm8, %v2495_v33, %v2489_v34 }
0x118c   :  { %v2501_v37 = vmul.f32 %v5020_v36, %v2497_v35 }
0x118e   :  { %2506 = vrot.lane.b32.xlu0 %v2501_v37, %s6355_s20  ;;  %v2337_v38 = vpop.permute.xlu0 %2336 }
0x1192   :  { %2320 = vrot.lane.b32.xlu0 %v2315_v8, %s6353_s5  ;;  %v2343_v40 = vpop.permute.xlu0 %2342 }
0x1193   :  { %v2347_v43 = vsel %vm323_vm5, %v2337_v38, %v2343_v40 }
0x1194   :  { %2380 = vrot.lane.b32.xlu1 %v2347_v43, %s5053_s26 }
0x1196   :  { %2328 = vrot.lane.b32.xlu0 %v5927_v6, %s5051_s24  ;;  %v2351_v44 = vpop.permute.xlu0 %2350  ;;  %s6357_s24 = smov 96  }
0x119a   :  { %v2357_v7 = vpop.permute.xlu0 %2356 }
0x119b   :  { %v2361_v21 = vsel %vm323_vm5, %v2351_v44, %v2357_v7  ;;  %v5022_v44 = vld [vmem:[%s6328_s1 + $0x8] sm:$0xff] }
0x119c   :  { %2388 = vrot.lane.b32.xlu0 %v2361_v21, %s5055_s28 }
0x119e   :  { %v2371_v18 = vpop.permute.xlu0 %2370 }
0x11cc   :  { %v2592_v41 = vpop.xlane.xlu1 %2591 }
0x11cd   :  { %v2593_v45 = vsub.f32 %v2587_v23, %v2592_v41 }
0x11cf   :  { %v2594_v46 = vmul.f32 1.442695, %v2593_v45 }
0x11d0   :  { %v2365_v49 = vpop.permute.xlu1 %2364 }
0x11d1   :  { %4969 = vpow2.f32 %v2594_v46  ;;  %v2375_v50 = vsel %vm323_vm5, %v2365_v49, %v2371_v18 }
0x11d2   :  { %2396 = vrot.lane.b32.xlu1 %v2375_v50, %s5058_s14 }
0x11d6   :  { %2676 = vrot.lane.b32.xlu1 %v5903_v56, %s5058_s14 }
0x11da   :  { %2674 = vrot.lane.b32.xlu1 %v5916_v3, %s6356_s3 }
0x11de   :  { %v4970_v51 = vpop.eup %4969  ;;  %2842 = vrot.lane.b32.xlu1 %v5903_v56, %s5055_s28 }
0x11df   :  { %v2596_v39 = vsel %vm323_vm5, %v4970_v51, 0.0 }
0x11e0   :  { %2597 = vadd.xlane.f32.xlu0 %v2596_v39 }
0x11e2   :  { %2840 = vrot.lane.b32.xlu1 %v5916_v3, %s6357_s24 }
0x11e6   :  { %3007 = vrot.lane.b32.xlu1 %v5903_v56, %s5053_s26 }
0x11ea   :  { %3005 = vrot.lane.b32.xlu1 %v5916_v3, %s6358_s25 }
0x1200   :  { %v2507_v54 = vpop.permute.xlu0 %2506 }
0x1201   :  { %v2511_v57 = vadd.f32 %v2507_v54, %v2499_v53 }
0x1203   :  { %3186 = vrot.lane.b32.xlu1 %v2511_v57, %s6355_s20 }
0x1204   :  { %v2321_v29 = vpop.permute.xlu0 %2320 }
0x1206   :  { %v2381_v55 = vpop.permute.xlu1 %2380 }
0x1207   :  { %3349 = vrot.lane.b32.xlu1 %v2511_v57, %s5058_s14 }
0x1208   :  { %v2329_v58 = vpop.permute.xlu0 %2328 }
0x1209   :  { %v2333_v59 = vsel %vm323_vm5, %v2321_v29, %v2329_v58 }
0x120a   :  { %v2401_v60 = vsel %vm392_vm6, %v2333_v59, %v2381_v55 }
0x120b   :  { %3515 = vrot.lane.b32.xlu1 %v2511_v57, %s5055_s28 }
0x120e   :  { %v2389_v56 = vpop.permute.xlu0 %2388 }
0x120f   :  { %v2403_v61 = vsel %vm395_vm7, %v2401_v60, %v2389_v56 }
0x1244   :  { %v2397_v62 = vpop.permute.xlu1 %2396 }
0x1245   :  { %v2405_v52 = vsel %vm398_vm8, %v2403_v61, %v2397_v62 }
0x1246   :  { %v2409_v0 = vmul.f32 %v5020_v36, %v2405_v52 }
0x1248   :  { %v2411_v1 = vadd.f32 %v2409_v0, %v2407_v42  ;;  %v2677_v2 = vpop.permute.xlu1 %2676 }
0x124a   :  { %3513 = vrot.lane.b32.xlu1 %v2411_v1, %s6357_s24  ;;  %3347 = vrot.lane.b32.xlu0 %v2411_v1, %s6356_s3 }
0x124c   :  { %v2675_v3 = vpop.permute.xlu1 %2674 }
0x124e   :  { %3680 = vrot.lane.b32.xlu1 %v2511_v57, %s5053_s26 }
0x1250   :  { %v2843_v9 = vpop.permute.xlu1 %2842 }
0x1252   :  { %3678 = vrot.lane.b32.xlu1 %v2411_v1, %s6358_s25 }
0x1254   :  { %v2841_v5 = vpop.permute.xlu1 %2840 }
0x1258   :  { %v3008_v12 = vpop.permute.xlu1 %3007 }
0x125c   :  { %v3006_v6 = vpop.permute.xlu1 %3005 }
0x1269   :  { %v2598_v8 = vpop.xlane.xlu0 %2597 }
0x126a   :  { %4971 = vrcp.f32 %v2598_v8 }
0x1275   :  { %v3187_v13 = vpop.permute.xlu1 %3186 }
0x1277   :  { %v4972_v10 = vpop.eup %4971 }
0x1278   :  { %v2600_v11 = vmul.f32 %v4972_v10, %v4970_v51 }
0x1279   :  { %v3350_v14 = vpop.permute.xlu1 %3349 }
0x127a   :  { %4768 = vmatmul.mubr.msk.f32.vlgmr.msra.gmra.mxu1 %vm323_vm5, %v2600_v11 }
0x127b   :  { %4771 = vmatpush3.xpose.msk.msra.mxu1 %vm392_vm6, %v2677_v2  ;;  %4772 = vmatprep.mubr.msk.f32.mxu1 %vm5060_vm9, %v5047_v48 }
0x127c   :  { %4780 = vmatprep.subr.mxu1 %v5047_v48 }
0x127d   :  { %v3516_v15 = vpop.permute.xlu1 %3515 }
0x127e   :  { %4773 = vmatmul.mubr.msk.f32.vlgmr.msra.gmra.mxu1 %vm392_vm6, %v2675_v3 }
0x127f   :  { %4781 = vmatpush3.xpose.msk.msra.mxu1 %vm392_vm6, %v2843_v9  ;;  %4782 = vmatprep.mubr.msk.f32.mxu1 %vm5060_vm9, %v5047_v48 }
0x1280   :  { %4790 = vmatprep.subr.mxu1 %v5047_v48 }
0x1282   :  { %4783 = vmatmul.mubr.msk.f32.vlgmr.msra.gmra.mxu1 %vm392_vm6, %v2841_v5 }
0x1283   :  { %4791 = vmatpush3.xpose.msk.msra.mxu1 %vm392_vm6, %v3008_v12  ;;  %4792 = vmatprep.mubr.msk.f32.mxu1 %vm5060_vm9, %v5047_v48 }
0x1284   :  { %4800 = vmatprep.subr.mxu1 %v5047_v48 }
0x1286   :  { %4793 = vmatmul.mubr.msk.f32.vlgmr.msra.gmra.mxu1 %vm392_vm6, %v3006_v6 }
0x1287   :  { %4801 = vmatpush3.xpose.msk.msra.mxu1 %vm392_vm6, %v3187_v13  ;;  %4802 = vmatprep.mubr.msk.f32.mxu1 %vm5060_vm9, %v5047_v48 }
0x1288   :  { %4810 = vmatprep.subr.mxu1 %v5047_v48 }
0x128a   :  { %4803 = vmatmul.mubr.msk.f32.vlgmr.msra.gmra.mxu1 %vm392_vm6, %v2411_v1 }
0x128b   :  { %4811 = vmatpush3.xpose.msk.msra.mxu1 %vm392_vm6, %v3350_v14  ;;  %4812 = vmatprep.mubr.msk.f32.mxu1 %vm5060_vm9, %v5047_v48 }
0x128c   :  { %4820 = vmatprep.subr.mxu1 %v5047_v48 }
0x12bc   :  { %v3348_v16 = vpop.permute.xlu0 %3347  ;;  %v3514_v19 = vpop.permute.xlu1 %3513 }
0x12bd   :  { %4813 = vmatmul.mubr.msk.f32.vlgmr.msra.gmra.mxu1 %vm392_vm6, %v3348_v16 }
0x12be   :  { %4821 = vmatpush3.xpose.msk.msra.mxu1 %vm392_vm6, %v3516_v15  ;;  %4822 = vmatprep.mubr.msk.f32.mxu1 %vm5060_vm9, %v5047_v48 }
0x12bf   :  { %4830 = vmatprep.subr.mxu1 %v5047_v48 }
0x12c0   :  { %v3681_v23 = vpop.permute.xlu1 %3680 }
0x12c1   :  { %4823 = vmatmul.mubr.msk.f32.vlgmr.msra.gmra.mxu1 %vm392_vm6, %v3514_v19 }
0x12c2   :  { %4831 = vmatpush3.xpose.msk.msra.mxu1 %vm392_vm6, %v3681_v23  ;;  %4832 = vmatprep.mubr.msk.f32.mxu1 %vm5060_vm9, %v5047_v48 }
0x12c4   :  { %v3679_v24 = vpop.permute.xlu1 %3678 }
0x12c5   :  { %4833 = vmatmul.mubr.msk.f32.vlgmr.msra.gmra.mxu1 %vm392_vm6, %v3679_v24 }
0x133a   :  { %v6048_v25 = vpop.f32.mrf.mxu1 }
0x133c   :  { %v4769_v26 = vpop.f32.mrf.mxu1 }
0x133e   :  { %v2748_v27 = vpop.f32.mrf.mxu1 }
0x133f   :  { %v2749_v30 = vadd.f32 %v5961_v20, %v2748_v27 }
0x1340   :  { %v4774_v28 = vpop.f32.mrf.mxu1 }
0x1341   :  { %v2752_v31 = vsel %vm323_vm5, %v2749_v30, -inf }
0x1342   :  { %2753 = vmax.xlane.f32.xlu1 %v2752_v31  ;;  %v2914_v32 = vpop.f32.mrf.mxu1 }
0x1343   :  { %v2915_v33 = vadd.f32 %v5961_v20, %v2914_v32 }
0x1344   :  { %v4784_v34 = vpop.f32.mrf.mxu1 }
0x1345   :  { %v2918_v35 = vsel %vm323_vm5, %v2915_v33, -inf }
0x1346   :  { %2919 = vmax.xlane.f32.xlu0 %v2918_v35  ;;  %v3079_v36 = vpop.f32.mrf.mxu1 }
0x1347   :  { %v3080_v37 = vadd.f32 %v5961_v20, %v3079_v36 }
0x1348   :  { %v4794_v38 = vpop.f32.mrf.mxu1 }
0x1349   :  { %v3083_v40 = vsel %vm323_vm5, %v3080_v37, -inf }
0x134a   :  { %3084 = vmax.xlane.f32.xlu0 %v3083_v40  ;;  %v3259_v43 = vpop.f32.mrf.mxu1 }
0x134b   :  { %v3260_v7 = vadd.f32 %v5022_v44, %v3259_v43 }
0x134c   :  { %v4804_v21 = vpop.f32.mrf.mxu1 }
0x134d   :  { %v3263_v41 = vsel %vm323_vm5, %v3260_v7, -inf }
0x134e   :  { %3264 = vmax.xlane.f32.xlu1 %v3263_v41 }
0x137d   :  { %v3421_v45 = vpop.f32.mrf.mxu1 }
0x137e   :  { %v3422_v46 = vadd.f32 %v5022_v44, %v3421_v45 }
0x137f   :  { %v4814_v18 = vpop.f32.mrf.mxu1 }
0x1380   :  { %v3425_v49 = vsel %vm323_vm5, %v3422_v46, -inf }
0x1381   :  { %3426 = vmax.xlane.f32.xlu0 %v3425_v49  ;;  %v3587_v20 = vpop.f32.mrf.mxu1 }
0x1382   :  { %v3588_v50 = vadd.f32 %v5022_v44, %v3587_v20 }
0x1383   :  { %v4824_v51 = vpop.f32.mrf.mxu1 }
0x1384   :  { %v3591_v39 = vsel %vm323_vm5, %v3588_v50, -inf }
0x1385   :  { %3592 = vmax.xlane.f32.xlu1 %v3591_v39  ;;  %v3752_v53 = vpop.f32.mrf.mxu1 }
0x1386   :  { %v3753_v54 = vadd.f32 %v5022_v44, %v3752_v53 }
0x1387   :  { %v4834_v57 = vpop.f32.mrf.mxu1 }
0x1388   :  { %v3756_v29 = vsel %vm323_vm5, %v3753_v54, -inf }
0x1389   :  { %3757 = vmax.xlane.f32.xlu0 %v3756_v29 }
0x1396   :  { %2929 = vrot.lane.b32.xlu1 %v5919_v4, %s6357_s24 }
0x139a   :  { %3094 = vrot.lane.b32.xlu1 %v5919_v4, %s6358_s25 }
0x139f   :  { %2764 = vrot.lane.b32.xlu0 %v5919_v4, %s6356_s3 }
0x13cb   :  { %v2754_v58 = vpop.xlane.xlu1 %2753 }
0x13cc   :  { %v2755_v55 = vsub.f32 %v2749_v30, %v2754_v58 }
0x13ce   :  { %v2756_v59 = vmul.f32 1.442695, %v2755_v55 }
0x13cf   :  { %v2920_v56 = vpop.xlane.xlu0 %2919 }
0x13d0   :  { %4973 = vpow2.f32 %v2756_v59  ;;  %v2921_v60 = vsub.f32 %v2915_v33, %v2920_v56  ;;  %v4424_v59 = vld [vmem:[%s6334_s7 + $0x78] sm:$0xff]  ;;  %v4423_v56 = vld [vmem:[%s6334_s7 + $0x70] sm:$0xff] }
0x13d1   :  { %4840 = vmatprep.subr.mxu1 %v4424_v59 }
0x13d2   :  { %v2922_v61 = vmul.f32 1.442695, %v2921_v60  ;;  %4841 = vmatpush3.msra.mxu1 %v4424_v59  ;;  %v4422_v60 = vld [vmem:[%s6334_s7 + $0x68] sm:$0xff] }
0x13d3   :  { %v3085_v62 = vpop.xlane.xlu0 %3084  ;;  %4842 = vmatprep.subr.mxu1 %v4423_v56 }
0x13d4   :  { %4975 = vpow2.f32 %v2922_v61  ;;  %v3086_v52 = vsub.f32 %v3080_v37, %v3085_v62  ;;  %4843 = vmatpush3.msra.mxu1 %v4423_v56  ;;  %v4421_v62 = vld [vmem:[%s6334_s7 + $0x60] sm:$0xff] }
0x13d5   :  { %4844 = vmatprep.subr.mxu1 %v4422_v60 }
0x13d6   :  { %v3087_v63 = vmul.f32 1.442695, %v3086_v52  ;;  %4845 = vmatpush3.msra.mxu1 %v4422_v60 }
0x13d7   :  { %v3265_v42 = vpop.xlane.xlu1 %3264  ;;  %4846 = vmatprep.subr.mxu1 %v4421_v62 }
0x13d8   :  { %4977 = vpow2.f32 %v3087_v63  ;;  %v3266_v0 = vsub.f32 %v3260_v7, %v3265_v42  ;;  %4847 = vmatpush3.msra.mxu1 %v4421_v62  ;;  %v4428_v62 = vld [vmem:[%s6335_s8 + $0x1] ss:$0 sm:$0xff] }
0x13da   :  { %v3267_v1 = vmul.f32 1.442695, %v3266_v0 }
0x13dc   :  { %4979 = vpow2.f32 %v3267_v1 }
0x13dd   :  { %v4974_v2 = vpop.eup %4973 }
0x13de   :  { %v2758_v3 = vsel %vm323_vm5, %v4974_v2, 0.0 }
0x13df   :  { %2759 = vadd.xlane.f32.xlu1 %v2758_v3 }
0x13e1   :  { %v4976_v4 = vpop.eup %4975 }
0x13e2   :  { %v2924_v8 = vsel %vm323_vm5, %v4976_v4, 0.0 }
0x13e3   :  { %2925 = vadd.xlane.f32.xlu0 %v2924_v8  ;;  %v4419_v8 = vld [vmem:[%s6334_s7 + $0x50] sm:$0xff] }
0x13e5   :  { %v4978_v9 = vpop.eup %4977 }
0x13e6   :  { %v3089_v5 = vsel %vm323_vm5, %v4978_v9, 0.0 }
0x13e7   :  { %3090 = vadd.xlane.f32.xlu1 %v3089_v5  ;;  %v4417_v5 = vld [vmem:[%s6334_s7 + $0x40] sm:$0xff] }
0x13e9   :  { %v4980_v10 = vpop.eup %4979 }
0x13ea   :  { %v3269_v11 = vsel %vm323_vm5, %v4980_v10, 0.0 }
0x13eb   :  { %3270 = vadd.xlane.f32.xlu0 %v3269_v11 }
0x1401   :  { %3437 = vrot.lane.b32.xlu0 %v5956_v17, %s6356_s3 }
0x140a   :  { %v3427_v12 = vpop.xlane.xlu0 %3426 }
0x140b   :  { %v3428_v6 = vsub.f32 %v3422_v46, %v3427_v12 }
0x140d   :  { %v3429_v13 = vmul.f32 1.442695, %v3428_v6 }
0x140e   :  { %v3593_v14 = vpop.xlane.xlu1 %3592 }
0x140f   :  { %4981 = vpow2.f32 %v3429_v13  ;;  %v3594_v15 = vsub.f32 %v3588_v50, %v3593_v14 }
0x1411   :  { %v3595_v16 = vmul.f32 1.442695, %v3594_v15 }
0x1412   :  { %v3758_v19 = vpop.xlane.xlu0 %3757  ;;  %v2930_v34 = vpop.permute.xlu1 %2929 }
0x1413   :  { %4983 = vpow2.f32 %v3595_v16  ;;  %v3759_v23 = vsub.f32 %v3753_v54, %v3758_v19 }
0x1415   :  { %v3760_v24 = vmul.f32 1.442695, %v3759_v23 }
0x1416   :  { %v2765_v26 = vpop.permute.xlu0 %2764  ;;  %v3095_v35 = vpop.permute.xlu1 %3094 }
0x1417   :  { %4985 = vpow2.f32 %v3760_v24  ;;  %4776 = vmatpush3.msra.mxu0 %v2765_v26 }
0x1418   :  { %4785 = vmatprep.subr.mxu0 %v5047_v48 }
0x141c   :  { %v4982_v27 = vpop.eup %4981 }
0x141d   :  { %v3431_v30 = vsel %vm323_vm5, %v4982_v27, 0.0 }
0x141e   :  { %3432 = vadd.xlane.f32.xlu1 %v3431_v30 }
0x1420   :  { %v4984_v28 = vpop.eup %4983 }
0x1421   :  { %v3597_v31 = vsel %vm323_vm5, %v4984_v28, 0.0 }
0x1422   :  { %3598 = vadd.xlane.f32.xlu0 %v3597_v31 }
0x1424   :  { %v4986_v32 = vpop.eup %4985 }
0x1425   :  { %v3762_v33 = vsel %vm323_vm5, %v4986_v32, 0.0 }
0x1426   :  { %3763 = vadd.xlane.f32.xlu1 %v3762_v33 }
0x1437   :  { %3602 = vrot.lane.b32.xlu1 %v5956_v17, %s6357_s24 }
0x1438   :  { %3767 = vrot.lane.b32.xlu0 %v5956_v17, %s6358_s25 }
0x1468   :  { %v2760_v36 = vpop.xlane.xlu1 %2759 }
0x1469   :  { %4987 = vrcp.f32 %v2760_v36 }
0x146c   :  { %v2926_v37 = vpop.xlane.xlu0 %2925 }
0x146d   :  { %4989 = vrcp.f32 %v2926_v37 }
0x1470   :  { %v3091_v38 = vpop.xlane.xlu1 %3090 }
0x1471   :  { %4991 = vrcp.f32 %v3091_v38 }
0x1474   :  { %v3271_v40 = vpop.xlane.xlu0 %3270 }
0x1475   :  { %4993 = vrcp.f32 %v3271_v40 }
0x1476   :  { %v4988_v43 = vpop.eup %4987 }
0x1477   :  { %v2762_v44 = vmul.f32 %v4988_v43, %v4974_v2 }
0x1478   :  { %v3438_v49 = vpop.permute.xlu0 %3437 }
0x1479   :  { %4778 = vmatmul.mubr.msk.f32.vlgmr.msra.gmra.mxu0 %vm323_vm5, %v2762_v44  ;;  %v4442_v44 = vld [vmem:[%s6336_s9 + $0xe8] sm:$0xff] }
0x147a   :  { %v4990_v7 = vpop.eup %4989  ;;  %4786 = vmatpush3.msra.mxu0 %v2930_v34  ;;  %4787 = vmatprep.mubr.msk.f32.mxu0 %vm5060_vm9, %v5047_v48 }
0x147b   :  { %4795 = vmatprep.subr.mxu0 %v5047_v48  ;;  %v2928_v21 = vmul.f32 %v4990_v7, %v4976_v4  ;;  %v4420_v4 = vld [vmem:[%s6334_s7 + $0x58] sm:$0xff]  ;;  %v4441_v7 = vld [vmem:[%s6336_s9 + $0xe0] sm:$0xff] }
0x147c   :  { %4848 = vmatprep.subr.mxu1 %v4420_v4 }
0x147d   :  { %4788 = vmatmul.mubr.msk.f32.vlgmr.msra.gmra.mxu0 %vm323_vm5, %v2928_v21  ;;  %4849 = vmatpush3.msra.mxu1 %v4420_v4  ;;  %v4440_v21 = vld [vmem:[%s6336_s9 + $0xd8] sm:$0xff] }
0x147e   :  { %v4992_v41 = vpop.eup %4991  ;;  %4796 = vmatpush3.msra.mxu0 %v3095_v35  ;;  %4797 = vmatprep.mubr.msk.f32.mxu0 %vm5060_vm9, %v5047_v48  ;;  %v4460_v4 = vld [vmem:[%s6337_s10 + $0xd8] sm:$0xff] }
0x147f   :  { %4805 = vmatprep.subr.mxu0 %v5047_v48  ;;  %v3093_v45 = vmul.f32 %v4992_v41, %v4978_v9  ;;  %4850 = vmatprep.subr.mxu1 %v4419_v8  ;;  %v4418_v9 = vld [vmem:[%s6334_s7 + $0x48] sm:$0xff]  ;;  %v4439_v41 = vld [vmem:[%s6336_s9 + $0xd0] sm:$0xff] }
0x1480   :  { %4851 = vmatpush3.msra.mxu1 %v4419_v8  ;;  %v4459_v8 = vld [vmem:[%s6337_s10 + $0xd0] sm:$0xff] }
0x1481   :  { %4798 = vmatmul.mubr.msk.f32.vlgmr.msra.gmra.mxu0 %vm323_vm5, %v3093_v45  ;;  %4852 = vmatprep.subr.mxu1 %v4418_v9  ;;  %v4438_v45 = vld [vmem:[%s6336_s9 + $0xc8] sm:$0xff] }
0x1482   :  { %v4994_v46 = vpop.eup %4993  ;;  %4806 = vmatpush3.msra.mxu0 %v5956_v17  ;;  %4807 = vmatprep.mubr.msk.f32.mxu0 %vm5060_vm9, %v5047_v48 }
0x1483   :  { %4815 = vmatprep.subr.mxu0 %v5047_v48  ;;  %v3273_v18 = vmul.f32 %v4994_v46, %v4980_v10  ;;  %4853 = vmatpush3.msra.mxu1 %v4418_v9  ;;  %v4437_v46 = vld [vmem:[%s6336_s9 + $0xc0] sm:$0xff]  ;;  %v4458_v9 = vld [vmem:[%s6337_s10 + $0xc8] sm:$0xff] }
0x1484   :  { %4854 = vmatprep.subr.mxu1 %v4417_v5 }
0x1485   :  { %4808 = vmatmul.mubr.msk.f32.vlgmr.msra.gmra.mxu0 %vm323_vm5, %v3273_v18  ;;  %4855 = vmatpush3.msra.mxu1 %v4417_v5  ;;  %v4436_v18 = vld [vmem:[%s6336_s9 + $0xb8] sm:$0xff]  ;;  %v4457_v5 = vld [vmem:[%s6337_s10 + $0xc0] sm:$0xff] }
0x1486   :  { %4816 = vmatpush3.msra.mxu0 %v3438_v49  ;;  %4817 = vmatprep.mubr.msk.f32.mxu0 %vm5060_vm9, %v5047_v48  ;;  %v4435_v49 = vld [vmem:[%s6336_s9 + $0xb0] sm:$0xff] }
0x1487   :  { %4825 = vmatprep.subr.mxu0 %v5047_v48 }
0x14a7   :  { %v3433_v20 = vpop.xlane.xlu1 %3432 }
0x14a8   :  { %4995 = vrcp.f32 %v3433_v20  ;;  %v4434_v20 = vld [vmem:[%s6336_s9 + $0xa8] sm:$0xff] }
0x14ab   :  { %v3599_v50 = vpop.xlane.xlu0 %3598 }
0x14ac   :  { %4997 = vrcp.f32 %v3599_v50  ;;  %v4433_v50 = vld [vmem:[%s6336_s9 + $0xa0] sm:$0xff] }
0x14af   :  { %v3764_v17 = vpop.xlane.xlu1 %3763  ;;  %v3768_v29 = vpop.permute.xlu0 %3767 }
0x14b0   :  { %4999 = vrcp.f32 %v3764_v17  ;;  %v4432_v17 = vld [vmem:[%s6336_s9 + $0x98] sm:$0xff] }
0x14b3   :  { %v3603_v53 = vpop.permute.xlu1 %3602 }
0x14b5   :  { %v4996_v51 = vpop.eup %4995 }
0x14b6   :  { %v3435_v39 = vmul.f32 %v4996_v51, %v4982_v27  ;;  %v4431_v51 = vld [vmem:[%s6336_s9 + $0x90] sm:$0xff] }
0x14b8   :  { %4818 = vmatmul.mubr.msk.f32.vlgmr.msra.gmra.mxu0 %vm323_vm5, %v3435_v39  ;;  %v4430_v39 = vld [vmem:[%s6336_s9 + $0x88] sm:$0xff] }
0x14b9   :  { %v4998_v54 = vpop.eup %4997  ;;  %4826 = vmatpush3.msra.mxu0 %v3603_v53  ;;  %4827 = vmatprep.mubr.msk.f32.mxu0 %vm5060_vm9, %v5047_v48  ;;  %v4429_v53 = vld [vmem:[%s6336_s9 + $0x80] sm:$0xff] }
0x14ba   :  { %4835 = vmatprep.subr.mxu0 %v5047_v48  ;;  %v3601_v57 = vmul.f32 %v4998_v54, %v4984_v28 }
0x14bc   :  { %4828 = vmatmul.mubr.msk.f32.vlgmr.msra.gmra.mxu0 %vm323_vm5, %v3601_v57 }
0x14bd   :  { %v5000_v58 = vpop.eup %4999  ;;  %4836 = vmatpush3.msra.mxu0 %v3768_v29  ;;  %4837 = vmatprep.mubr.msk.f32.mxu0 %vm5060_vm9, %v5047_v48 }
0x14be   :  { %v3766_v55 = vmul.f32 %v5000_v58, %v4986_v32 }
0x14c0   :  { %4838 = vmatmul.mubr.msk.f32.vlgmr.msra.gmra.mxu0 %vm323_vm5, %v3766_v55 }
0x14c1   :  { %4063 = vmatprep.mubr.f32.mxu0 %v5047_v48 }
0x1539   :  { %v2836_v61 = vpop.f32.mrf.mxu0 }
0x153a   :  { %3171 = vrot.lane.b32.xlu1 %v2836_v61, %s5053_s26 }
0x153b   :  { %v4779_v52 = vpop.f32.mrf.mxu0 }
0x153d   :  { %v3001_v63 = vpop.f32.mrf.mxu0 }
0x153e   :  { %3175 = vrot.lane.b32.xlu0 %v3001_v63, %s5055_s28 }
0x153f   :  { %v4789_v42 = vpop.f32.mrf.mxu0 }
0x1541   :  { %v3166_v0 = vpop.f32.mrf.mxu0 }
0x1542   :  { %3179 = vrot.lane.b32.xlu0 %v3166_v0, %s5058_s14  ;;  %v4464_v0 = vld [vmem:[%s6337_s10 + $0xf8] sm:$0xff] }
0x1543   :  { %v4799_v1 = vpop.f32.mrf.mxu0  ;;  %4859 = vmatprep.subr.mxu1 %v4464_v0 }
0x1544   :  { %v4463_v1 = vld [vmem:[%s6337_s10 + $0xf0] sm:$0xff] }
0x1545   :  { %v3343_v2 = vpop.f32.mrf.mxu0 }
0x1547   :  { %v4809_v3 = vpop.f32.mrf.mxu0 }
0x1548   :  { %v4461_v3 = vld [vmem:[%s6337_s10 + $0xe0] sm:$0xff] }
0x1578   :  { %v3509_v10 = vpop.f32.mrf.mxu0 }
0x1579   :  { %3844 = vrot.lane.b32.xlu1 %v3509_v10, %s5053_s26  ;;  %v4456_v10 = vld [vmem:[%s6337_s10 + $0xb8] sm:$0xff] }
0x157a   :  { %v4819_v11 = vpop.f32.mrf.mxu0 }
0x157b   :  { %v4455_v11 = vld [vmem:[%s6337_s10 + $0xb0] sm:$0xff] }
0x157c   :  { %v3674_v12 = vpop.f32.mrf.mxu0 }
0x157d   :  { %3848 = vrot.lane.b32.xlu1 %v3674_v12, %s5055_s28  ;;  %v4454_v12 = vld [vmem:[%s6337_s10 + $0xa8] sm:$0xff] }
0x157e   :  { %v4829_v6 = vpop.f32.mrf.mxu0 }
0x157f   :  { %v4453_v6 = vld [vmem:[%s6337_s10 + $0xa0] sm:$0xff] }
0x1580   :  { %v3839_v13 = vpop.f32.mrf.mxu0 }
0x1581   :  { %3852 = vrot.lane.b32.xlu0 %v3839_v13, %s5058_s14  ;;  %v4452_v13 = vld [vmem:[%s6337_s10 + $0x98] sm:$0xff] }
0x1582   :  { %v4839_v14 = vpop.f32.mrf.mxu0 }
0x1583   :  { %v4451_v14 = vld [vmem:[%s6337_s10 + $0x90] sm:$0xff] }
0x15ac   :  { %v3172_v15 = vpop.permute.xlu1 %3171 }
0x15ad   :  { %v3182_v19 = vsel %vm392_vm6, %v6048_v25, %v3172_v15  ;;  %v4450_v15 = vld [vmem:[%s6337_s10 + $0x88] sm:$0xff] }
0x15b0   :  { %v3176_v16 = vpop.permute.xlu0 %3175 }
0x15b1   :  { %v3183_v23 = vsel %vm395_vm7, %v3182_v19, %v3176_v16  ;;  %v4449_v16 = vld [vmem:[%s6337_s10 + $0x80] sm:$0xff] }
0x15b4   :  { %v3180_v24 = vpop.permute.xlu0 %3179 }
0x15b5   :  { %v3184_v26 = vsel %vm398_vm8, %v3183_v23, %v3180_v24 }
0x15b6   :  { %4856 = vmatprep.mubr.msk.f32.mxu1 %vm182_vm2, %v3184_v26 }
0x15eb   :  { %v3845_v27 = vpop.permute.xlu1 %3844 }
0x15ec   :  { %v3855_v28 = vsel %vm392_vm6, %v3343_v2, %v3845_v27  ;;  %v4462_v2 = vld [vmem:[%s6337_s10 + $0xe8] sm:$0xff] }
0x15ef   :  { %v3849_v30 = vpop.permute.xlu1 %3848 }
0x15f0   :  { %v3856_v31 = vsel %vm395_vm7, %v3855_v28, %v3849_v30 }
0x15f3   :  { %v3853_v32 = vpop.permute.xlu0 %3852 }
0x15f4   :  { %v3857_v33 = vsel %vm398_vm8, %v3856_v31, %v3853_v32 }
0x15f5   :  { %4857 = vmatmul.mubr.msk.f32.vlgmr.msra.gmra.mxu1 %vm182_vm2, %v3857_v33 }
0x15f6   :  { %4860 = vmatpush3.msra.mxu1 %v4464_v0 }
0x15f7   :  { %4861 = vmatprep.subr.mxu1 %v4463_v1 }
0x15f8   :  { %4862 = vmatpush3.msra.mxu1 %v4463_v1 }
0x15f9   :  { %4863 = vmatprep.subr.mxu1 %v4462_v2 }
0x15fa   :  { %4864 = vmatpush3.msra.mxu1 %v4462_v2  ;;  %v4465_v2 = vld [vmem:[%s6338_s11] ss:$0 sm:$0xff] }
0x15fb   :  { %4865 = vmatprep.subr.mxu1 %v4461_v3 }
0x15fc   :  { %4866 = vmatpush3.msra.mxu1 %v4461_v3 }
0x15fd   :  { %4867 = vmatprep.subr.mxu1 %v4460_v4 }
0x15fe   :  { %4868 = vmatpush3.msra.mxu1 %v4460_v4 }
0x15ff   :  { %4869 = vmatprep.subr.mxu1 %v4459_v8 }
0x1600   :  { %4870 = vmatpush3.msra.mxu1 %v4459_v8 }
0x1601   :  { %4871 = vmatprep.subr.mxu1 %v4458_v9 }
0x1602   :  { %4872 = vmatpush3.msra.mxu1 %v4458_v9 }
0x1603   :  { %4873 = vmatprep.subr.mxu1 %v4457_v5 }
0x1604   :  { %4874 = vmatpush3.msra.mxu1 %v4457_v5 }
0x1605   :  { %4875 = vmatprep.subr.mxu1 %v4456_v10 }
0x1606   :  { %4876 = vmatpush3.msra.mxu1 %v4456_v10 }
0x1607   :  { %4877 = vmatprep.subr.mxu1 %v4455_v11 }
0x1608   :  { %4878 = vmatpush3.msra.mxu1 %v4455_v11 }
0x1609   :  { %4879 = vmatprep.subr.mxu1 %v4454_v12 }
0x160a   :  { %4880 = vmatpush3.msra.mxu1 %v4454_v12 }
0x160b   :  { %4881 = vmatprep.subr.mxu1 %v4453_v6 }
0x160c   :  { %4882 = vmatpush3.msra.mxu1 %v4453_v6 }
0x160d   :  { %4883 = vmatprep.subr.mxu1 %v4452_v13 }
0x160e   :  { %4884 = vmatpush3.msra.mxu1 %v4452_v13 }
0x160f   :  { %4885 = vmatprep.subr.mxu1 %v4451_v14 }
0x1610   :  { %4886 = vmatpush3.msra.mxu1 %v4451_v14 }
0x1611   :  { %4887 = vmatprep.subr.mxu1 %v4450_v15 }
0x1612   :  { %4888 = vmatpush3.msra.mxu1 %v4450_v15 }
0x1613   :  { %4889 = vmatprep.subr.mxu1 %v4449_v16 }
0x1614   :  { %4890 = vmatpush3.msra.mxu1 %v4449_v16 }
0x16b5   :  { %v4858_v34 = vpop.f32.mrf.mxu1 }
0x16b6   :  { %v6149_v25 = vadd.f32 %v4858_v34, %v5871_v22  ;;  %v4444_v22 = vld [vmem:[%s6336_s9 + $0xf8] sm:$0xff] }
0x16b7   :  { %v3939_v35 = vpop.f32.mrf.mxu1  ;;  %4015 = vmatprep.subr.mxu0 %v4444_v22 }
0x16b8   :  { %v6152_v36 = vadd.f32 %v3939_v35, %v5779_v47  ;;  %v3953_v37 = vmul.f32 %v6149_v25, %v6149_v25  ;;  %v4443_v47 = vld [vmem:[%s6336_s9 + $0xf0] sm:$0xff] }
0x16b9   :  { %4016 = vmatpush1.msra.mxu0 %v4443_v47 }
0x16ba   :  { %v3957_v38 = vsel %vm182_vm2, %v3953_v37, 0.0  ;;  %v3952_v40 = vmul.f32 %v6152_v36, %v6152_v36  ;;  %4017 = vmatprep.subr.mxu0 %v4442_v44 }
0x16bb   :  { %3958 = vadd.xlane.f32.xlu0 %v3957_v38  ;;  %4018 = vmatpush1.msra.mxu0 %v4441_v7 }
0x16bc   :  { %v3954_v43 = vsel %vm182_vm2, %v3952_v40, 0.0  ;;  %4019 = vmatprep.subr.mxu0 %v4440_v21 }
0x16bd   :  { %3955 = vadd.xlane.f32.xlu1 %v3954_v43  ;;  %4020 = vmatpush1.msra.mxu0 %v4439_v41 }
0x16be   :  { %4021 = vmatprep.subr.mxu0 %v4438_v45 }
0x16bf   :  { %4022 = vmatpush1.msra.mxu0 %v4437_v46 }
0x16c0   :  { %4023 = vmatprep.subr.mxu0 %v4436_v18  ;;  %v4226_v18 = vld [vmem:[%s6339_s12 + $0x78] sm:$0xff] }
0x16c1   :  { %4024 = vmatpush1.msra.mxu0 %v4435_v49  ;;  %v4223_v49 = vld [vmem:[%s6339_s12 + $0x60] sm:$0xff] }
0x16c2   :  { %4025 = vmatprep.subr.mxu0 %v4434_v20  ;;  %v4222_v20 = vld [vmem:[%s6339_s12 + $0x58] sm:$0xff] }
0x16c3   :  { %4026 = vmatpush1.msra.mxu0 %v4433_v50  ;;  %v4221_v50 = vld [vmem:[%s6339_s12 + $0x50] sm:$0xff] }
0x16c4   :  { %4027 = vmatprep.subr.mxu0 %v4432_v17  ;;  %v4220_v17 = vld [vmem:[%s6339_s12 + $0x48] sm:$0xff] }
0x16c5   :  { %4028 = vmatpush1.msra.mxu0 %v4431_v51  ;;  %v4219_v51 = vld [vmem:[%s6339_s12 + $0x40] sm:$0xff] }
0x16c6   :  { %4029 = vmatprep.subr.mxu0 %v4430_v39  ;;  %v4218_v39 = vld [vmem:[%s6339_s12 + $0x38] sm:$0xff] }
0x16c7   :  { %4030 = vmatpush1.msra.mxu0 %v4429_v53  ;;  %v4217_v53 = vld [vmem:[%s6339_s12 + $0x30] sm:$0xff] }
0x16c8   :  { %4249 = vmatprep.subr.mxu0 %v4226_v18 }
0x1744   :  { %v3959_v54 = vpop.xlane.xlu0 %3958 }
0x1745   :  { %v3961_v57 = vmul.f32 0.015625, %v3959_v54  ;;  %v4216_v54 = vld [vmem:[%s6339_s12 + $0x28] sm:$0xff] }
0x1746   :  { %v3956_v29 = vpop.xlane.xlu1 %3955 }
0x1747   :  { %v3963_v58 = vadd.f32 1e-05, %v3961_v57  ;;  %v3960_v55 = vmul.f32 0.015625, %v3956_v29  ;;  %v4215_v57 = vld [vmem:[%s6339_s12 + $0x20] sm:$0xff]  ;;  %v4214_v29 = vld [vmem:[%s6339_s12 + $0x18] sm:$0xff] }
0x1749   :  { %v3962_v59 = vadd.f32 1e-05, %v3960_v55  ;;  %5001 = vrsqrt.f32 %v3963_v58  ;;  %v4213_v58 = vld [vmem:[%s6339_s12 + $0x10] sm:$0xff]  ;;  %v4212_v55 = vld [vmem:[%s6339_s12 + $0x8] sm:$0xff] }
0x174b   :  { %5003 = vrsqrt.f32 %v3962_v59  ;;  %v4211_v59 = vld [vmem:[%s6339_s12] sm:$0xff] }
0x1756   :  { %v5002_v56 = vpop.eup %5001 }
0x1757   :  { %v3967_v63 = vmul.f32 %v5002_v56, %v6149_v25 }
0x1758   :  { %v5004_v60 = vpop.eup %5003 }
0x1759   :  { %v3966_v61 = vmul.f32 %v5004_v60, %v6152_v36  ;;  %v3975_v42 = vmul.f32 %v4428_v62, %v3967_v63 }
0x175b   :  { %v3974_v52 = vmul.f32 %v4428_v62, %v3966_v61 }
0x175d   :  { %4445 = vmatmul.mubr.msk.f32.vlgmr.msra.gmra.mxu0 %vm182_vm2, %v3974_v52 }
0x175e   :  { %4069 = vmatprep.mubr.f32.mxu0 %v5047_v48 }
0x1761   :  { %4446 = vmatmul.mubr.msk.f32.gmra.mxu0 %vm182_vm2, %v3975_v42 }
0x1762   :  { %4297 = vmatprep.mubr.f32.mxu0 %v5047_v48 }
0x181d   :  { %v4065_v19 = vpop.f32.mrf.mxu0 }
0x181e   :  { %v4447_v23 = vmul.f32 -1.442695, %v4065_v19 }
0x181f   :  { %v4067_v24 = vpop.f32.mrf.mxu0 }
0x1820   :  { %5005 = vpow2.f32 %v4447_v23 }
0x1821   :  { %v4071_v26 = vpop.f32.mrf.mxu0 }
0x1822   :  { %v4448_v27 = vmul.f32 -1.442695, %v4071_v26 }
0x1823   :  { %v4073_v40 = vpop.f32.mrf.mxu0 }
0x1824   :  { %5007 = vpow2.f32 %v4448_v27 }
0x182d   :  { %v5006_v30 = vpop.eup %5005 }
0x182e   :  { %v4082_v28 = vadd.f32 1.0, %v5006_v30 }
0x1830   :  { %5009 = vrcp.f32 %v4082_v28 }
0x1831   :  { %v5008_v31 = vpop.eup %5007 }
0x1832   :  { %v4083_v32 = vadd.f32 1.0, %v5008_v31 }
0x1834   :  { %5011 = vrcp.f32 %v4083_v32 }
0x183d   :  { %v5010_v33 = vpop.eup %5009 }
0x183e   :  { %v4088_v34 = vmul.f32 %v5010_v33, %v4065_v19 }
0x1840   :  { %v4090_v35 = vmul.f32 %v4088_v34, %v4067_v24 }
0x1841   :  { %v5012_v37 = vpop.eup %5011 }
0x1842   :  { %v4089_v38 = vmul.f32 %v5012_v37, %v4071_v26  ;;  %4891 = vmatprep.mubr.f32.mxu1 %v4090_v35 }
0x1844   :  { %v4091_v43 = vmul.f32 %v4089_v38, %v4073_v40 }
0x1846   :  { %4892 = vmatmul.mubr.f32.vlgmr.msra.gmra.mxu1 %v4091_v43 }
0x1906   :  { %v4893_v22 = vpop.f32.mrf.mxu1 }
0x1907   :  { %v4185_v47 = vadd.f32 %v4893_v22, %v6149_v25  ;;  %v4225_v25 = vld [vmem:[%s6339_s12 + $0x70] sm:$0xff] }
0x1908   :  { %v4175_v44 = vpop.f32.mrf.mxu1  ;;  %4250 = vmatpush1.msra.mxu0 %v4225_v25 }
0x1909   :  { %v4188_v7 = vmul.f32 %v4185_v47, %v4185_v47  ;;  %v4184_v21 = vadd.f32 %v4175_v44, %v6152_v36  ;;  %v4224_v36 = vld [vmem:[%s6339_s12 + $0x68] sm:$0xff]  ;;  %s5064_s12 = smov [#allocation2]  }
0x190a   :  { %4251 = vmatprep.subr.mxu0 %v4224_v36  ;;  %s4319_s23 = sshll.u32 %s5064_s12, 4  ;;  %s4320_s23 = int_to_ptr.vmem [resolvable:$true] %s4319_s23 }
0x190b   :  { %v4187_v41 = vmul.f32 %v4184_v21, %v4184_v21  ;;  %v4192_v45 = vsel %vm182_vm2, %v4188_v7, 0.0  ;;  %4252 = vmatpush1.msra.mxu0 %v4223_v49  ;;  %s5023_s11 = scalar_lea.vmem %s4320_s23, 512  ;;  %p5028_p1 = scmp.lt.s32.totalorder %s4320_s23, %s4320_s23 }
0x190c   :  { %4193 = vadd.xlane.f32.xlu1 %v4192_v45  ;;  %4253 = vmatprep.subr.mxu0 %v4222_v20  ;;  %p5024_p0 = scmp.ne.s32.totalorder %s4320_s23, %s5023_s11  ;;  %p5029_p2 = scmp.lt.s32.totalorder %s5023_s11, %s5023_s11 }
0x190d   :  { %v4189_v46 = vsel %vm182_vm2, %v4187_v41, 0.0  ;;  %4254 = vmatpush1.msra.mxu0 %v4221_v50 }
0x190e   :  { %4190 = vadd.xlane.f32.xlu0 %v4189_v46  ;;  %4255 = vmatprep.subr.mxu0 %v4220_v17  ;;  %p5030_p3 = por %p5029_p2, %p5028_p1 }
0x190f   :  { %4256 = vmatpush1.msra.mxu0 %v4219_v51 }
0x1910   :  { %4257 = vmatprep.subr.mxu0 %v4218_v39  ;;  %p5031_p4 = pnand %p5030_p3, %p5024_p0 }
0x1911   :  { %4258 = vmatpush1.msra.mxu0 %v4217_v53 }
0x1912   :  { %4259 = vmatprep.subr.mxu0 %v4216_v54 }
0x1913   :  { %4260 = vmatpush1.msra.mxu0 %v4215_v57 }
0x1914   :  { %4261 = vmatprep.subr.mxu0 %v4214_v29 }
0x1915   :  { %4262 = vmatpush1.msra.mxu0 %v4213_v58 }
0x1916   :  { %4263 = vmatprep.subr.mxu0 %v4212_v55 }
0x1917   :  { %4264 = vmatpush1.msra.mxu0 %v4211_v59 }
0x1995   :  { %v4194_v56 = vpop.xlane.xlu1 %4193 }
0x1996   :  { %v4196_v60 = vmul.f32 0.015625, %v4194_v56 }
0x1997   :  { %v4191_v61 = vpop.xlane.xlu0 %4190 }
0x1998   :  { %v4198_v62 = vadd.f32 1e-05, %v4196_v60  ;;  %v4195_v52 = vmul.f32 0.015625, %v4191_v61 }
0x199a   :  { %v4197_v63 = vadd.f32 1e-05, %v4195_v52  ;;  %5013 = vrsqrt.f32 %v4198_v62 }
0x199c   :  { %5015 = vrsqrt.f32 %v4197_v63 }
0x19a7   :  { %v5014_v42 = vpop.eup %5013 }
0x19a8   :  { %v4202_v4 = vmul.f32 %v5014_v42, %v4185_v47 }
0x19a9   :  { %v5016_v0 = vpop.eup %5015 }
0x19aa   :  { %v4201_v1 = vmul.f32 %v5016_v0, %v4184_v21  ;;  %v4210_v8 = vmul.f32 %v4465_v2, %v4202_v4 }
0x19ac   :  { %v4209_v3 = vmul.f32 %v4465_v2, %v4201_v1 }
0x19ae   :  { %4466 = vmatmul.mubr.msk.f32.vlgmr.msra.gmra.mxu0 %vm182_vm2, %v4209_v3 }
0x19af   :  { %4303 = vmatprep.mubr.f32.mxu0 %v5047_v48 }
0x19b2   :  { %4467 = vmatmul.mubr.msk.f32.gmra.mxu0 %vm182_vm2, %v4210_v8 }
0x1a6e   :  { %v4299_v9 = vpop.f32.mrf.mxu0 }
0x1a6f   :  { %4310 = vst [vmem:[#allocation2] sm:$0xff] %v4299_v9 }
0x1a70   :  { %v4301_v5 = vpop.f32.mrf.mxu0 }
0x1a71   :  { %4311 = vst [vmem:[#allocation2 + $0x8] sm:$0xff] %v4301_v5 }
0x1a72   :  { %v4305_v10 = vpop.f32.mrf.mxu0 }
0x1a73   :  { %4312 = vst [vmem:[#allocation2 + $0x10] sm:$0xff] %v4305_v10 }
0x1a74   :  { %v4307_v11 = vpop.f32.mrf.mxu0 }
0x1a75   :  { %4313 = vst [vmem:[#allocation2 + $0x18] sm:$0xff] %v4307_v11 }
0x1a76   :  { %5034 = shalt.err (!%p5031_p4)
}
0x1a77   :  { %s5065_s27 = smov 256  }
0x1a78   :  { %4325 = dma.vmem_to_hbm [thread:$0]  %s4320_s23, 512, %s6340_s13, [#allocation3], %s5065_s27, %s5065_s27, %s5053_s26  }
0x1a79   :  { %5043 = dma.done.wait [#allocation3], 512  }
0x1a7a   :  { %5044 = vsyncadd [#allocation3], 4294966784 }
0x1a7b   :  { %4329 = vsyncpa [#allocation3], 1 }

</bundles_post_ra>
